<compile_context>
chip_gen: v6e
topology: v6e:2x2x1
jax: 0.10.0
libtpu: 0.0.40
codegen_flags: <defaults>
</compile_context>

<pallas_src>
import functools

import jax
import jax.numpy as jnp
from jax.experimental import pallas as pl
from jax.experimental.pallas import tpu as pltpu

_EPS = 1e-5


# ----------------------------- Pallas kernel --------------------------------

def _fused_bottleneck_kernel(x_ref, mask_ref, w1_ref, b1_ref, w2_ref, b2_ref,
                             w3_ref, b3_ref, o_ref, stack_ref,
                             *, H, W, M, taps_per_dot, do_act):
    """NB batch elements of the full bottleneck, channels-on-sublanes layout.

      x_ref   : (NB, C, M)           M = D*H*W flattened spatial (lanes)
      mask_ref: (27, NB*M)           per-tap 0/1 boundary masks (f32)
      w1_ref  : (Cmid, C)            BN scale folded into weights (cd)
      b1_ref  : (Cmid, 1)            folded BN shift (f32)
      w2_ref  : (Cmid, 27*Cmid)      tap-major im2col weights (cd)
      b2_ref  : (Cmid, 1)
      w3_ref  : (C, Cmid)
      b3_ref  : (C, 1)
      o_ref   : (NB, C, M)           f32 output
      stack_ref: (taps_per_dot*Cmid, NB*M) f32 im2col scratch
    """
    NB = x_ref.shape[0]
    cmid = w1_ref.shape[0]
    L = NB * M
    HW = H * W
    cd = w1_ref.dtype                        # MXU operand dtype (bf16 or f32)

    # -- stage 1: 1x1x1 conv (C -> Cmid) + folded BN + ReLU ------------------
    # One matmul per batch element, concatenated along lanes so stages 2/3 see
    # a single fat (Cmid, NB*M) operand (lane concat at M-aligned offsets).
    parts = [jnp.dot(w1_ref[...], x_ref[n], preferred_element_type=jnp.float32)
             for n in range(NB)]
    y1 = parts[0] if NB == 1 else jnp.concatenate(parts, axis=1)    # (Cmid, L)
    y1 = jnp.maximum(y1 + b1_ref[...], 0.0)

    # -- stage 2: 3x3x3 conv, padding=1, + folded BN + ReLU ------------------
    # im2col via XLU lane rotates: roll brings y1[., p+off] to lane p; rolled
    # wrap-around / cross-batch lanes are exactly the out-of-bounds positions
    # and are zeroed by the boundary mask (folded into the stacking store).
    y2 = None
    for g0 in range(0, 27, taps_per_dot):
        for j in range(taps_per_dot):
            t = g0 + j
            kd, kh, kw = t // 9, (t // 3) % 3, t % 3
            off = (kd - 1) * HW + (kh - 1) * W + (kw - 1)
            if off == 0:
                tap = y1                                  # centre tap in-bounds
            else:
                tap = (pltpu.roll(y1, (-off) % L, 1)
                       * mask_ref[t:t + 1, :])
            stack_ref[j * cmid:(j + 1) * cmid, :] = tap
        part = jnp.dot(w2_ref[:, g0 * cmid:(g0 + taps_per_dot) * cmid],
                       stack_ref[...].astype(cd),
                       preferred_element_type=jnp.float32)
        y2 = part if g0 == 0 else y2 + part
    y2 = jnp.maximum(y2 + b2_ref[...], 0.0)                          # (Cmid, L)

    # -- stage 3: 1x1x1 conv (Cmid -> C) + folded BN + optional ReLU ---------
    y3 = jnp.dot(w3_ref[...], y2.astype(cd), preferred_element_type=jnp.float32)
    y3 = y3 + b3_ref[...]
    if do_act:
        y3 = jnp.maximum(y3, 0.0)
    for n in range(NB):
        o_ref[n] = y3[:, n * M:(n + 1) * M].astype(o_ref.dtype)     # lane-dense


# ------------------------------ host wrapper ---------------------------------

def _fold_bn(conv_bias, gamma, beta, mean, var, eps=_EPS):
    scale = gamma / jnp.sqrt(var + eps)
    shift = beta + scale * (conv_bias - mean)
    return scale, shift


def _tap_masks(D, H, W):
    """(27, D*H*W) 0/1 masks marking in-bounds inputs for each 3x3x3 tap."""
    d = jnp.arange(D).reshape(D, 1, 1)
    h = jnp.arange(H).reshape(1, H, 1)
    w = jnp.arange(W).reshape(1, 1, W)
    masks = []
    for od in (-1, 0, 1):
        for oh in (-1, 0, 1):
            for ow in (-1, 0, 1):
                m = ((d + od >= 0) & (d + od < D) &
                     (h + oh >= 0) & (h + oh < H) &
                     (w + ow >= 0) & (w + ow < W))
                masks.append(m.reshape(-1))
    return jnp.stack(masks).astype(jnp.float32)


def bott_conv_bn_relu_3d(x_ncdhw, p, *, do_act=True,
                         compute_dtype=jnp.bfloat16):
    """Forward pass of BottConvBnRelu3d. Input/output are NCDHW (PyTorch)."""
    N, C, D, H, W = x_ncdhw.shape
    M = D * H * W
    cmid = p["w1_pt"].shape[0]
    cd = jnp.dtype(compute_dtype)

    # Fold eval-mode BN: scale goes into the weights, shift stays in epilogue.
    s1, sh1 = _fold_bn(p["b1"], p["g1"], p["be1"], p["m1"], p["v1"])
    s2, sh2 = _fold_bn(p["b2"], p["g2"], p["be2"], p["m2"], p["v2"])
    s3, sh3 = _fold_bn(p["b3"], p["g3"], p["be3"], p["m3"], p["v3"])

    w1 = (p["w1_pt"].reshape(cmid, C) * s1[:, None]).astype(cd)      # (Cmid, C)
    w2 = jnp.transpose(p["w2_pt"], (2, 3, 4, 0, 1)).reshape(27, cmid, cmid)
    w2 = w2 * s2[None, :, None]                                      # (27,Co,Ci)
    # (Cmid, 27*Cmid), tap-major columns matching the im2col stack order.
    w2f = jnp.transpose(w2, (1, 0, 2)).reshape(cmid, 27 * cmid).astype(cd)
    w3 = (p["w3_pt"].reshape(C, cmid) * s3[:, None]).astype(cd)      # (C, Cmid)
    b1 = sh1.reshape(cmid, 1).astype(jnp.float32)
    b2 = sh2.reshape(cmid, 1).astype(jnp.float32)
    b3 = sh3.reshape(C, 1).astype(jnp.float32)

    # Fold NB batch elements into the lane axis per grid step (amortizes the
    # per-step overhead and fattens the stage-2/3 matmuls for tiny channels).
    nb = 1
    for cand in range(min(N, 8), 0, -1):
        if N % cand == 0 and cand * C * M * cd.itemsize <= (8 << 20):
            nb = cand
            break
    L = nb * M

    masks = jnp.tile(_tap_masks(D, H, W), (1, nb))                   # (27, L)

    # Native channel-major layout: contiguous reshape only (no host transpose).
    # Cast to the MXU operand dtype on the host (halves x DMA bytes for bf16).
    x_flat = x_ncdhw.reshape(N, C, M).astype(cd)

    # Taps per stacked matmul: largest divisor of 27 whose im2col scratch
    # stays modest (27 -> single K = 27*Cmid contraction for small volumes).
    taps_per_dot = 1
    for g in (27, 9, 3, 1):
        if g * cmid * L * 4 <= (6 << 20):
            taps_per_dot = g
            break

    # Scoped-VMEM budget: double-buffered x/out blocks + masks + weights +
    # im2col scratch + activation temporaries, with headroom.
    est = (2 * nb * C * M * cd.itemsize              # x blocks
           + 2 * nb * C * M * 4                      # out blocks
           + 2 * 27 * L * 4                          # masks
           + 2 * (cmid * C + 27 * cmid * cmid + C * cmid) * cd.itemsize
           + taps_per_dot * cmid * L * 4             # im2col scratch
           + (3 * cmid + 2 * C) * L * 4)             # y1/y2/y3 temporaries
    vmem_limit = int(min(max(2 * est + (8 << 20), 32 << 20), 64 << 20))

    kernel = functools.partial(_fused_bottleneck_kernel, H=H, W=W, M=M,
                               taps_per_dot=taps_per_dot, do_act=do_act)
    out = pl.pallas_call(
        kernel,
        out_shape=jax.ShapeDtypeStruct((N, C, M), jnp.float32),
        grid_spec=pltpu.PrefetchScalarGridSpec(
            num_scalar_prefetch=0,
            grid=(N // nb,),
            in_specs=[
                pl.BlockSpec((nb, C, M), lambda n: (n, 0, 0)),
                pl.BlockSpec((27, L), lambda n: (0, 0)),
                pl.BlockSpec((cmid, C), lambda n: (0, 0)),
                pl.BlockSpec((cmid, 1), lambda n: (0, 0)),
                pl.BlockSpec((cmid, 27 * cmid), lambda n: (0, 0)),
                pl.BlockSpec((cmid, 1), lambda n: (0, 0)),
                pl.BlockSpec((C, cmid), lambda n: (0, 0)),
                pl.BlockSpec((C, 1), lambda n: (0, 0)),
            ],
            out_specs=pl.BlockSpec((nb, C, M), lambda n: (n, 0, 0)),
            scratch_shapes=[pltpu.VMEM((taps_per_dot * cmid, L), jnp.float32)],
        ),
        compiler_params=pltpu.CompilerParams(
            dimension_semantics=("parallel",),
            vmem_limit_bytes=vmem_limit),
    )(x_flat, masks, w1, b1, w2f, b2, w3, b3)

    return out.reshape(N, C, D, H, W)


# ------------------------------ params / init --------------------------------

def init_params(key, channels, ratio):
    cmid = channels // ratio
    ks = jax.random.split(key, 12)

    def nrm(k, shape, s=0.1):
        return s * jax.random.normal(k, shape, jnp.float32)

    # PyTorch conv weight layout: (Cout, Cin, kD, kH, kW)
    p = {
        "w1_pt": nrm(ks[0], (cmid, channels, 1, 1, 1)),
        "b1": nrm(ks[1], (cmid,)),
        "g1": 1.0 + nrm(ks[2], (cmid,)),
        "be1": nrm(ks[3], (cmid,)),
        "w2_pt": nrm(ks[4], (cmid, cmid, 3, 3, 3)),
        "b2": nrm(ks[5], (cmid,)),
        "g2": 1.0 + nrm(ks[6], (cmid,)),
        "be2": nrm(ks[7], (cmid,)),
        "w3_pt": nrm(ks[8], (channels, cmid, 1, 1, 1)),
        "b3": nrm(ks[9], (channels,)),
        "g3": 1.0 + nrm(ks[10], (channels,)),
        "be3": nrm(ks[11], (channels,)),
        "m1": jnp.zeros((cmid,)), "v1": jnp.ones((cmid,)),
        "m2": jnp.zeros((cmid,)), "v2": jnp.ones((cmid,)),
        "m3": jnp.zeros((channels,)), "v3": jnp.ones((channels,)),
    }
    return p


# --------------------------- pure-JAX reference ------------------------------

def _ref_conv_bn_relu(x, w_pt, b, gamma, beta, mean, var, padding, do_act):
    y = jax.lax.conv_general_dilated(
        x, w_pt, window_strides=(1, 1, 1),
        padding=[(padding, padding)] * 3,
        dimension_numbers=("NCDHW", "OIDHW", "NCDHW"))

    def bc(v):
        return v.reshape(1, -1, 1, 1, 1)

    y = y + bc(b)
    y = bc(gamma) * (y - bc(mean)) / jnp.sqrt(bc(var) + _EPS) + bc(beta)
    if do_act:
        y = jnp.maximum(y, 0.0)
    return y


def _reference(x, p, do_act=True):
    y = _ref_conv_bn_relu(x, p["w1_pt"], p["b1"], p["g1"], p["be1"],
                          p["m1"], p["v1"], 0, True)
    y = _ref_conv_bn_relu(y, p["w2_pt"], p["b2"], p["g2"], p["be2"],
                          p["m2"], p["v2"], 1, True)
    y = _ref_conv_bn_relu(y, p["w3_pt"], p["b3"], p["g3"], p["be3"],
                          p["m3"], p["v3"], 0, do_act)
    return y


# ---------------------------------- main -------------------------------------

if __name__ == "__main__":
    channels, ratio = 8, 2
    N, D, H, W = 2, 8, 8, 8

    key = jax.random.PRNGKey(0)
    kx, kp = jax.random.split(key)
    x = jax.random.normal(kx, (N, channels, D, H, W), jnp.float32)   # NCDHW
    params = init_params(kp, channels, ratio)

    ref = _reference(x, params, do_act=True)
    assert ref.shape == (N, channels, D, H, W)

    # f32 MXU operands: tight check against the f32 XLA reference.
    out_f32 = jax.block_until_ready(
        bott_conv_bn_relu_3d(x, params, do_act=True,
                             compute_dtype=jnp.float32))
    assert out_f32.shape == ref.shape
    assert jnp.allclose(out_f32, ref, atol=1e-4, rtol=1e-4), (
        float(jnp.max(jnp.abs(out_f32 - ref))))

    # bf16 MXU operands with f32 accumulation: the deployment configuration.
    out_bf16 = jax.block_until_ready(
        bott_conv_bn_relu_3d(x, params, do_act=True,
                             compute_dtype=jnp.bfloat16))
    assert out_bf16.shape == ref.shape
    assert jnp.allclose(out_bf16, ref, atol=5e-2, rtol=5e-2), (
        float(jnp.max(jnp.abs(out_bf16 - ref))))

    print("KERNEL_OK")
</pallas_src>

<mosaic_0001>
module attributes {stable_mosaic.version = 11 : i64} {
  func.func @_fused_bottleneck_kernel(%arg0: i32, %arg1: memref<2x8x512xf32, #tpu.memory_space<vmem>>, %arg2: memref<27x1024xf32, #tpu.memory_space<vmem>>, %arg3: memref<4x8xf32, #tpu.memory_space<vmem>>, %arg4: memref<4x1xf32, #tpu.memory_space<vmem>>, %arg5: memref<4x108xf32, #tpu.memory_space<vmem>>, %arg6: memref<4x1xf32, #tpu.memory_space<vmem>>, %arg7: memref<8x4xf32, #tpu.memory_space<vmem>>, %arg8: memref<8x1xf32, #tpu.memory_space<vmem>>, %arg9: memref<2x8x512xf32, #tpu.memory_space<vmem>>, %arg10: memref<108x1024xf32, #tpu.memory_space<vmem>>) attributes {dimension_semantics = [#tpu.dimension_semantics<parallel>], iteration_bounds = array<i64: 1>, scalar_prefetch = 0 : i64, scratch_operands = 1 : i64, tpu.core_type = #tpu.core_type<tc>, window_params = [{transform_indices = @transform_0, window_bounds = array<i64: 2, 8, 512>}, {pipeline_mode = #tpu.pipeline_mode<synchronous>, transform_indices = @transform_1, window_bounds = array<i64: 27, 1024>}, {pipeline_mode = #tpu.pipeline_mode<synchronous>, transform_indices = @transform_2, window_bounds = array<i64: 4, 8>}, {pipeline_mode = #tpu.pipeline_mode<synchronous>, transform_indices = @transform_3, window_bounds = array<i64: 4, 1>}, {pipeline_mode = #tpu.pipeline_mode<synchronous>, transform_indices = @transform_4, window_bounds = array<i64: 4, 108>}, {pipeline_mode = #tpu.pipeline_mode<synchronous>, transform_indices = @transform_5, window_bounds = array<i64: 4, 1>}, {pipeline_mode = #tpu.pipeline_mode<synchronous>, transform_indices = @transform_6, window_bounds = array<i64: 8, 4>}, {pipeline_mode = #tpu.pipeline_mode<synchronous>, transform_indices = @transform_7, window_bounds = array<i64: 8, 1>}, {transform_indices = @transform_8, window_bounds = array<i64: 2, 8, 512>}]} {
    %c0 = arith.constant 0 : index
    %c0_0 = arith.constant 0 : index
    %0 = vector.load %arg3[%c0, %c0_0] : memref<4x8xf32, #tpu.memory_space<vmem>>, vector<4x8xf32>
    %c0_1 = arith.constant 0 : index
    %c0_2 = arith.constant 0 : index
    %c0_3 = arith.constant 0 : index
    %1 = vector.load %arg1[%c0_1, %c0_2, %c0_3] : memref<2x8x512xf32, #tpu.memory_space<vmem>>, vector<1x8x512xf32>
    %2 = vector.shape_cast %1 : vector<1x8x512xf32> to vector<8x512xf32>
    %cst = arith.constant dense<0.000000e+00> : vector<4x512xf32>
    %3 = tpu.matmul %0, %2, %cst {dimension_numbers = #tpu.dot_dimension_numbers<[1], [0], [0], [1], [0, 0, 1, 1], [], []>} : vector<4x8xf32>, vector<8x512xf32>, vector<4x512xf32> -> vector<4x512xf32>
    %c0_4 = arith.constant 0 : index
    %c0_5 = arith.constant 0 : index
    %4 = vector.load %arg3[%c0_4, %c0_5] : memref<4x8xf32, #tpu.memory_space<vmem>>, vector<4x8xf32>
    %c1 = arith.constant 1 : index
    %c0_6 = arith.constant 0 : index
    %c0_7 = arith.constant 0 : index
    %5 = vector.load %arg1[%c1, %c0_6, %c0_7] : memref<2x8x512xf32, #tpu.memory_space<vmem>>, vector<1x8x512xf32>
    %6 = vector.shape_cast %5 : vector<1x8x512xf32> to vector<8x512xf32>
    %cst_8 = arith.constant dense<0.000000e+00> : vector<4x512xf32>
    %7 = tpu.matmul %4, %6, %cst_8 {dimension_numbers = #tpu.dot_dimension_numbers<[1], [0], [0], [1], [0, 0, 1, 1], [], []>} : vector<4x8xf32>, vector<8x512xf32>, vector<4x512xf32> -> vector<4x512xf32>
    %8 = tpu.concatenate %3, %7 in 1 : vector<4x512xf32>, vector<4x512xf32> -> vector<4x1024xf32>
    %c0_9 = arith.constant 0 : index
    %c0_10 = arith.constant 0 : index
    %9 = vector.load %arg4[%c0_9, %c0_10] : memref<4x1xf32, #tpu.memory_space<vmem>>, vector<4x1xf32>
    %10 = vector.broadcast %9 : vector<4x1xf32> to vector<4x1024xf32>
    %11 = arith.addf %8, %10 : vector<4x1024xf32>
    %cst_11 = arith.constant 0.000000e+00 : f32
    %12 = vector.broadcast %cst_11 : f32 to vector<4x1024xf32>
    %13 = arith.maximumf %11, %12 : vector<4x1024xf32>
    %c73_i32 = arith.constant 73 : i32
    %14 = tpu.dynamic_rotate %13 by %c73_i32 dim 1 : vector<4x1024xf32>, i32 -> vector<4x1024xf32>
    %c0_12 = arith.constant 0 : index
    %c0_13 = arith.constant 0 : index
    %15 = vector.load %arg2[%c0_12, %c0_13] : memref<27x1024xf32, #tpu.memory_space<vmem>>, vector<1x1024xf32>
    %16 = vector.broadcast %15 : vector<1x1024xf32> to vector<4x1024xf32>
    %17 = arith.mulf %14, %16 : vector<4x1024xf32>
    %c0_14 = arith.constant 0 : index
    %c0_15 = arith.constant 0 : index
    %18 = vector.load %arg10[%c0_14, %c0_15] : memref<108x1024xf32, #tpu.memory_space<vmem>>, vector<4x1024xf32>
    tpu.vector_store %arg10[%c0_14, %c0_15], %17 {strides = array<i32>} : memref<108x1024xf32, #tpu.memory_space<vmem>>, vector<4x1024xf32>,
    %c72_i32 = arith.constant 72 : i32
    %19 = tpu.dynamic_rotate %13 by %c72_i32 dim 1 : vector<4x1024xf32>, i32 -> vector<4x1024xf32>
    %c1_16 = arith.constant 1 : index
    %c0_17 = arith.constant 0 : index
    %20 = vector.load %arg2[%c1_16, %c0_17] : memref<27x1024xf32, #tpu.memory_space<vmem>>, vector<1x1024xf32>
    %21 = vector.broadcast %20 : vector<1x1024xf32> to vector<4x1024xf32>
    %22 = arith.mulf %19, %21 : vector<4x1024xf32>
    %c4 = arith.constant 4 : index
    %c0_18 = arith.constant 0 : index
    %23 = vector.load %arg10[%c4, %c0_18] : memref<108x1024xf32, #tpu.memory_space<vmem>>, vector<4x1024xf32>
    tpu.vector_store %arg10[%c4, %c0_18], %22 {strides = array<i32>} : memref<108x1024xf32, #tpu.memory_space<vmem>>, vector<4x1024xf32>,
    %c71_i32 = arith.constant 71 : i32
    %24 = tpu.dynamic_rotate %13 by %c71_i32 dim 1 : vector<4x1024xf32>, i32 -> vector<4x1024xf32>
    %c2 = arith.constant 2 : index
    %c0_19 = arith.constant 0 : index
    %25 = vector.load %arg2[%c2, %c0_19] : memref<27x1024xf32, #tpu.memory_space<vmem>>, vector<1x1024xf32>
    %26 = vector.broadcast %25 : vector<1x1024xf32> to vector<4x1024xf32>
    %27 = arith.mulf %24, %26 : vector<4x1024xf32>
    %c8 = arith.constant 8 : index
    %c0_20 = arith.constant 0 : index
    %28 = vector.load %arg10[%c8, %c0_20] : memref<108x1024xf32, #tpu.memory_space<vmem>>, vector<4x1024xf32>
    tpu.vector_store %arg10[%c8, %c0_20], %27 {strides = array<i32>} : memref<108x1024xf32, #tpu.memory_space<vmem>>, vector<4x1024xf32>,
    %c65_i32 = arith.constant 65 : i32
    %29 = tpu.dynamic_rotate %13 by %c65_i32 dim 1 : vector<4x1024xf32>, i32 -> vector<4x1024xf32>
    %c3 = arith.constant 3 : index
    %c0_21 = arith.constant 0 : index
    %30 = vector.load %arg2[%c3, %c0_21] : memref<27x1024xf32, #tpu.memory_space<vmem>>, vector<1x1024xf32>
    %31 = vector.broadcast %30 : vector<1x1024xf32> to vector<4x1024xf32>
    %32 = arith.mulf %29, %31 : vector<4x1024xf32>
    %c12 = arith.constant 12 : index
    %c0_22 = arith.constant 0 : index
    %33 = vector.load %arg10[%c12, %c0_22] : memref<108x1024xf32, #tpu.memory_space<vmem>>, vector<4x1024xf32>
    tpu.vector_store %arg10[%c12, %c0_22], %32 {strides = array<i32>} : memref<108x1024xf32, #tpu.memory_space<vmem>>, vector<4x1024xf32>,
    %c64_i32 = arith.constant 64 : i32
    %34 = tpu.dynamic_rotate %13 by %c64_i32 dim 1 : vector<4x1024xf32>, i32 -> vector<4x1024xf32>
    %c4_23 = arith.constant 4 : index
    %c0_24 = arith.constant 0 : index
    %35 = vector.load %arg2[%c4_23, %c0_24] : memref<27x1024xf32, #tpu.memory_space<vmem>>, vector<1x1024xf32>
    %36 = vector.broadcast %35 : vector<1x1024xf32> to vector<4x1024xf32>
    %37 = arith.mulf %34, %36 : vector<4x1024xf32>
    %c16 = arith.constant 16 : index
    %c0_25 = arith.constant 0 : index
    %38 = vector.load %arg10[%c16, %c0_25] : memref<108x1024xf32, #tpu.memory_space<vmem>>, vector<4x1024xf32>
    tpu.vector_store %arg10[%c16, %c0_25], %37 {strides = array<i32>} : memref<108x1024xf32, #tpu.memory_space<vmem>>, vector<4x1024xf32>,
    %c63_i32 = arith.constant 63 : i32
    %39 = tpu.dynamic_rotate %13 by %c63_i32 dim 1 : vector<4x1024xf32>, i32 -> vector<4x1024xf32>
    %c5 = arith.constant 5 : index
    %c0_26 = arith.constant 0 : index
    %40 = vector.load %arg2[%c5, %c0_26] : memref<27x1024xf32, #tpu.memory_space<vmem>>, vector<1x1024xf32>
    %41 = vector.broadcast %40 : vector<1x1024xf32> to vector<4x1024xf32>
    %42 = arith.mulf %39, %41 : vector<4x1024xf32>
    %c20 = arith.constant 20 : index
    %c0_27 = arith.constant 0 : index
    %43 = vector.load %arg10[%c20, %c0_27] : memref<108x1024xf32, #tpu.memory_space<vmem>>, vector<4x1024xf32>
    tpu.vector_store %arg10[%c20, %c0_27], %42 {strides = array<i32>} : memref<108x1024xf32, #tpu.memory_space<vmem>>, vector<4x1024xf32>,
    %c57_i32 = arith.constant 57 : i32
    %44 = tpu.dynamic_rotate %13 by %c57_i32 dim 1 : vector<4x1024xf32>, i32 -> vector<4x1024xf32>
    %c6 = arith.constant 6 : index
    %c0_28 = arith.constant 0 : index
    %45 = vector.load %arg2[%c6, %c0_28] : memref<27x1024xf32, #tpu.memory_space<vmem>>, vector<1x1024xf32>
    %46 = vector.broadcast %45 : vector<1x1024xf32> to vector<4x1024xf32>
    %47 = arith.mulf %44, %46 : vector<4x1024xf32>
    %c24 = arith.constant 24 : index
    %c0_29 = arith.constant 0 : index
    %48 = vector.load %arg10[%c24, %c0_29] : memref<108x1024xf32, #tpu.memory_space<vmem>>, vector<4x1024xf32>
    tpu.vector_store %arg10[%c24, %c0_29], %47 {strides = array<i32>} : memref<108x1024xf32, #tpu.memory_space<vmem>>, vector<4x1024xf32>,
    %c56_i32 = arith.constant 56 : i32
    %49 = tpu.dynamic_rotate %13 by %c56_i32 dim 1 : vector<4x1024xf32>, i32 -> vector<4x1024xf32>
    %c7 = arith.constant 7 : index
    %c0_30 = arith.constant 0 : index
    %50 = vector.load %arg2[%c7, %c0_30] : memref<27x1024xf32, #tpu.memory_space<vmem>>, vector<1x1024xf32>
    %51 = vector.broadcast %50 : vector<1x1024xf32> to vector<4x1024xf32>
    %52 = arith.mulf %49, %51 : vector<4x1024xf32>
    %c28 = arith.constant 28 : index
    %c0_31 = arith.constant 0 : index
    %53 = vector.load %arg10[%c28, %c0_31] : memref<108x1024xf32, #tpu.memory_space<vmem>>, vector<4x1024xf32>
    tpu.vector_store %arg10[%c28, %c0_31], %52 {strides = array<i32>} : memref<108x1024xf32, #tpu.memory_space<vmem>>, vector<4x1024xf32>,
    %c55_i32 = arith.constant 55 : i32
    %54 = tpu.dynamic_rotate %13 by %c55_i32 dim 1 : vector<4x1024xf32>, i32 -> vector<4x1024xf32>
    %c8_32 = arith.constant 8 : index
    %c0_33 = arith.constant 0 : index
    %55 = vector.load %arg2[%c8_32, %c0_33] : memref<27x1024xf32, #tpu.memory_space<vmem>>, vector<1x1024xf32>
    %56 = vector.broadcast %55 : vector<1x1024xf32> to vector<4x1024xf32>
    %57 = arith.mulf %54, %56 : vector<4x1024xf32>
    %c32 = arith.constant 32 : index
    %c0_34 = arith.constant 0 : index
    %58 = vector.load %arg10[%c32, %c0_34] : memref<108x1024xf32, #tpu.memory_space<vmem>>, vector<4x1024xf32>
    tpu.vector_store %arg10[%c32, %c0_34], %57 {strides = array<i32>} : memref<108x1024xf32, #tpu.memory_space<vmem>>, vector<4x1024xf32>,
    %c9_i32 = arith.constant 9 : i32
    %59 = tpu.dynamic_rotate %13 by %c9_i32 dim 1 : vector<4x1024xf32>, i32 -> vector<4x1024xf32>
    %c9 = arith.constant 9 : index
    %c0_35 = arith.constant 0 : index
    %60 = vector.load %arg2[%c9, %c0_35] : memref<27x1024xf32, #tpu.memory_space<vmem>>, vector<1x1024xf32>
    %61 = vector.broadcast %60 : vector<1x1024xf32> to vector<4x1024xf32>
    %62 = arith.mulf %59, %61 : vector<4x1024xf32>
    %c36 = arith.constant 36 : index
    %c0_36 = arith.constant 0 : index
    %63 = vector.load %arg10[%c36, %c0_36] : memref<108x1024xf32, #tpu.memory_space<vmem>>, vector<4x1024xf32>
    tpu.vector_store %arg10[%c36, %c0_36], %62 {strides = array<i32>} : memref<108x1024xf32, #tpu.memory_space<vmem>>, vector<4x1024xf32>,
    %c8_i32 = arith.constant 8 : i32
    %64 = tpu.dynamic_rotate %13 by %c8_i32 dim 1 : vector<4x1024xf32>, i32 -> vector<4x1024xf32>
    %c10 = arith.constant 10 : index
    %c0_37 = arith.constant 0 : index
    %65 = vector.load %arg2[%c10, %c0_37] : memref<27x1024xf32, #tpu.memory_space<vmem>>, vector<1x1024xf32>
    %66 = vector.broadcast %65 : vector<1x1024xf32> to vector<4x1024xf32>
    %67 = arith.mulf %64, %66 : vector<4x1024xf32>
    %c40 = arith.constant 40 : index
    %c0_38 = arith.constant 0 : index
    %68 = vector.load %arg10[%c40, %c0_38] : memref<108x1024xf32, #tpu.memory_space<vmem>>, vector<4x1024xf32>
    tpu.vector_store %arg10[%c40, %c0_38], %67 {strides = array<i32>} : memref<108x1024xf32, #tpu.memory_space<vmem>>, vector<4x1024xf32>,
    %c7_i32 = arith.constant 7 : i32
    %69 = tpu.dynamic_rotate %13 by %c7_i32 dim 1 : vector<4x1024xf32>, i32 -> vector<4x1024xf32>
    %c11 = arith.constant 11 : index
    %c0_39 = arith.constant 0 : index
    %70 = vector.load %arg2[%c11, %c0_39] : memref<27x1024xf32, #tpu.memory_space<vmem>>, vector<1x1024xf32>
    %71 = vector.broadcast %70 : vector<1x1024xf32> to vector<4x1024xf32>
    %72 = arith.mulf %69, %71 : vector<4x1024xf32>
    %c44 = arith.constant 44 : index
    %c0_40 = arith.constant 0 : index
    %73 = vector.load %arg10[%c44, %c0_40] : memref<108x1024xf32, #tpu.memory_space<vmem>>, vector<4x1024xf32>
    tpu.vector_store %arg10[%c44, %c0_40], %72 {strides = array<i32>} : memref<108x1024xf32, #tpu.memory_space<vmem>>, vector<4x1024xf32>,
    %c1_i32 = arith.constant 1 : i32
    %74 = tpu.dynamic_rotate %13 by %c1_i32 dim 1 : vector<4x1024xf32>, i32 -> vector<4x1024xf32>
    %c12_41 = arith.constant 12 : index
    %c0_42 = arith.constant 0 : index
    %75 = vector.load %arg2[%c12_41, %c0_42] : memref<27x1024xf32, #tpu.memory_space<vmem>>, vector<1x1024xf32>
    %76 = vector.broadcast %75 : vector<1x1024xf32> to vector<4x1024xf32>
    %77 = arith.mulf %74, %76 : vector<4x1024xf32>
    %c48 = arith.constant 48 : index
    %c0_43 = arith.constant 0 : index
    %78 = vector.load %arg10[%c48, %c0_43] : memref<108x1024xf32, #tpu.memory_space<vmem>>, vector<4x1024xf32>
    tpu.vector_store %arg10[%c48, %c0_43], %77 {strides = array<i32>} : memref<108x1024xf32, #tpu.memory_space<vmem>>, vector<4x1024xf32>,
    %c52 = arith.constant 52 : index
    %c0_44 = arith.constant 0 : index
    %79 = vector.load %arg10[%c52, %c0_44] : memref<108x1024xf32, #tpu.memory_space<vmem>>, vector<4x1024xf32>
    tpu.vector_store %arg10[%c52, %c0_44], %13 {strides = array<i32>} : memref<108x1024xf32, #tpu.memory_space<vmem>>, vector<4x1024xf32>,
    %c1023_i32 = arith.constant 1023 : i32
    %80 = tpu.dynamic_rotate %13 by %c1023_i32 dim 1 : vector<4x1024xf32>, i32 -> vector<4x1024xf32>
    %c14 = arith.constant 14 : index
    %c0_45 = arith.constant 0 : index
    %81 = vector.load %arg2[%c14, %c0_45] : memref<27x1024xf32, #tpu.memory_space<vmem>>, vector<1x1024xf32>
    %82 = vector.broadcast %81 : vector<1x1024xf32> to vector<4x1024xf32>
    %83 = arith.mulf %80, %82 : vector<4x1024xf32>
    %c56 = arith.constant 56 : index
    %c0_46 = arith.constant 0 : index
    %84 = vector.load %arg10[%c56, %c0_46] : memref<108x1024xf32, #tpu.memory_space<vmem>>, vector<4x1024xf32>
    tpu.vector_store %arg10[%c56, %c0_46], %83 {strides = array<i32>} : memref<108x1024xf32, #tpu.memory_space<vmem>>, vector<4x1024xf32>,
    %c1017_i32 = arith.constant 1017 : i32
    %85 = tpu.dynamic_rotate %13 by %c1017_i32 dim 1 : vector<4x1024xf32>, i32 -> vector<4x1024xf32>
    %c15 = arith.constant 15 : index
    %c0_47 = arith.constant 0 : index
    %86 = vector.load %arg2[%c15, %c0_47] : memref<27x1024xf32, #tpu.memory_space<vmem>>, vector<1x1024xf32>
    %87 = vector.broadcast %86 : vector<1x1024xf32> to vector<4x1024xf32>
    %88 = arith.mulf %85, %87 : vector<4x1024xf32>
    %c60 = arith.constant 60 : index
    %c0_48 = arith.constant 0 : index
    %89 = vector.load %arg10[%c60, %c0_48] : memref<108x1024xf32, #tpu.memory_space<vmem>>, vector<4x1024xf32>
    tpu.vector_store %arg10[%c60, %c0_48], %88 {strides = array<i32>} : memref<108x1024xf32, #tpu.memory_space<vmem>>, vector<4x1024xf32>,
    %c1016_i32 = arith.constant 1016 : i32
    %90 = tpu.dynamic_rotate %13 by %c1016_i32 dim 1 : vector<4x1024xf32>, i32 -> vector<4x1024xf32>
    %c16_49 = arith.constant 16 : index
    %c0_50 = arith.constant 0 : index
    %91 = vector.load %arg2[%c16_49, %c0_50] : memref<27x1024xf32, #tpu.memory_space<vmem>>, vector<1x1024xf32>
    %92 = vector.broadcast %91 : vector<1x1024xf32> to vector<4x1024xf32>
    %93 = arith.mulf %90, %92 : vector<4x1024xf32>
    %c64 = arith.constant 64 : index
    %c0_51 = arith.constant 0 : index
    %94 = vector.load %arg10[%c64, %c0_51] : memref<108x1024xf32, #tpu.memory_space<vmem>>, vector<4x1024xf32>
    tpu.vector_store %arg10[%c64, %c0_51], %93 {strides = array<i32>} : memref<108x1024xf32, #tpu.memory_space<vmem>>, vector<4x1024xf32>,
    %c1015_i32 = arith.constant 1015 : i32
    %95 = tpu.dynamic_rotate %13 by %c1015_i32 dim 1 : vector<4x1024xf32>, i32 -> vector<4x1024xf32>
    %c17 = arith.constant 17 : index
    %c0_52 = arith.constant 0 : index
    %96 = vector.load %arg2[%c17, %c0_52] : memref<27x1024xf32, #tpu.memory_space<vmem>>, vector<1x1024xf32>
    %97 = vector.broadcast %96 : vector<1x1024xf32> to vector<4x1024xf32>
    %98 = arith.mulf %95, %97 : vector<4x1024xf32>
    %c68 = arith.constant 68 : index
    %c0_53 = arith.constant 0 : index
    %99 = vector.load %arg10[%c68, %c0_53] : memref<108x1024xf32, #tpu.memory_space<vmem>>, vector<4x1024xf32>
    tpu.vector_store %arg10[%c68, %c0_53], %98 {strides = array<i32>} : memref<108x1024xf32, #tpu.memory_space<vmem>>, vector<4x1024xf32>,
    %c969_i32 = arith.constant 969 : i32
    %100 = tpu.dynamic_rotate %13 by %c969_i32 dim 1 : vector<4x1024xf32>, i32 -> vector<4x1024xf32>
    %c18 = arith.constant 18 : index
    %c0_54 = arith.constant 0 : index
    %101 = vector.load %arg2[%c18, %c0_54] : memref<27x1024xf32, #tpu.memory_space<vmem>>, vector<1x1024xf32>
    %102 = vector.broadcast %101 : vector<1x1024xf32> to vector<4x1024xf32>
    %103 = arith.mulf %100, %102 : vector<4x1024xf32>
    %c72 = arith.constant 72 : index
    %c0_55 = arith.constant 0 : index
    %104 = vector.load %arg10[%c72, %c0_55] : memref<108x1024xf32, #tpu.memory_space<vmem>>, vector<4x1024xf32>
    tpu.vector_store %arg10[%c72, %c0_55], %103 {strides = array<i32>} : memref<108x1024xf32, #tpu.memory_space<vmem>>, vector<4x1024xf32>,
    %c968_i32 = arith.constant 968 : i32
    %105 = tpu.dynamic_rotate %13 by %c968_i32 dim 1 : vector<4x1024xf32>, i32 -> vector<4x1024xf32>
    %c19 = arith.constant 19 : index
    %c0_56 = arith.constant 0 : index
    %106 = vector.load %arg2[%c19, %c0_56] : memref<27x1024xf32, #tpu.memory_space<vmem>>, vector<1x1024xf32>
    %107 = vector.broadcast %106 : vector<1x1024xf32> to vector<4x1024xf32>
    %108 = arith.mulf %105, %107 : vector<4x1024xf32>
    %c76 = arith.constant 76 : index
    %c0_57 = arith.constant 0 : index
    %109 = vector.load %arg10[%c76, %c0_57] : memref<108x1024xf32, #tpu.memory_space<vmem>>, vector<4x1024xf32>
    tpu.vector_store %arg10[%c76, %c0_57], %108 {strides = array<i32>} : memref<108x1024xf32, #tpu.memory_space<vmem>>, vector<4x1024xf32>,
    %c967_i32 = arith.constant 967 : i32
    %110 = tpu.dynamic_rotate %13 by %c967_i32 dim 1 : vector<4x1024xf32>, i32 -> vector<4x1024xf32>
    %c20_58 = arith.constant 20 : index
    %c0_59 = arith.constant 0 : index
    %111 = vector.load %arg2[%c20_58, %c0_59] : memref<27x1024xf32, #tpu.memory_space<vmem>>, vector<1x1024xf32>
    %112 = vector.broadcast %111 : vector<1x1024xf32> to vector<4x1024xf32>
    %113 = arith.mulf %110, %112 : vector<4x1024xf32>
    %c80 = arith.constant 80 : index
    %c0_60 = arith.constant 0 : index
    %114 = vector.load %arg10[%c80, %c0_60] : memref<108x1024xf32, #tpu.memory_space<vmem>>, vector<4x1024xf32>
    tpu.vector_store %arg10[%c80, %c0_60], %113 {strides = array<i32>} : memref<108x1024xf32, #tpu.memory_space<vmem>>, vector<4x1024xf32>,
    %c961_i32 = arith.constant 961 : i32
    %115 = tpu.dynamic_rotate %13 by %c961_i32 dim 1 : vector<4x1024xf32>, i32 -> vector<4x1024xf32>
    %c21 = arith.constant 21 : index
    %c0_61 = arith.constant 0 : index
    %116 = vector.load %arg2[%c21, %c0_61] : memref<27x1024xf32, #tpu.memory_space<vmem>>, vector<1x1024xf32>
    %117 = vector.broadcast %116 : vector<1x1024xf32> to vector<4x1024xf32>
    %118 = arith.mulf %115, %117 : vector<4x1024xf32>
    %c84 = arith.constant 84 : index
    %c0_62 = arith.constant 0 : index
    %119 = vector.load %arg10[%c84, %c0_62] : memref<108x1024xf32, #tpu.memory_space<vmem>>, vector<4x1024xf32>
    tpu.vector_store %arg10[%c84, %c0_62], %118 {strides = array<i32>} : memref<108x1024xf32, #tpu.memory_space<vmem>>, vector<4x1024xf32>,
    %c960_i32 = arith.constant 960 : i32
    %120 = tpu.dynamic_rotate %13 by %c960_i32 dim 1 : vector<4x1024xf32>, i32 -> vector<4x1024xf32>
    %c22 = arith.constant 22 : index
    %c0_63 = arith.constant 0 : index
    %121 = vector.load %arg2[%c22, %c0_63] : memref<27x1024xf32, #tpu.memory_space<vmem>>, vector<1x1024xf32>
    %122 = vector.broadcast %121 : vector<1x1024xf32> to vector<4x1024xf32>
    %123 = arith.mulf %120, %122 : vector<4x1024xf32>
    %c88 = arith.constant 88 : index
    %c0_64 = arith.constant 0 : index
    %124 = vector.load %arg10[%c88, %c0_64] : memref<108x1024xf32, #tpu.memory_space<vmem>>, vector<4x1024xf32>
    tpu.vector_store %arg10[%c88, %c0_64], %123 {strides = array<i32>} : memref<108x1024xf32, #tpu.memory_space<vmem>>, vector<4x1024xf32>,
    %c959_i32 = arith.constant 959 : i32
    %125 = tpu.dynamic_rotate %13 by %c959_i32 dim 1 : vector<4x1024xf32>, i32 -> vector<4x1024xf32>
    %c23 = arith.constant 23 : index
    %c0_65 = arith.constant 0 : index
    %126 = vector.load %arg2[%c23, %c0_65] : memref<27x1024xf32, #tpu.memory_space<vmem>>, vector<1x1024xf32>
    %127 = vector.broadcast %126 : vector<1x1024xf32> to vector<4x1024xf32>
    %128 = arith.mulf %125, %127 : vector<4x1024xf32>
    %c92 = arith.constant 92 : index
    %c0_66 = arith.constant 0 : index
    %129 = vector.load %arg10[%c92, %c0_66] : memref<108x1024xf32, #tpu.memory_space<vmem>>, vector<4x1024xf32>
    tpu.vector_store %arg10[%c92, %c0_66], %128 {strides = array<i32>} : memref<108x1024xf32, #tpu.memory_space<vmem>>, vector<4x1024xf32>,
    %c953_i32 = arith.constant 953 : i32
    %130 = tpu.dynamic_rotate %13 by %c953_i32 dim 1 : vector<4x1024xf32>, i32 -> vector<4x1024xf32>
    %c24_67 = arith.constant 24 : index
    %c0_68 = arith.constant 0 : index
    %131 = vector.load %arg2[%c24_67, %c0_68] : memref<27x1024xf32, #tpu.memory_space<vmem>>, vector<1x1024xf32>
    %132 = vector.broadcast %131 : vector<1x1024xf32> to vector<4x1024xf32>
    %133 = arith.mulf %130, %132 : vector<4x1024xf32>
    %c96 = arith.constant 96 : index
    %c0_69 = arith.constant 0 : index
    %134 = vector.load %arg10[%c96, %c0_69] : memref<108x1024xf32, #tpu.memory_space<vmem>>, vector<4x1024xf32>
    tpu.vector_store %arg10[%c96, %c0_69], %133 {strides = array<i32>} : memref<108x1024xf32, #tpu.memory_space<vmem>>, vector<4x1024xf32>,
    %c952_i32 = arith.constant 952 : i32
    %135 = tpu.dynamic_rotate %13 by %c952_i32 dim 1 : vector<4x1024xf32>, i32 -> vector<4x1024xf32>
    %c25 = arith.constant 25 : index
    %c0_70 = arith.constant 0 : index
    %136 = vector.load %arg2[%c25, %c0_70] : memref<27x1024xf32, #tpu.memory_space<vmem>>, vector<1x1024xf32>
    %137 = vector.broadcast %136 : vector<1x1024xf32> to vector<4x1024xf32>
    %138 = arith.mulf %135, %137 : vector<4x1024xf32>
    %c100 = arith.constant 100 : index
    %c0_71 = arith.constant 0 : index
    %139 = vector.load %arg10[%c100, %c0_71] : memref<108x1024xf32, #tpu.memory_space<vmem>>, vector<4x1024xf32>
    tpu.vector_store %arg10[%c100, %c0_71], %138 {strides = array<i32>} : memref<108x1024xf32, #tpu.memory_space<vmem>>, vector<4x1024xf32>,
    %c951_i32 = arith.constant 951 : i32
    %140 = tpu.dynamic_rotate %13 by %c951_i32 dim 1 : vector<4x1024xf32>, i32 -> vector<4x1024xf32>
    %c26 = arith.constant 26 : index
    %c0_72 = arith.constant 0 : index
    %141 = vector.load %arg2[%c26, %c0_72] : memref<27x1024xf32, #tpu.memory_space<vmem>>, vector<1x1024xf32>
    %142 = vector.broadcast %141 : vector<1x1024xf32> to vector<4x1024xf32>
    %143 = arith.mulf %140, %142 : vector<4x1024xf32>
    %c104 = arith.constant 104 : index
    %c0_73 = arith.constant 0 : index
    %144 = vector.load %arg10[%c104, %c0_73] : memref<108x1024xf32, #tpu.memory_space<vmem>>, vector<4x1024xf32>
    tpu.vector_store %arg10[%c104, %c0_73], %143 {strides = array<i32>} : memref<108x1024xf32, #tpu.memory_space<vmem>>, vector<4x1024xf32>,
    %c0_74 = arith.constant 0 : index
    %c0_75 = arith.constant 0 : index
    %145 = vector.load %arg5[%c0_74, %c0_75] : memref<4x108xf32, #tpu.memory_space<vmem>>, vector<4x108xf32>
    %c0_76 = arith.constant 0 : index
    %c0_77 = arith.constant 0 : index
    %146 = vector.load %arg10[%c0_76, %c0_77] : memref<108x1024xf32, #tpu.memory_space<vmem>>, vector<108x1024xf32>
    %cst_78 = arith.constant dense<0.000000e+00> : vector<4x1024xf32>
    %147 = tpu.matmul %145, %146, %cst_78 {dimension_numbers = #tpu.dot_dimension_numbers<[1], [0], [0], [1], [0, 0, 1, 1], [], []>} : vector<4x108xf32>, vector<108x1024xf32>, vector<4x1024xf32> -> vector<4x1024xf32>
    %c0_79 = arith.constant 0 : index
    %c0_80 = arith.constant 0 : index
    %148 = vector.load %arg6[%c0_79, %c0_80] : memref<4x1xf32, #tpu.memory_space<vmem>>, vector<4x1xf32>
    %149 = vector.broadcast %148 : vector<4x1xf32> to vector<4x1024xf32>
    %150 = arith.addf %147, %149 : vector<4x1024xf32>
    %cst_81 = arith.constant 0.000000e+00 : f32
    %151 = vector.broadcast %cst_81 : f32 to vector<4x1024xf32>
    %152 = arith.maximumf %150, %151 : vector<4x1024xf32>
    %c0_82 = arith.constant 0 : index
    %c0_83 = arith.constant 0 : index
    %153 = vector.load %arg7[%c0_82, %c0_83] : memref<8x4xf32, #tpu.memory_space<vmem>>, vector<8x4xf32>
    %cst_84 = arith.constant dense<0.000000e+00> : vector<8x1024xf32>
    %154 = tpu.matmul %153, %152, %cst_84 {dimension_numbers = #tpu.dot_dimension_numbers<[1], [0], [0], [1], [0, 0, 1, 1], [], []>} : vector<8x4xf32>, vector<4x1024xf32>, vector<8x1024xf32> -> vector<8x1024xf32>
    %c0_85 = arith.constant 0 : index
    %c0_86 = arith.constant 0 : index
    %155 = vector.load %arg8[%c0_85, %c0_86] : memref<8x1xf32, #tpu.memory_space<vmem>>, vector<8x1xf32>
    %156 = vector.broadcast %155 : vector<8x1xf32> to vector<8x1024xf32>
    %157 = arith.addf %154, %156 : vector<8x1024xf32>
    %cst_87 = arith.constant 0.000000e+00 : f32
    %158 = vector.broadcast %cst_87 : f32 to vector<8x1024xf32>
    %159 = arith.maximumf %157, %158 : vector<8x1024xf32>
    %160 = vector.extract_strided_slice %159 {offsets = [0, 0], sizes = [8, 512], strides = [1, 1]} : vector<8x1024xf32> to vector<8x512xf32>
    %c0_88 = arith.constant 0 : index
    %c0_89 = arith.constant 0 : index
    %c0_90 = arith.constant 0 : index
    %161 = vector.load %arg9[%c0_88, %c0_89, %c0_90] : memref<2x8x512xf32, #tpu.memory_space<vmem>>, vector<1x8x512xf32>
    %162 = vector.shape_cast %161 : vector<1x8x512xf32> to vector<8x512xf32>
    %163 = vector.shape_cast %160 : vector<8x512xf32> to vector<1x8x512xf32>
    tpu.vector_store %arg9[%c0_88, %c0_89, %c0_90], %163 {strides = array<i32>} : memref<2x8x512xf32, #tpu.memory_space<vmem>>, vector<1x8x512xf32>,
    %164 = vector.extract_strided_slice %159 {offsets = [0, 512], sizes = [8, 512], strides = [1, 1]} : vector<8x1024xf32> to vector<8x512xf32>
    %c1_91 = arith.constant 1 : index
    %c0_92 = arith.constant 0 : index
    %c0_93 = arith.constant 0 : index
    %165 = vector.load %arg9[%c1_91, %c0_92, %c0_93] : memref<2x8x512xf32, #tpu.memory_space<vmem>>, vector<1x8x512xf32>
    %166 = vector.shape_cast %165 : vector<1x8x512xf32> to vector<8x512xf32>
    %167 = vector.shape_cast %164 : vector<8x512xf32> to vector<1x8x512xf32>
    tpu.vector_store %arg9[%c1_91, %c0_92, %c0_93], %167 {strides = array<i32>} : memref<2x8x512xf32, #tpu.memory_space<vmem>>, vector<1x8x512xf32>,
    return
  }
  func.func @transform_0(%arg0: i32) -> (i32, i32, i32) {
    %c0_i32 = arith.constant 0 : i32
    %c0_i32_0 = arith.constant 0 : i32
    %c0_i32_1 = arith.constant 0 : i32
    return %arg0, %c0_i32, %c0_i32_0 : i32, i32, i32
  }
  func.func @transform_1(%arg0: i32) -> (i32, i32) {
    %c0_i32 = arith.constant 0 : i32
    %c0_i32_0 = arith.constant 0 : i32
    %c0_i32_1 = arith.constant 0 : i32
    return %c0_i32, %c0_i32_0 : i32, i32
  }
  func.func @transform_2(%arg0: i32) -> (i32, i32) {
    %c0_i32 = arith.constant 0 : i32
    %c0_i32_0 = arith.constant 0 : i32
    %c0_i32_1 = arith.constant 0 : i32
    return %c0_i32, %c0_i32_0 : i32, i32
  }
  func.func @transform_3(%arg0: i32) -> (i32, i32) {
    %c0_i32 = arith.constant 0 : i32
    %c0_i32_0 = arith.constant 0 : i32
    %c0_i32_1 = arith.constant 0 : i32
    return %c0_i32, %c0_i32_0 : i32, i32
  }
  func.func @transform_4(%arg0: i32) -> (i32, i32) {
    %c0_i32 = arith.constant 0 : i32
    %c0_i32_0 = arith.constant 0 : i32
    %c0_i32_1 = arith.constant 0 : i32
    return %c0_i32, %c0_i32_0 : i32, i32
  }
  func.func @transform_5(%arg0: i32) -> (i32, i32) {
    %c0_i32 = arith.constant 0 : i32
    %c0_i32_0 = arith.constant 0 : i32
    %c0_i32_1 = arith.constant 0 : i32
    return %c0_i32, %c0_i32_0 : i32, i32
  }
  func.func @transform_6(%arg0: i32) -> (i32, i32) {
    %c0_i32 = arith.constant 0 : i32
    %c0_i32_0 = arith.constant 0 : i32
    %c0_i32_1 = arith.constant 0 : i32
    return %c0_i32, %c0_i32_0 : i32, i32
  }
  func.func @transform_7(%arg0: i32) -> (i32, i32) {
    %c0_i32 = arith.constant 0 : i32
    %c0_i32_0 = arith.constant 0 : i32
    %c0_i32_1 = arith.constant 0 : i32
    return %c0_i32, %c0_i32_0 : i32, i32
  }
  func.func @transform_8(%arg0: i32) -> (i32, i32, i32) {
    %c0_i32 = arith.constant 0 : i32
    %c0_i32_0 = arith.constant 0 : i32
    %c0_i32_1 = arith.constant 0 : i32
    return %arg0, %c0_i32, %c0_i32_0 : i32, i32, i32
  }
}

</mosaic_0001>

<bundles_post_ra>
// kernel: tpu_custom_call.1
= control target key start
LH: loop header
LB: loop body
LE: loop exit
PB: predicated region body
PF: predicated region fallthrough
CT: control target
= control target key end

     0   :  { %13 = vsyncpa [#allocation4], 0  ;;  %s5364_s0 = inlined_call_operand.hbm [shape: f32[2,8,512], index: 0, kind: input, shape index: {}]   ;;  %s5365_s1 = inlined_call_operand.hbm [shape: f32[27,1024], index: 1, kind: input, shape index: {}]   ;;  %s5366_s2 = inlined_call_operand.vmem [shape: f32[4,8], index: 2, kind: input, shape index: {}]   ;;  %s5367_s3 = inlined_call_operand.vmem [shape: f32[4,1], index: 3, kind: input, shape index: {}]   ;;  %s5368_s4 = inlined_call_operand.vmem [shape: f32[4,108], index: 4, kind: input, shape index: {}]   ;;  %s5369_s5 = inlined_call_operand.vmem [shape: f32[4,1], index: 5, kind: input, shape index: {}]   ;;  %s5370_s6 = inlined_call_operand.vmem [shape: f32[8,4], index: 6, kind: input, shape index: {}]   ;;  %s5371_s7 = inlined_call_operand.vmem [shape: f32[8,1], index: 7, kind: input, shape index: {}]   ;;  %s5372_s8 = inlined_call_operand.hbm [shape: f32[2,8,512], index: 8, kind: output, shape index: {}]  }
   0x1   :  { %14 = vsyncpa [#allocation7], 0 }
   0x2   :  { %15 = vsyncpa [#allocation5], 0  ;;  %s3626_s27 = smov [#allocation3]  }
   0x3   :  { %s21_s28 = sshll.u32 %s3626_s27, 4  ;;  %s22_s28 = int_to_ptr.vmem [resolvable:$true] %s21_s28 }
   0x4   :  { %s3568_s29 = scalar_lea.vmem %s22_s28, 1024  ;;  %p3573_p1 = scmp.lt.s32.totalorder %s22_s28, %s22_s28 }
   0x5   :  { %p3569_p0 = scmp.ne.s32.totalorder %s22_s28, %s3568_s29  ;;  %p3574_p2 = scmp.lt.s32.totalorder %s3568_s29, %s3568_s29 }
   0x7   :  { %p3575_p3 = por %p3574_p2, %p3573_p1 }
   0x9   :  { %p3576_p4 = pnand %p3575_p3, %p3569_p0 }
   0xb   :  { %3579 = shalt.err (!%p3576_p4)
}
   0xc   :  { %s3627_s30 = smov 512   ;;  %s3628_s9 = smov 32  }
   0xd   :  { %27 = dma.hbm_to_vmem [thread:$0]  %s5364_s0, 1024, %s22_s28, [#allocation4], %s3627_s30, %s3627_s30, %s3628_s9  }
   0xe   :  { %s3629_s12 = smov [#allocation6]  }
   0xf   :  { %s33_s13 = sshll.u32 %s3629_s12, 4  ;;  %s34_s13 = int_to_ptr.vmem [resolvable:$true] %s33_s13 }
  0x10   :  { %s3588_s14 = scalar_lea.vmem %s34_s13, 4096  ;;  %p3593_p6 = scmp.lt.s32.totalorder %s34_s13, %s34_s13 }
  0x11   :  { %p3589_p5 = scmp.ne.s32.totalorder %s34_s13, %s3588_s14  ;;  %p3594_p7 = scmp.lt.s32.totalorder %s3588_s14, %s3588_s14 }
  0x13   :  { %p3595_p8 = por %p3594_p7, %p3593_p6 }
  0x15   :  { %p3596_p9 = pnand %p3595_p8, %p3589_p5 }
  0x17   :  { %3599 = shalt.err (!%p3596_p9)
}
  0x18   :  { %s3630_s15 = smov 1024   ;;  %s3631_s16 = smov 64  }
  0x19   :  { %39 = dma.hbm_to_vmem [thread:$0]  %s5365_s1, 4096, %s34_s13, [#allocation7], %s3630_s15, %s3630_s15, %s3631_s16  }
  0x1a   :  { %3620 = dma.done.wait [#allocation4], 1024  }
  0x1b   :  { %3621 = vsyncadd [#allocation4], 4294966272 }
  0x1c   :  { %3622 = dma.done.wait [#allocation7], 4096  }
  0x1d   :  { %3623 = vsyncadd [#allocation7], 4294963200  ;;  %v5373_v0 = vmov 0.0   ;;  %v3633_v1 = vmov 0   ;;  %v60_v2 = vld [vmem:[#allocation3 + $0x8] sm:$0xff]  ;;  %v62_v3 = vld [vmem:[#allocation3 + $0x18] sm:$0xff]  ;;  %v394_v55 = vlaneseq }
  0x1e   :  { %131 = vmatprep.mubr.f32.mxu0 %v5373_v0  ;;  %202 = vmatprep.mubr.f32.mxu1 %v5373_v0  ;;  %v59_v4 = vld [vmem:[#allocation3] sm:$0xff]  ;;  %vm63_vm0 = vcmask 64512   ;;  %v61_v5 = vld [vmem:[#allocation3 + $0x10] sm:$0xff]  ;;  %v211_v7 = vld [vmem:[#allocation3 + $0x28] sm:$0xff]  ;;  %s3636_s21 = smov 63   ;;  %s3637_s22 = smov 57  }
  0x1f   :  { %3557 = vset.pattern.permute.xlu0 %v3633_v1  ;;  %3558 = vset.pattern.permute.xlu1 %v3633_v1  ;;  %v58_v6 = vld [vmem:[%s5366_s2] sm:$0xf]  ;;  %v213_v8 = vld [vmem:[#allocation3 + $0x38] sm:$0xff]  ;;  %v212_v10 = vld [vmem:[#allocation3 + $0x30] sm:$0xff]  ;;  %s3634_s2 = smov 55   ;;  %s3638_s23 = smov 65  }
  0x20   :  { %97 = vmatprep.subr.mxu0 %v60_v2  ;;  %168 = vmatprep.subr.mxu1 %v62_v3  ;;  %v210_v9 = vld [vmem:[#allocation3 + $0x20] sm:$0xff]  ;;  %s3639_s24 = smov 72   ;;  %s3640_s25 = smov 73   ;;  %v3906_v58 = vshrl.u32 %v394_v55, 7  ;;  %v3916_v2 = vand.u32 127, %v394_v55  ;;  %vm2833_vm4 = vcmask 1043456  }
  0x21   :  { %98 = vmatpush1.msra.mxu0 %v59_v4  ;;  %169 = vmatpush1.msra.mxu1 %v61_v5  ;;  %v356_v11 = vld [vmem:[%s5367_s3] sm:$0xf]  ;;  %s3635_s3 = smov 56   ;;  %s3641_s26 = smov 121  }
  0x22   :  { %3504 = vmatmul.mubr.msk.f32.vlgmr.msra.gmra.mxu0 %vm63_vm0, %v58_v6  ;;  %3505 = vmatmul.mubr.msk.f32.vlgmr.msra.gmra.mxu1 %vm63_vm0, %v58_v6  ;;  %s3642_s27 = smov 127   ;;  %s3643_s28 = smov 71   ;;  %5440 = vst [vmem:[#allocation20_spill] sm:$0xff] %v3906_v58  ;;  %v1079_v59 = vld [vmem:[#allocation6 + $0x7] ss:$8 sm:$0xf] }
  0x23   :  { %244 = vmatprep.subr.mxu0 %v211_v7  ;;  %315 = vmatprep.subr.mxu1 %v213_v8  ;;  %s3644_s29 = smov 119   ;;  %s3645_s10 = smov 120   ;;  %v1080_v60 = vld [vmem:[#allocation6 + $0x7] ss:$8 sm:$0xf0]  ;;  %v3919_v3 = vsub.s32 2, %v3906_v58 }
  0x24   :  { %245 = vmatpush1.msra.mxu0 %v210_v9  ;;  %278 = vmatprep.mubr.f32.mxu0 %v5373_v0  ;;  %s3646_s11 = smov 7   ;;  %s3647_s12 = smov 1   ;;  %v2565_v61 = vld [vmem:[#allocation6 + $0xc1] ss:$8 sm:$0xf]  ;;  %v3922_v4 = vsub.s32 3, %v3906_v58  ;;  %v3928_v7 = vor.u32 %v1080_v60, %v1079_v59 }
  0x25   :  { %316 = vmatpush1.msra.mxu1 %v212_v10  ;;  %349 = vmatprep.mubr.f32.mxu1 %v5373_v0  ;;  %s3648_s13 = smov 9   ;;  %s3649_s14 = smov 8   ;;  %v2566_v62 = vld [vmem:[#allocation6 + $0xc1] ss:$8 sm:$0xf0]  ;;  %vm1069_vm1 = vcmp.lt.s32.totalorder %v3916_v2, 56 }
  0x26   :  { %3506 = vmatmul.mubr.msk.f32.vlgmr.msra.gmra.mxu0 %vm63_vm0, %v58_v6  ;;  %3507 = vmatmul.mubr.msk.f32.vlgmr.msra.gmra.mxu1 %vm63_vm0, %v58_v6  ;;  %v1189_v5 = vld [vmem:[#allocation6 + $0x40] ss:$8 sm:$0xf]  ;;  %5442 = vst [vmem:[#allocation22_spill] sm:$0xff] %v3928_v7  ;;  %v3930_v8 = vor.u32 %v2566_v62, %v2565_v61  ;;  %vm1179_vm2 = vcmp.lt.s32.totalorder %v3916_v2, 55  ;;  %vm873_vm3 = vcmp.lt.s32.totalorder %v3916_v2, 63 }
  0x27   :  { %359 = vperm.xlu0 %3557, %v356_v11   ;;  %2993 = vmatprep.mubr.f32.mxu1 %v5373_v0  ;;  %v1190_v6 = vld [vmem:[#allocation6 + $0x40] ss:$8 sm:$0xf0]  ;;  %v2650_v9 = vld [vmem:[#allocation6 + $0xc2] ss:$8 sm:$0xf] }
  0x28   :  { %2922 = vmatprep.mubr.f32.mxu0 %v5373_v0  ;;  %5443 = vst [vmem:[#allocation23_spill] sm:$0xff] %v3930_v8  ;;  %v2651_v10 = vld [vmem:[#allocation6 + $0xc2] ss:$8 sm:$0xf0]  ;;  %vm983_vm5 = vcmp.lt.s32.totalorder %v3916_v2, 57  ;;  %vm677_vm6 = vcmp.lt.s32.totalorder %v3916_v2, 65 }
  0x29   :  { %vm787_vm7 = vcmp.lt.s32.totalorder %v3916_v2, 64  ;;  %vm481_vm8 = vcmp.lt.s32.totalorder %v3916_v2, 72  ;;  %vm591_vm9 = vcmp.lt.s32.totalorder %v3916_v2, 71  ;;  %vm5415_vm10 = vcmp.lt.s32.totalorder %v3916_v2, 73 }
  0x2a   :  { %vm1971_vm11 = vcmp.lt.s32.totalorder %v3916_v2, 119  ;;  %vm5420_vm12 = vcmp.lt.s32.totalorder %v3916_v2, 121  ;;  %vm1885_vm13 = vcmp.lt.s32.totalorder %v3916_v2, 120  ;;  %vm1689_vm14 = vcmp.lt.s32.totalorder %v3916_v2, 127 }
  0x2b   :  { %vm1461_vm15 = vcmp.lt.s32.totalorder %v3916_v2, 7  ;;  %vm1571_vm0 = vcmp.lt.s32.totalorder %v3916_v2, 1 }
  0xa2   :  { %v360_v12 = vpop.permute.xlu0 %359 }
  0xe2   :  { %v133_v13 = vpop.f32.mrf.mxu0  ;;  %v204_v14 = vpop.f32.mrf.mxu1 }
  0xe3   :  { %v362_v15 = vadd.f32 %v360_v12, %v133_v13  ;;  %v364_v16 = vadd.f32 %v360_v12, %v204_v14  ;;  %v3937_v13 = vsub.s32 0, %v3906_v58  ;;  %v3940_v14 = vsub.s32 1, %v3906_v58 }
  0xe4   :  { %v135_v17 = vpop.f32.mrf.mxu0  ;;  %v206_v18 = vpop.f32.mrf.mxu1 }
  0xe5   :  { %v3722_v19 = vmax.f32 %v362_v15, 0.0  ;;  %v3724_v20 = vmax.f32 %v364_v16, 0.0  ;;  %v363_v21 = vadd.f32 %v360_v12, %v135_v17  ;;  %v365_v22 = vadd.f32 %v360_v12, %v206_v18 }
  0xe6   :  { %v280_v23 = vpop.f32.mrf.mxu0  ;;  %v351_v24 = vpop.f32.mrf.mxu1  ;;  %v3942_v15 = vor.u32 %v1190_v6, %v1189_v5  ;;  %v3944_v16 = vor.u32 %v2651_v10, %v2650_v9  ;;  %v1098_v17 = vrot.slane %v3928_v7, %v3922_v4  ;;  %v2580_v18 = vrot.slane %v3930_v8, %v3919_v3 }
  0xe7   :  { %v3726_v25 = vmax.f32 %v363_v21, 0.0  ;;  %v3728_v26 = vmax.f32 %v365_v22, 0.0  ;;  %v366_v27 = vadd.f32 %v360_v12, %v280_v23  ;;  %v368_v28 = vadd.f32 %v360_v12, %v351_v24  ;;  %1167 = vrot.lane.b32.xlu0 %v3724_v20, %s3634_s2  ;;  %1057 = vrot.lane.b32.xlu1 %v3724_v20, %s3635_s3 }
  0xe8   :  { %v282_v29 = vpop.f32.mrf.mxu0  ;;  %v353_v30 = vpop.f32.mrf.mxu1  ;;  %v1651_v31 = vrot.slane %v3724_v20, 4  ;;  %v1649_v32 = vrot.slane %v3722_v19, 4  ;;  %v1200_v22 = vrot.slane %v3942_v15, %v3940_v14  ;;  %v1204_v23 = vrot.slane %v3942_v15, %v3919_v3 }
  0xe9   :  { %v3736_v33 = vmax.f32 %v366_v27, 0.0  ;;  %v3738_v34 = vmax.f32 %v368_v28, 0.0  ;;  %v367_v35 = vadd.f32 %v360_v12, %v282_v29  ;;  %v369_v36 = vadd.f32 %v360_v12, %v353_v30  ;;  %v883_v27 = vld [vmem:[#allocation6 + $0x5] ss:$8 sm:$0xf] }
  0xea   :  { %v1650_v37 = vrot.slane %v3726_v25, 4  ;;  %v1652_v38 = vrot.slane %v3728_v26, 4  ;;  %1667 = vst [vmem:[#allocation2 + $0x178] sm:$0xf0] %v1651_v31  ;;  %1665 = vst [vmem:[#allocation2 + $0x2b8] sm:$0xf0] %v1649_v32  ;;  %v2657_v24 = vrot.slane %v3944_v16, %v3937_v13  ;;  %v2661_v31 = vrot.slane %v3944_v16, %v3940_v14 }
  0xeb   :  { %5432 = vst [vmem:[#allocation12_spill] sm:$0xff] %v3736_v33  ;;  %v3742_v39 = vmax.f32 %v367_v35, 0.0  ;;  %v3744_v40 = vmax.f32 %v369_v36, 0.0  ;;  %1163 = vrot.lane.b32.xlu0 %v3722_v19, %s3634_s2  ;;  %1053 = vrot.lane.b32.xlu1 %v3722_v19, %s3635_s3  ;;  %v1653_v41 = vrot.slane %v3736_v33, 4  ;;  %v1655_v42 = vrot.slane %v3738_v34, 4 }
  0xec   :  { %1666 = vst [vmem:[#allocation2 + $0x228] sm:$0xf0] %v1650_v37  ;;  %1668 = vst [vmem:[#allocation2 + $0x200] sm:$0xf0] %v1652_v38 }
  0xed   :  { %v1656_v43 = vrot.slane %v3744_v40, 4  ;;  %v1654_v44 = vrot.slane %v3742_v39, 4  ;;  %1669 = vst [vmem:[#allocation2 + $0x2e8] sm:$0xf0] %v1653_v41  ;;  %1671 = vst [vmem:[#allocation2 + $0x2f8] sm:$0xf0] %v1655_v42  ;;  %v1208_v42 = vrot.slane %v3942_v15, %v3922_v4 }
  0xee   :  { %v884_v28 = vld [vmem:[#allocation6 + $0x5] ss:$8 sm:$0xf0]  ;;  %v2419_v32 = vld [vmem:[#allocation6 + $0x87] ss:$8 sm:$0xf] }
  0xef   :  { %861 = vrot.lane.b32.xlu0 %v3724_v20, %s3636_s21  ;;  %857 = vrot.lane.b32.xlu1 %v3722_v19, %s3636_s21  ;;  %1672 = vst [vmem:[#allocation2 + $0x268] sm:$0xf0] %v1656_v43  ;;  %1670 = vst [vmem:[#allocation2 + $0x208] sm:$0xf0] %v1654_v44  ;;  %v2665_v43 = vrot.slane %v3944_v16, %v3919_v3  ;;  %v3988_v59 = vor.u32 %v884_v28, %v883_v27 }
  0xf0   :  { %v2420_v35 = vld [vmem:[#allocation6 + $0x87] ss:$8 sm:$0xf0] }
  0xf1   :  { %v3990_v60 = vor.u32 %v2420_v35, %v2419_v32 }
  0xf3   :  { %971 = vrot.lane.b32.xlu0 %v3724_v20, %s3637_s22  ;;  %661 = vrot.lane.b32.xlu1 %v3722_v19, %s3638_s23  ;;  %v2426_v28 = vrot.slane %v3990_v60, %v3937_v13  ;;  %v2434_v35 = vrot.slane %v3990_v60, %v3919_v3 }
  0xf7   :  { %967 = vrot.lane.b32.xlu0 %v3722_v19, %s3637_s22  ;;  %465 = vrot.lane.b32.xlu1 %v3722_v19, %s3639_s24 }
  0xfb   :  { %665 = vrot.lane.b32.xlu0 %v3724_v20, %s3638_s23  ;;  %378 = vrot.lane.b32.xlu1 %v3722_v19, %s3640_s25 }
  0xff   :  { %775 = vrot.lane.b32.xlu0 %v3724_v20, %s3631_s16  ;;  %1759 = vrot.lane.b32.xlu1 %v3722_v19, %s3641_s26 }
 0x103   :  { %771 = vrot.lane.b32.xlu0 %v3722_v19, %s3631_s16  ;;  %1673 = vrot.lane.b32.xlu1 %v3722_v19, %s3642_s27 }
 0x107   :  { %469 = vrot.lane.b32.xlu0 %v3724_v20, %s3639_s24  ;;  %1059 = vrot.lane.b32.xlu1 %v3728_v26, %s3635_s3 }
 0x10b   :  { %579 = vrot.lane.b32.xlu0 %v3724_v20, %s3643_s28  ;;  %1165 = vrot.lane.b32.xlu1 %v3726_v25, %s3634_s2 }
 0x10f   :  { %575 = vrot.lane.b32.xlu0 %v3722_v19, %s3643_s28  ;;  %1169 = vrot.lane.b32.xlu1 %v3728_v26, %s3634_s2 }
 0x113   :  { %382 = vrot.lane.b32.xlu0 %v3724_v20, %s3640_s25  ;;  %859 = vrot.lane.b32.xlu1 %v3726_v25, %s3636_s21 }
 0x117   :  { %1959 = vrot.lane.b32.xlu0 %v3724_v20, %s3644_s29  ;;  %863 = vrot.lane.b32.xlu1 %v3728_v26, %s3636_s21 }
 0x11b   :  { %1955 = vrot.lane.b32.xlu0 %v3722_v19, %s3644_s29  ;;  %969 = vrot.lane.b32.xlu1 %v3726_v25, %s3637_s22 }
 0x11f   :  { %1763 = vrot.lane.b32.xlu0 %v3724_v20, %s3641_s26  ;;  %973 = vrot.lane.b32.xlu1 %v3728_v26, %s3637_s22 }
 0x123   :  { %1873 = vrot.lane.b32.xlu0 %v3724_v20, %s3645_s10  ;;  %663 = vrot.lane.b32.xlu1 %v3726_v25, %s3638_s23 }
 0x127   :  { %1869 = vrot.lane.b32.xlu0 %v3722_v19, %s3645_s10  ;;  %667 = vrot.lane.b32.xlu1 %v3728_v26, %s3638_s23 }
 0x12b   :  { %1677 = vrot.lane.b32.xlu0 %v3724_v20, %s3642_s27  ;;  %773 = vrot.lane.b32.xlu1 %v3726_v25, %s3631_s16 }
 0x12f   :  { %1445 = vrot.lane.b32.xlu0 %v3722_v19, %s3646_s11  ;;  %777 = vrot.lane.b32.xlu1 %v3728_v26, %s3631_s16 }
 0x133   :  { %1449 = vrot.lane.b32.xlu0 %v3724_v20, %s3646_s11  ;;  %467 = vrot.lane.b32.xlu1 %v3726_v25, %s3639_s24 }
 0x137   :  { %1555 = vrot.lane.b32.xlu0 %v3722_v19, %s3647_s12  ;;  %471 = vrot.lane.b32.xlu1 %v3728_v26, %s3639_s24 }
 0x13b   :  { %1559 = vrot.lane.b32.xlu0 %v3724_v20, %s3647_s12  ;;  %577 = vrot.lane.b32.xlu1 %v3726_v25, %s3643_s28 }
 0x13f   :  { %1249 = vrot.lane.b32.xlu0 %v3722_v19, %s3648_s13  ;;  %581 = vrot.lane.b32.xlu1 %v3728_v26, %s3643_s28 }
 0x143   :  { %1253 = vrot.lane.b32.xlu0 %v3724_v20, %s3648_s13  ;;  %380 = vrot.lane.b32.xlu1 %v3726_v25, %s3640_s25 }
 0x147   :  { %1359 = vrot.lane.b32.xlu0 %v3722_v19, %s3649_s14  ;;  %384 = vrot.lane.b32.xlu1 %v3728_v26, %s3640_s25 }
 0x14b   :  { %1363 = vrot.lane.b32.xlu0 %v3724_v20, %s3649_s14  ;;  %1957 = vrot.lane.b32.xlu1 %v3726_v25, %s3644_s29 }
 0x14f   :  { %1961 = vrot.lane.b32.xlu1 %v3728_v26, %s3644_s29  ;;  %1055 = vrot.lane.b32.xlu0 %v3726_v25, %s3635_s3 }
 0x153   :  { %1761 = vrot.lane.b32.xlu1 %v3726_v25, %s3641_s26  ;;  %1061 = vrot.lane.b32.xlu0 %v3736_v33, %s3635_s3 }
 0x157   :  { %1765 = vrot.lane.b32.xlu1 %v3728_v26, %s3641_s26  ;;  %1171 = vrot.lane.b32.xlu0 %v3736_v33, %s3634_s2 }
 0x159   :  { %v3862_v45 = vpop.permute.xlu0 %1167  ;;  %v3864_v46 = vpop.permute.xlu1 %1057 }
 0x15b   :  { %1871 = vrot.lane.b32.xlu1 %v3726_v25, %s3645_s10  ;;  %865 = vrot.lane.b32.xlu0 %v3736_v33, %s3636_s21 }
 0x15d   :  { %v3870_v47 = vpop.permute.xlu0 %1163  ;;  %v3872_v48 = vpop.permute.xlu1 %1053 }
 0x15e   :  { %5433 = vst [vmem:[#allocation13_spill] sm:$0xff] %v3870_v47  ;;  %5434 = vst [vmem:[#allocation14_spill] sm:$0xff] %v3872_v48 }
 0x15f   :  { %1875 = vrot.lane.b32.xlu1 %v3728_v26, %s3645_s10  ;;  %975 = vrot.lane.b32.xlu0 %v3736_v33, %s3637_s22 }
 0x161   :  { %v3878_v49 = vpop.permute.xlu0 %861  ;;  %v3880_v50 = vpop.permute.xlu1 %857 }
 0x162   :  { %5435 = vst [vmem:[#allocation15_spill] sm:$0xff] %v3880_v50 }
 0x163   :  { %1675 = vrot.lane.b32.xlu1 %v3726_v25, %s3642_s27  ;;  %669 = vrot.lane.b32.xlu0 %v3736_v33, %s3638_s23 }
 0x165   :  { %v3886_v51 = vpop.permute.xlu0 %971  ;;  %v3888_v52 = vpop.permute.xlu1 %661 }
 0x166   :  { %5436 = vst [vmem:[#allocation16_spill] sm:$0xff] %v3888_v52 }
 0x167   :  { %1679 = vrot.lane.b32.xlu1 %v3728_v26, %s3642_s27  ;;  %779 = vrot.lane.b32.xlu0 %v3736_v33, %s3631_s16 }
 0x169   :  { %v3894_v53 = vpop.permute.xlu0 %967  ;;  %v3896_v54 = vpop.permute.xlu1 %465 }
 0x16a   :  { %5437 = vst [vmem:[#allocation17_spill] sm:$0xff] %v3894_v53  ;;  %5438 = vst [vmem:[#allocation18_spill] sm:$0xff] %v3896_v54 }
 0x16b   :  { %1447 = vrot.lane.b32.xlu1 %v3726_v25, %s3646_s11  ;;  %473 = vrot.lane.b32.xlu0 %v3736_v33, %s3639_s24 }
 0x16d   :  { %v3902_v56 = vpop.permute.xlu0 %665  ;;  %v3904_v57 = vpop.permute.xlu1 %378 }
 0x16e   :  { %5439 = vst [vmem:[#allocation19_spill] sm:$0xff] %v3904_v57 }
 0x16f   :  { %1451 = vrot.lane.b32.xlu1 %v3728_v26, %s3646_s11  ;;  %583 = vrot.lane.b32.xlu0 %v3736_v33, %s3643_s28 }
 0x171   :  { %v3912_v63 = vpop.permute.xlu0 %775  ;;  %v3914_v1 = vpop.permute.xlu1 %1759 }
 0x172   :  { %5441 = vst [vmem:[#allocation21_spill] sm:$0xff] %v3914_v1 }
 0x173   :  { %1557 = vrot.lane.b32.xlu1 %v3726_v25, %s3647_s12  ;;  %386 = vrot.lane.b32.xlu0 %v3736_v33, %s3640_s25 }
 0x175   :  { %v3932_v11 = vpop.permute.xlu0 %771  ;;  %v3934_v12 = vpop.permute.xlu1 %1673 }
 0x176   :  { %5444 = vst [vmem:[#allocation24_spill] sm:$0xff] %v3932_v11  ;;  %5445 = vst [vmem:[#allocation25_spill] sm:$0xff] %v3934_v12 }
 0x177   :  { %1561 = vrot.lane.b32.xlu1 %v3728_v26, %s3647_s12  ;;  %1963 = vrot.lane.b32.xlu0 %v3736_v33, %s3644_s29 }
 0x179   :  { %v3955_v19 = vpop.permute.xlu0 %469  ;;  %v3957_v20 = vpop.permute.xlu1 %1059 }
 0x17a   :  { %v1074_v21 = vsel %vm1069_vm1, %v3864_v46, %v3957_v20 }
 0x17b   :  { %v1126_v29 = vmul.f32 %v1098_v17, %v1074_v21  ;;  %v2611_v30 = vmul.f32 %v2580_v18, %v1074_v21  ;;  %1251 = vrot.lane.b32.xlu1 %v3726_v25, %s3648_s13  ;;  %1767 = vrot.lane.b32.xlu0 %v3736_v33, %s3641_s26  ;;  %v894_v18 = vrot.slane %v3988_v59, %v3940_v14 }
 0x17c   :  { %v898_v21 = vrot.slane %v3988_v59, %v3919_v3 }
 0x17d   :  { %v1142_v36 = vrot.slane %v1126_v29, 4  ;;  %v2627_v37 = vrot.slane %v2611_v30, 4  ;;  %v3976_v38 = vpop.permute.xlu0 %579  ;;  %v1166_v41 = vpop.permute.xlu1 %1165  ;;  %v2430_v29 = vrot.slane %v3990_v60, %v3940_v14  ;;  %v2505_v30 = vld [vmem:[#allocation6 + $0xc0] ss:$8 sm:$0xf0] }
 0x17e   :  { %v1185_v44 = vsel %vm1179_vm2, %v1166_v41, %v3862_v45  ;;  %v1186_v55 = vsel %vm1179_vm2, %v3870_v47, %v1166_v41 }
 0x17f   :  { %1158 = vst [vmem:[#allocation2 + $0x260] sm:$0xf0] %v1142_v36  ;;  %2643 = vst [vmem:[#allocation2 + $0x1b8] sm:$0xf0] %v2627_v37  ;;  %v1234_v61 = vmul.f32 %v1200_v22, %v1186_v55  ;;  %v1235_v62 = vmul.f32 %v1204_v23, %v1185_v44  ;;  %v2694_v5 = vmul.f32 %v2657_v24, %v1186_v55  ;;  %1255 = vrot.lane.b32.xlu1 %v3728_v26, %s3648_s13 }
 0x180   :  { %v2695_v6 = vmul.f32 %v2661_v31, %v1185_v44  ;;  %1877 = vrot.lane.b32.xlu0 %v3736_v33, %s3645_s10  ;;  %v993_v22 = vld [vmem:[#allocation6 + $0x6] ss:$8 sm:$0xf] }
 0x181   :  { %1242 = vst [vmem:[#allocation2 + $0x298] sm:$0xf] %v1234_v61  ;;  %1243 = vst [vmem:[#allocation2 + $0xb8] sm:$0xf] %v1235_v62  ;;  %v3996_v9 = vpop.permute.xlu0 %575  ;;  %v3998_v10 = vpop.permute.xlu1 %1169 }
 0x182   :  { %2702 = vst [vmem:[#allocation2 + $0x190] sm:$0xf] %v2694_v5  ;;  %2703 = vst [vmem:[#allocation2 + $0x220] sm:$0xf] %v2695_v6  ;;  %v1184_v17 = vsel %vm1179_vm2, %v3862_v45, %v3998_v10 }
 0x183   :  { %5446 = vst [vmem:[#allocation26_spill] sm:$0xff] %v3996_v9  ;;  %v994_v23 = vld [vmem:[#allocation6 + $0x6] ss:$8 sm:$0xf0]  ;;  %v1236_v24 = vmul.f32 %v1208_v42, %v1184_v17  ;;  %v2696_v27 = vmul.f32 %v2665_v43, %v1184_v17  ;;  %1361 = vrot.lane.b32.xlu1 %v3726_v25, %s3649_s14  ;;  %v902_v25 = vrot.slane %v3988_v59, %v3922_v4 }
 0x184   :  { %v2504_v45 = vld [vmem:[#allocation6 + $0xc0] ss:$8 sm:$0xf]  ;;  %1681 = vrot.lane.b32.xlu0 %v3736_v33, %s3642_s27  ;;  %v4029_v41 = vor.u32 %v994_v23, %v993_v22 }
 0x185   :  { %1244 = vst [vmem:[#allocation2 + $0x170] sm:$0xf] %v1236_v24  ;;  %2704 = vst [vmem:[#allocation2 + $0x8] sm:$0xf] %v2696_v27  ;;  %v4017_v31 = vpop.permute.xlu0 %382  ;;  %v860_v32 = vpop.permute.xlu1 %859  ;;  %v4031_v42 = vor.u32 %v2505_v30, %v2504_v45 }
 0x186   :  { %v879_v36 = vsel %vm873_vm3, %v860_v32, %v3878_v49  ;;  %v880_v37 = vsel %vm873_vm3, %v3880_v50, %v860_v32  ;;  %v1008_v27 = vrot.slane %v4029_v41, %v3919_v3 }
 0x187   :  { %v928_v43 = vmul.f32 %v894_v18, %v880_v37  ;;  %v929_v44 = vmul.f32 %v898_v21, %v879_v36  ;;  %v2463_v55 = vmul.f32 %v2426_v28, %v880_v37  ;;  %v2464_v61 = vmul.f32 %v2430_v29, %v879_v36  ;;  %1365 = vrot.lane.b32.xlu1 %v3728_v26, %s3649_s14  ;;  %v687_v28 = vld [vmem:[#allocation6 + $0x3] ss:$8 sm:$0xf]  ;;  %v2273_v36 = vld [vmem:[#allocation6 + $0x85] ss:$8 sm:$0xf] }
 0x188   :  { %1065 = vrot.lane.b32.xlu0 %v3738_v34, %s3635_s3  ;;  %v1004_v21 = vrot.slane %v4029_v41, %v3940_v14  ;;  %v688_v29 = vld [vmem:[#allocation6 + $0x3] ss:$8 sm:$0xf0]  ;;  %v2515_v32 = vrot.slane %v4031_v42, %v3940_v14  ;;  %v2274_v37 = vld [vmem:[#allocation6 + $0x85] ss:$8 sm:$0xf0] }
 0x189   :  { %v2816_v62 = vld [vmem:[#allocation2 + $0x220] sm:$0xf]  ;;  %v2815_v5 = vld [vmem:[#allocation2 + $0x190] sm:$0xf]  ;;  %v944_v6 = vrot.slane %v928_v43, 4  ;;  %v945_v17 = vrot.slane %v929_v44, 4  ;;  %v4038_v24 = vpop.permute.xlu0 %1959  ;;  %v4041_v18 = vpop.permute.xlu1 %863 }
 0x18a   :  { %v2479_v22 = vrot.slane %v2463_v55, 4  ;;  %v2480_v23 = vrot.slane %v2464_v61, 4  ;;  %3508 = vmatprep.subr.msk.mxu0 %vm2833_vm4, %v2816_v62  ;;  %v878_v26 = vsel %vm873_vm3, %v3878_v49, %v4041_v18  ;;  %v2511_v49 = vrot.slane %v4031_v42, %v3937_v13 }
 0x18b   :  { %3509 = vmatpush1.msk.msra.mxu0 %vm2833_vm4, %v2815_v5  ;;  %960 = vst [vmem:[#allocation2 + $0x330] sm:$0xf0] %v944_v6  ;;  %961 = vst [vmem:[#allocation2 + $0x2d0] sm:$0xf0] %v945_v17  ;;  %v930_v45 = vmul.f32 %v902_v25, %v878_v26  ;;  %v2465_v30 = vmul.f32 %v2434_v35, %v878_v26  ;;  %1569 = vrot.lane.b32.xlu1 %v3744_v40, %s3647_s12 }
 0x18c   :  { %2495 = vst [vmem:[#allocation2 + $0x348] sm:$0xf0] %v2479_v22  ;;  %2496 = vst [vmem:[#allocation2 + $0x168] sm:$0xf0] %v2480_v23  ;;  %1175 = vrot.lane.b32.xlu0 %v3738_v34, %s3634_s2  ;;  %v1012_v35 = vrot.slane %v4029_v41, %v3922_v4  ;;  %v2519_v61 = vrot.slane %v4031_v42, %v3919_v3  ;;  %v4072_v6 = vor.u32 %v688_v29, %v687_v28 }
 0x18d   :  { %v946_v43 = vrot.slane %v930_v45, 4  ;;  %v2481_v44 = vrot.slane %v2465_v30, 4  ;;  %v4060_v55 = vpop.permute.xlu0 %1955  ;;  %v970_v25 = vpop.permute.xlu1 %969  ;;  %v4074_v17 = vor.u32 %v2274_v37, %v2273_v36 }
 0x18e   :  { %5447 = vst [vmem:[#allocation27_spill] sm:$0xff] %v4060_v55  ;;  %v989_v62 = vsel %vm983_vm5, %v970_v25, %v3886_v51  ;;  %v990_v5 = vsel %vm983_vm5, %v3894_v53, %v970_v25  ;;  %v702_v30 = vrot.slane %v4072_v6, %v3919_v3  ;;  %v2359_v25 = vld [vmem:[#allocation6 + $0x86] ss:$8 sm:$0xf0] }
 0x18f   :  { %962 = vst [vmem:[#allocation2 + $0x198] sm:$0xf0] %v946_v43  ;;  %2497 = vst [vmem:[#allocation2 + $0x288] sm:$0xf0] %v2481_v44  ;;  %v1038_v22 = vmul.f32 %v1004_v21, %v990_v5  ;;  %v1039_v23 = vmul.f32 %v1008_v27, %v989_v62  ;;  %v2548_v26 = vmul.f32 %v2511_v49, %v990_v5  ;;  %1373 = vrot.lane.b32.xlu1 %v3744_v40, %s3649_s14 }
 0x190   :  { %v2549_v45 = vmul.f32 %v2515_v32, %v989_v62  ;;  %869 = vrot.lane.b32.xlu0 %v3738_v34, %s3636_s21  ;;  %v698_v27 = vrot.slane %v4072_v6, %v3940_v14  ;;  %v797_v49 = vld [vmem:[#allocation6 + $0x4] ss:$8 sm:$0xf]  ;;  %v2280_v43 = vrot.slane %v4074_v17, %v3937_v13  ;;  %v2284_v44 = vrot.slane %v4074_v17, %v3940_v14 }
 0x191   :  { %1046 = vst [vmem:[#allocation2 + $0x120] sm:$0xf] %v1038_v22  ;;  %1047 = vst [vmem:[#allocation2 + $0x1a0] sm:$0xf] %v1039_v23  ;;  %v4080_v28 = vpop.permute.xlu0 %1763  ;;  %v4082_v29 = vpop.permute.xlu1 %973  ;;  %v2288_v5 = vrot.slane %v4074_v17, %v3919_v3 }
 0x192   :  { %2556 = vst [vmem:[#allocation2 + $0x240] sm:$0xf] %v2548_v26  ;;  %2557 = vst [vmem:[#allocation2 + $0x258] sm:$0xf] %v2549_v45  ;;  %v988_v21 = vsel %vm983_vm5, %v3886_v51, %v4082_v29 }
 0x193   :  { %v798_v32 = vld [vmem:[#allocation6 + $0x4] ss:$8 sm:$0xf0]  ;;  %v1040_v36 = vmul.f32 %v1012_v35, %v988_v21  ;;  %v2550_v37 = vmul.f32 %v2519_v61, %v988_v21  ;;  %1177 = vrot.lane.b32.xlu1 %v3744_v40, %s3634_s2  ;;  %v2358_v51 = vld [vmem:[#allocation6 + $0x86] ss:$8 sm:$0xf]  ;;  %v706_v61 = vrot.slane %v4072_v6, %v3922_v4 }
 0x194   :  { %979 = vrot.lane.b32.xlu0 %v3738_v34, %s3637_s22  ;;  %v4113_v26 = vor.u32 %v798_v32, %v797_v49  ;;  %v4115_v45 = vor.u32 %v2359_v25, %v2358_v51  ;;  %v492_v51 = vld [vmem:[#allocation6 + $0x1] ss:$8 sm:$0xf0] }
 0x195   :  { %1048 = vst [vmem:[#allocation2 + $0x260] sm:$0xf] %v1040_v36  ;;  %2558 = vst [vmem:[#allocation2 + $0x1b8] sm:$0xf] %v2550_v37  ;;  %v4101_v62 = vpop.permute.xlu0 %1873  ;;  %v664_v35 = vpop.permute.xlu1 %663 }
 0x196   :  { %v683_v22 = vsel %vm677_vm6, %v664_v35, %v3902_v56  ;;  %v684_v23 = vsel %vm677_vm6, %v3888_v52, %v664_v35 }
 0x197   :  { %v732_v21 = vmul.f32 %v698_v27, %v684_v23  ;;  %v733_v36 = vmul.f32 %v702_v30, %v683_v22  ;;  %v2317_v37 = vmul.f32 %v2280_v43, %v684_v23  ;;  %v2318_v0 = vmul.f32 %v2284_v44, %v683_v22  ;;  %981 = vrot.lane.b32.xlu1 %v3744_v40, %s3637_s22  ;;  %v491_v44 = vld [vmem:[#allocation6 + $0x1] ss:$8 sm:$0xf]  ;;  %v2127_v23 = vld [vmem:[#allocation6 + $0x83] ss:$8 sm:$0xf] }
 0x198   :  { %673 = vrot.lane.b32.xlu0 %v3738_v34, %s3638_s23  ;;  %v808_v30 = vrot.slane %v4113_v26, %v3940_v14  ;;  %v812_v43 = vrot.slane %v4113_v26, %v3919_v3  ;;  %v2369_v22 = vrot.slane %v4115_v45, %v3940_v14 }
 0x199   :  { %v748_v50 = vrot.slane %v732_v21, 4  ;;  %v749_v53 = vrot.slane %v733_v36, 4  ;;  %v2333_v47 = vrot.slane %v2317_v37, 4  ;;  %v2334_v35 = vrot.slane %v2318_v0, 4  ;;  %v4122_v49 = vpop.permute.xlu0 %1869  ;;  %v4124_v32 = vpop.permute.xlu1 %667 }
 0x19a   :  { %5448 = vst [vmem:[#allocation28_spill] sm:$0xff] %v4122_v49  ;;  %5449 = vst [vmem:[#allocation29_spill] sm:$0xff] %v4124_v32  ;;  %v682_v27 = vsel %vm677_vm6, %v3902_v56, %v4124_v32  ;;  %v2365_v56 = vrot.slane %v4115_v45, %v3937_v13  ;;  %v2128_v21 = vld [vmem:[#allocation6 + $0x83] ss:$8 sm:$0xf0]  ;;  %v2373_v36 = vrot.slane %v4115_v45, %v3919_v3 }
 0x19b   :  { %764 = vst [vmem:[#allocation2 + $0x110] sm:$0xf0] %v748_v50  ;;  %765 = vst [vmem:[#allocation2 + $0x90] sm:$0xf0] %v749_v53  ;;  %v734_v0 = vmul.f32 %v706_v61, %v682_v27  ;;  %v2319_v25 = vmul.f32 %v2288_v5, %v682_v27  ;;  %785 = vrot.lane.b32.xlu1 %v3744_v40, %s3631_s16  ;;  %v816_v5 = vrot.slane %v4113_v26, %v3922_v4 }
 0x19c   :  { %2349 = vst [vmem:[#allocation2 + $0x140] sm:$0xf0] %v2333_v47  ;;  %2350 = vst [vmem:[#allocation2 + $0x20] sm:$0xf0] %v2334_v35  ;;  %783 = vrot.lane.b32.xlu0 %v3738_v34, %s3631_s16  ;;  %v4154_v27 = vor.u32 %v492_v51, %v491_v44 }
 0x19d   :  { %v750_v50 = vrot.slane %v734_v0, 4  ;;  %v2335_v53 = vrot.slane %v2319_v25, 4  ;;  %v4142_v47 = vpop.permute.xlu0 %1677  ;;  %v774_v61 = vpop.permute.xlu1 %773  ;;  %v4156_v0 = vor.u32 %v2128_v21, %v2127_v23 }
 0x19e   :  { %v793_v37 = vsel %vm787_vm7, %v774_v61, %v3912_v63  ;;  %v794_v35 = vsel %vm787_vm7, %v3932_v11, %v774_v61  ;;  %5450 = vst [vmem:[#allocation30_spill] sm:$0xff] %v4154_v27 }
 0x19f   :  { %5451 = vst [vmem:[#allocation31_spill] sm:$0xff] %v4156_v0  ;;  %766 = vst [vmem:[#allocation2 + $0x318] sm:$0xf0] %v750_v50  ;;  %v842_v25 = vmul.f32 %v808_v30, %v794_v35  ;;  %v843_v52 = vmul.f32 %v812_v43, %v793_v37  ;;  %v2402_v33 = vmul.f32 %v2365_v56, %v794_v35  ;;  %589 = vrot.lane.b32.xlu1 %v3744_v40, %s3643_s28  ;;  %v2213_v50 = vld [vmem:[#allocation6 + $0x84] ss:$8 sm:$0xf0] }
 0x1a0   :  { %2351 = vst [vmem:[#allocation2 + $0x68] sm:$0xf0] %v2335_v53  ;;  %v2403_v32 = vmul.f32 %v2369_v22, %v793_v37  ;;  %1459 = vrot.lane.b32.xlu0 %v3744_v40, %s3646_s11  ;;  %v502_v43 = vrot.slane %v4154_v27, %v3940_v14  ;;  %v506_v56 = vrot.slane %v4154_v27, %v3919_v3 }
 0x1a1   :  { %850 = vst [vmem:[#allocation2 + $0x330] sm:$0xf] %v842_v25  ;;  %851 = vst [vmem:[#allocation2 + $0x2d0] sm:$0xf] %v843_v52  ;;  %v4162_v44 = vpop.permute.xlu0 %1445  ;;  %v4164_v51 = vpop.permute.xlu1 %777  ;;  %v2134_v23 = vrot.slane %v4156_v0, %v3937_v13  ;;  %v2138_v21 = vrot.slane %v4156_v0, %v3940_v14 }
 0x1a2   :  { %2410 = vst [vmem:[#allocation2 + $0x348] sm:$0xf] %v2402_v33  ;;  %2411 = vst [vmem:[#allocation2 + $0x168] sm:$0xf] %v2403_v32  ;;  %v792_v30 = vsel %vm787_vm7, %v3912_v63, %v4164_v51 }
 0x1a3   :  { %5452 = vst [vmem:[#allocation32_spill] sm:$0xff] %v4162_v44  ;;  %v601_v52 = vld [vmem:[#allocation6 + $0x2] ss:$8 sm:$0xf]  ;;  %v844_v32 = vmul.f32 %v816_v5, %v792_v30  ;;  %v2404_v22 = vmul.f32 %v2373_v36, %v792_v30  ;;  %1063 = vrot.lane.b32.xlu1 %v3742_v39, %s3635_s3  ;;  %v510_v5 = vrot.slane %v4154_v27, %v3922_v4 }
 0x1a4   :  { %v602_v33 = vld [vmem:[#allocation6 + $0x2] ss:$8 sm:$0xf0]  ;;  %v2212_v63 = vld [vmem:[#allocation6 + $0x84] ss:$8 sm:$0xf]  ;;  %1263 = vrot.lane.b32.xlu0 %v3744_v40, %s3648_s13  ;;  %v2142_v36 = vrot.slane %v4156_v0, %v3919_v3 }
 0x1a5   :  { %852 = vst [vmem:[#allocation2 + $0x198] sm:$0xf] %v844_v32  ;;  %2412 = vst [vmem:[#allocation2 + $0x288] sm:$0xf] %v2404_v22  ;;  %v4183_v53 = vpop.permute.xlu0 %1449  ;;  %v468_v61 = vpop.permute.xlu1 %467  ;;  %v4195_v25 = vor.u32 %v602_v33, %v601_v52  ;;  %v4197_v30 = vor.u32 %v2213_v50, %v2212_v63 }
 0x1a6   :  { %5453 = vst [vmem:[#allocation33_spill] sm:$0xff] %v4183_v53  ;;  %v487_v37 = vsel %vm481_vm8, %v468_v61, %v3955_v19  ;;  %v488_v35 = vsel %vm481_vm8, %v3896_v54, %v468_v61  ;;  %v406_v63 = vld [vmem:[#allocation6] ss:$8 sm:$0xf0] }
 0x1a7   :  { %v536_v32 = vmul.f32 %v502_v43, %v488_v35  ;;  %v537_v22 = vmul.f32 %v506_v56, %v487_v37  ;;  %v2171_v11 = vmul.f32 %v2134_v23, %v488_v35  ;;  %v2172_v44 = vmul.f32 %v2138_v21, %v487_v37  ;;  %1173 = vrot.lane.b32.xlu1 %v3742_v39, %s3634_s2  ;;  %v405_v21 = vld [vmem:[#allocation6] ss:$8 sm:$0xf]  ;;  %v2066_v37 = vld [vmem:[#allocation6 + $0x82] ss:$8 sm:$0xf] }
 0x1a8   :  { %1067 = vrot.lane.b32.xlu0 %v3744_v40, %s3635_s3  ;;  %v612_v56 = vrot.slane %v4195_v25, %v3940_v14  ;;  %v616_v23 = vrot.slane %v4195_v25, %v3919_v3  ;;  %v2223_v50 = vrot.slane %v4197_v30, %v3940_v14  ;;  %v2067_v35 = vld [vmem:[#allocation6 + $0x82] ss:$8 sm:$0xf0] }
 0x1a9   :  { %v552_v53 = vrot.slane %v536_v32, 4  ;;  %v553_v0 = vrot.slane %v537_v22, 4  ;;  %v2187_v27 = vrot.slane %v2171_v11, 4  ;;  %v2188_v61 = vrot.slane %v2172_v44, 4  ;;  %v4204_v52 = vpop.permute.xlu0 %1555  ;;  %v4206_v33 = vpop.permute.xlu1 %471 }
 0x1aa   :  { %5454 = vst [vmem:[#allocation34_spill] sm:$0xff] %v4204_v52  ;;  %v486_v43 = vsel %vm481_vm8, %v3955_v19, %v4206_v33  ;;  %v2219_v19 = vrot.slane %v4197_v30, %v3937_v13  ;;  %v2227_v32 = vrot.slane %v4197_v30, %v3919_v3 }
 0x1ab   :  { %568 = vst [vmem:[#allocation2 + $0xd0] sm:$0xf0] %v552_v53  ;;  %569 = vst [vmem:[#allocation2 + $0x10] sm:$0xf0] %v553_v0  ;;  %v538_v11 = vmul.f32 %v510_v5, %v486_v43  ;;  %v2173_v44 = vmul.f32 %v2142_v36, %v486_v43  ;;  %867 = vrot.lane.b32.xlu1 %v3742_v39, %s3636_s21  ;;  %v620_v36 = vrot.slane %v4195_v25, %v3922_v4 }
 0x1ac   :  { %2203 = vst [vmem:[#allocation2 + $0x30] sm:$0xf0] %v2187_v27  ;;  %2204 = vst [vmem:[#allocation2 + $0x210] sm:$0xf0] %v2188_v61  ;;  %871 = vrot.lane.b32.xlu0 %v3744_v40, %s3636_s21  ;;  %v4236_v43 = vor.u32 %v406_v63, %v405_v21 }
 0x1ad   :  { %v554_v53 = vrot.slane %v538_v11, 4  ;;  %v2189_v0 = vrot.slane %v2173_v44, 4  ;;  %v4224_v27 = vpop.permute.xlu0 %1559  ;;  %v578_v5 = vpop.permute.xlu1 %577  ;;  %v4238_v11 = vor.u32 %v2067_v35, %v2066_v37  ;;  %v1982_v35 = vld [vmem:[#allocation6 + $0x81] ss:$8 sm:$0xf0] }
 0x1ae   :  { %5455 = vst [vmem:[#allocation35_spill] sm:$0xff] %v4224_v27  ;;  %v597_v22 = vsel %vm591_vm9, %v578_v5, %v3976_v38  ;;  %v598_v61 = vsel %vm591_vm9, %v3996_v9, %v578_v5 }
 0x1af   :  { %570 = vst [vmem:[#allocation2 + $0x48] sm:$0xf0] %v554_v53  ;;  %2205 = vst [vmem:[#allocation2 + $0x1e0] sm:$0xf0] %v2189_v0  ;;  %v646_v44 = vmul.f32 %v612_v56, %v598_v61  ;;  %v647_v54 = vmul.f32 %v616_v23, %v597_v22  ;;  %v2256_v52 = vmul.f32 %v2219_v19, %v598_v61  ;;  %977 = vrot.lane.b32.xlu1 %v3742_v39, %s3637_s22 }
 0x1b0   :  { %v2257_v27 = vmul.f32 %v2223_v50, %v597_v22  ;;  %675 = vrot.lane.b32.xlu0 %v3744_v40, %s3638_s23  ;;  %v416_v23 = vrot.slane %v4236_v43, %v3940_v14  ;;  %v420_v19 = vrot.slane %v4236_v43, %v3919_v3  ;;  %v2073_v50 = vrot.slane %v4238_v11, %v3937_v13 }
 0x1b1   :  { %654 = vst [vmem:[#allocation2 + $0x110] sm:$0xf] %v646_v44  ;;  %655 = vst [vmem:[#allocation2 + $0x90] sm:$0xf] %v647_v54  ;;  %v4244_v21 = vpop.permute.xlu0 %1249  ;;  %v4246_v63 = vpop.permute.xlu1 %581  ;;  %v2077_v37 = vrot.slane %v4238_v11, %v3940_v14 }
 0x1b2   :  { %2264 = vst [vmem:[#allocation2 + $0x140] sm:$0xf] %v2256_v52  ;;  %2265 = vst [vmem:[#allocation2 + $0x20] sm:$0xf] %v2257_v27  ;;  %v596_v56 = vsel %vm591_vm9, %v3976_v38, %v4246_v63  ;;  %v424_v27 = vrot.slane %v4236_v43, %v3922_v4 }
 0x1b3   :  { %5456 = vst [vmem:[#allocation36_spill] sm:$0xff] %v4244_v21  ;;  %v648_v54 = vmul.f32 %v620_v36, %v596_v56  ;;  %v2258_v52 = vmul.f32 %v2227_v32, %v596_v56  ;;  %671 = vrot.lane.b32.xlu1 %v3742_v39, %s3638_s23  ;;  %v1981_v38 = vld [vmem:[#allocation6 + $0x81] ss:$8 sm:$0xf]  ;;  %v2081_v32 = vrot.slane %v4238_v11, %v3919_v3 }
 0x1b4   :  { %479 = vrot.lane.b32.xlu0 %v3744_v40, %s3639_s24  ;;  %v4277_v22 = vor.u32 %v1982_v35, %v1981_v38  ;;  %v1785_v38 = vld [vmem:[#allocation6 + $0x47] ss:$8 sm:$0xf] }
 0x1b5   :  { %656 = vst [vmem:[#allocation2 + $0x318] sm:$0xf] %v648_v54  ;;  %2266 = vst [vmem:[#allocation2 + $0x68] sm:$0xf] %v2258_v52  ;;  %v4265_v53 = vpop.permute.xlu0 %1253  ;;  %v381_v0 = vpop.permute.xlu1 %380 }
 0x1b6   :  { %5457 = vst [vmem:[#allocation37_spill] sm:$0xff] %v4265_v53  ;;  %v402_v5 = vsel %vm5415_vm10, %v381_v0, %v4017_v31  ;;  %v403_v36 = vsel %vm5415_vm10, %v3904_v57, %v381_v0  ;;  %5458 = vst [vmem:[#allocation38_spill] sm:$0xff] %v4277_v22  ;;  %v1786_v35 = vld [vmem:[#allocation6 + $0x47] ss:$8 sm:$0xf0] }
 0x1b7   :  { %v450_v61 = vmul.f32 %v416_v23, %v403_v36  ;;  %v451_v44 = vmul.f32 %v420_v19, %v402_v5  ;;  %v2110_v56 = vmul.f32 %v2073_v50, %v403_v36  ;;  %v2111_v54 = vmul.f32 %v2077_v37, %v402_v5  ;;  %781 = vrot.lane.b32.xlu1 %v3742_v39, %s3631_s16 }
 0x1b8   :  { %392 = vrot.lane.b32.xlu0 %v3744_v40, %s3640_s25  ;;  %v1988_v37 = vrot.slane %v4277_v22, %v3937_v13  ;;  %v1992_v5 = vrot.slane %v4277_v22, %v3940_v14  ;;  %v4300_v36 = vor.u32 %v1786_v35, %v1785_v38 }
 0x1b9   :  { %458 = vst [vmem:[#allocation2 + $0xd0] sm:$0xf] %v450_v61  ;;  %459 = vst [vmem:[#allocation2 + $0x10] sm:$0xf] %v451_v44  ;;  %v4283_v52 = vpop.permute.xlu0 %1359  ;;  %v4285_v0 = vpop.permute.xlu1 %384 }
 0x1ba   :  { %2118 = vst [vmem:[#allocation2 + $0x30] sm:$0xf] %v2110_v56  ;;  %2119 = vst [vmem:[#allocation2 + $0x210] sm:$0xf] %v2111_v54  ;;  %v401_v23 = vsel %vm5415_vm10, %v4017_v31, %v4285_v0  ;;  %v4303_v31 = vsub.s32 4, %v3906_v58  ;;  %v1996_v56 = vrot.slane %v4277_v22, %v3919_v3  ;;  %v1090_v54 = vrot.slane %v3928_v7, %v3940_v14 }
 0x1bb   :  { %5459 = vst [vmem:[#allocation39_spill] sm:$0xff] %v4283_v52  ;;  %5460 = vst [vmem:[#allocation40_spill] sm:$0xff] %v4285_v0  ;;  %v452_v19 = vmul.f32 %v424_v27, %v401_v23  ;;  %v2112_v50 = vmul.f32 %v2081_v32, %v401_v23  ;;  %475 = vrot.lane.b32.xlu1 %v3742_v39, %s3639_s24  ;;  %v1094_v23 = vrot.slane %v3928_v7, %v3919_v3  ;;  %v1896_v52 = vld [vmem:[#allocation6 + $0x80] ss:$8 sm:$0xf0] }
 0x1bc   :  { %477 = vrot.lane.b32.xlu0 %v3738_v34, %s3639_s24  ;;  %5461 = vst [vmem:[#allocation41_spill] sm:$0xff] %v4300_v36  ;;  %v1102_v9 = vrot.slane %v3928_v7, %v4303_v31  ;;  %v2584_v58 = vrot.slane %v3930_v8, %v3922_v4  ;;  %v1800_v7 = vrot.slane %v4300_v36, %v3919_v3 }
 0x1bd   :  { %460 = vst [vmem:[#allocation2 + $0x48] sm:$0xf] %v452_v19  ;;  %2120 = vst [vmem:[#allocation2 + $0x1e0] sm:$0xf] %v2112_v50  ;;  %v4305_v27 = vpop.permute.xlu0 %1363  ;;  %v1958_v32 = vpop.permute.xlu1 %1957  ;;  %v2572_v19 = vrot.slane %v3930_v8, %v3937_v13  ;;  %v2576_v50 = vrot.slane %v3930_v8, %v3940_v14 }
 0x1be   :  { %5462 = vst [vmem:[#allocation42_spill] sm:$0xff] %v4305_v27  ;;  %v1977_v61 = vsel %vm1971_vm11, %v1958_v32, %v4038_v24  ;;  %v1978_v44 = vsel %vm1971_vm11, %v4060_v55, %v1958_v32  ;;  %v1895_v32 = vld [vmem:[#allocation6 + $0x80] ss:$8 sm:$0xf] }
 0x1bf   :  { %v2025_v38 = vmul.f32 %v1988_v37, %v1978_v44  ;;  %v2026_v35 = vmul.f32 %v1992_v5, %v1977_v61  ;;  %585 = vrot.lane.b32.xlu1 %v3742_v39, %s3643_s28  ;;  %v1792_v37 = vrot.slane %v4300_v36, %v3937_v13  ;;  %v1796_v5 = vrot.slane %v4300_v36, %v3940_v14 }
 0x1c0   :  { %587 = vrot.lane.b32.xlu0 %v3738_v34, %s3643_s28 }
 0x1c1   :  { %v2041_v61 = vrot.slane %v2025_v38, 4  ;;  %v2042_v44 = vrot.slane %v2026_v35, 4  ;;  %v4332_v55 = vpop.permute.xlu1 %1961  ;;  %v1056_v57 = vpop.permute.xlu0 %1055 }
 0x1c2   :  { %v1976_v27 = vsel %vm1971_vm11, %v4038_v24, %v4332_v55  ;;  %v1075_v38 = vsel %vm1069_vm1, %v1056_v57, %v3864_v46  ;;  %v1076_v35 = vsel %vm1069_vm1, %v3872_v48, %v1056_v57  ;;  %v1212_v46 = vrot.slane %v3942_v15, %v4303_v31 }
 0x1c3   :  { %2057 = vst [vmem:[#allocation2 + $0x218] sm:$0xf0] %v2041_v61  ;;  %2058 = vst [vmem:[#allocation2 + $0x370] sm:$0xf0] %v2042_v44  ;;  %v2027_v8 = vmul.f32 %v1996_v56, %v1976_v27  ;;  %v1124_v21 = vmul.f32 %v1090_v54, %v1076_v35  ;;  %v1125_v53 = vmul.f32 %v1094_v23, %v1075_v38  ;;  %388 = vrot.lane.b32.xlu1 %v3742_v39, %s3640_s25 }
 0x1c4   :  { %v2609_v0 = vmul.f32 %v2572_v19, %v1076_v35  ;;  %v2610_v24 = vmul.f32 %v2576_v50, %v1075_v38  ;;  %390 = vrot.lane.b32.xlu0 %v3738_v34, %s3640_s25  ;;  %v2669_v57 = vrot.slane %v3944_v16, %v3922_v4  ;;  %v4358_v48 = vor.u32 %v1896_v52, %v1895_v32 }
 0x1c5   :  { %v2043_v61 = vrot.slane %v2027_v8, 4  ;;  %v1140_v27 = vrot.slane %v1124_v21, 4  ;;  %v1141_v56 = vrot.slane %v1125_v53, 4  ;;  %v1762_v23 = vpop.permute.xlu1 %1761  ;;  %v4360_v19 = vpop.permute.xlu0 %1061 }
 0x1c6   :  { %v2625_v54 = vrot.slane %v2609_v0, 4  ;;  %v2626_v44 = vrot.slane %v2610_v24, 4  ;;  %v1781_v50 = vsel %vm5420_vm12, %v1762_v23, %v4080_v28  ;;  %v1782_v38 = vsel %vm5420_vm12, %v3914_v1, %v1762_v23  ;;  %v1700_v23 = vld [vmem:[#allocation6 + $0x46] ss:$8 sm:$0xf0] }
 0x1c7   :  { %v1073_v8 = vsel %vm1069_vm1, %v3957_v20, %v4360_v19  ;;  %2059 = vst [vmem:[#allocation2 + $0xa8] sm:$0xf0] %v2043_v61  ;;  %1156 = vst [vmem:[#allocation2 + $0x120] sm:$0xf0] %v1140_v27  ;;  %v1829_v21 = vmul.f32 %v1792_v37, %v1782_v38  ;;  %v1830_v53 = vmul.f32 %v1796_v5, %v1781_v50  ;;  %1965 = vrot.lane.b32.xlu1 %v3742_v39, %s3644_s29 }
 0x1c8   :  { %1157 = vst [vmem:[#allocation2 + $0x1a0] sm:$0xf0] %v1141_v56  ;;  %2641 = vst [vmem:[#allocation2 + $0x240] sm:$0xf0] %v2625_v54  ;;  %v1127_v52 = vmul.f32 %v1102_v9, %v1073_v8  ;;  %v2612_v0 = vmul.f32 %v2584_v58, %v1073_v8  ;;  %1967 = vrot.lane.b32.xlu0 %v3738_v34, %s3644_s29  ;;  %v1902_v20 = vrot.slane %v4358_v48, %v3937_v13 }
 0x1c9   :  { %2642 = vst [vmem:[#allocation2 + $0x258] sm:$0xf0] %v2626_v44  ;;  %v1845_v32 = vrot.slane %v1829_v21, 4  ;;  %v1846_v35 = vrot.slane %v1830_v53, 4  ;;  %v4379_v37 = vpop.permute.xlu1 %1765  ;;  %v4381_v9 = vpop.permute.xlu0 %1171  ;;  %v1906_v27 = vrot.slane %v4358_v48, %v3940_v14  ;;  %v906_v56 = vrot.slane %v3988_v59, %v4303_v31 }
 0x1ca   :  { %v1143_v24 = vrot.slane %v1127_v52, 4  ;;  %v2628_v61 = vrot.slane %v2612_v0, 4  ;;  %v1780_v58 = vsel %vm5420_vm12, %v4080_v28, %v4379_v37  ;;  %v1183_v5 = vsel %vm1179_vm2, %v3998_v10, %v4381_v9  ;;  %v1699_v54 = vld [vmem:[#allocation6 + $0x46] ss:$8 sm:$0xf] }
 0x1cb   :  { %1861 = vst [vmem:[#allocation2 + $0x270] sm:$0xf0] %v1845_v32  ;;  %1862 = vst [vmem:[#allocation2 + $0xf8] sm:$0xf0] %v1846_v35  ;;  %v1831_v44 = vmul.f32 %v1800_v7, %v1780_v58  ;;  %v1237_v50 = vmul.f32 %v1212_v46, %v1183_v5  ;;  %v2697_v28 = vmul.f32 %v2669_v57, %v1183_v5  ;;  %1969 = vrot.lane.b32.xlu1 %v3744_v40, %s3644_s29 }
 0x1cc   :  { %1159 = vst [vmem:[#allocation2 + $0xe0] sm:$0xf0] %v1143_v24  ;;  %2644 = vst [vmem:[#allocation2 + $0x118] sm:$0xf0] %v2628_v61  ;;  %v2438_v10 = vrot.slane %v3990_v60, %v3922_v4  ;;  %1769 = vrot.lane.b32.xlu0 %v3742_v39, %s3641_s26  ;;  %v1910_v7 = vrot.slane %v4358_v48, %v3919_v3  ;;  %v1016_v46 = vrot.slane %v4029_v41, %v4303_v31 }
 0x1cd   :  { %v1847_v38 = vrot.slane %v1831_v44, 4  ;;  %1245 = vst [vmem:[#allocation2 + $0x98] sm:$0xf] %v1237_v50  ;;  %2705 = vst [vmem:[#allocation2 + $0x18] sm:$0xf] %v2697_v28  ;;  %v1872_v8 = vpop.permute.xlu1 %1871  ;;  %v4401_v21 = vpop.permute.xlu0 %865  ;;  %v4407_v57 = vor.u32 %v1700_v23, %v1699_v54  ;;  %v2523_v35 = vrot.slane %v4031_v42, %v3922_v4  ;;  %v2800_v50 = vld [vmem:[#allocation2 + $0x168] sm:$0xff] }
 0x1ce   :  { %v1891_v53 = vsel %vm1885_vm13, %v1872_v8, %v4101_v62  ;;  %v1892_v52 = vsel %vm1885_vm13, %v4122_v49, %v1872_v8  ;;  %v877_v0 = vsel %vm873_vm3, %v4041_v18, %v4401_v21  ;;  %v1471_v28 = vld [vmem:[#allocation6 + $0x43] ss:$8 sm:$0xf] }
 0x1cf   :  { %v2807_v32 = vld [vmem:[#allocation2 + $0x240] sm:$0xff]  ;;  %1863 = vst [vmem:[#allocation2 + $0x1c8] sm:$0xf0] %v1847_v38  ;;  %v1939_v24 = vmul.f32 %v1902_v20, %v1892_v52  ;;  %v1940_v61 = vmul.f32 %v1906_v27, %v1891_v53  ;;  %v931_v58 = vmul.f32 %v906_v56, %v877_v0  ;;  %v2466_v5 = vmul.f32 %v2438_v10, %v877_v0  ;;  %v2799_v8 = vld [vmem:[#allocation2 + $0x348] sm:$0xff] }
 0x1d0   :  { %v2808_v54 = vld [vmem:[#allocation2 + $0x258] sm:$0xff]  ;;  %1771 = vrot.lane.b32.xlu1 %v3738_v34, %s3641_s26  ;;  %1773 = vrot.lane.b32.xlu0 %v3744_v40, %s3641_s26  ;;  %v1706_v27 = vrot.slane %v4407_v57, %v3937_v13  ;;  %v1710_v56 = vrot.slane %v4407_v57, %v3940_v14  ;;  %v710_v53 = vrot.slane %v4072_v6, %v4303_v31 }
 0x1d1   :  { %2864 = vmatprep.subr.mxu0 %v2808_v54  ;;  %1947 = vst [vmem:[#allocation2 + $0x218] sm:$0xf] %v1939_v24  ;;  %1948 = vst [vmem:[#allocation2 + $0x370] sm:$0xf] %v1940_v61  ;;  %v947_v18 = vrot.slane %v931_v58, 4  ;;  %v2482_v23 = vrot.slane %v2466_v5, 4  ;;  %v4425_v44 = vpop.permute.xlu1 %1875  ;;  %v4427_v20 = vpop.permute.xlu0 %975  ;;  %v2292_v52 = vrot.slane %v4074_v17, %v3922_v4  ;;  %v1714_v5 = vrot.slane %v4407_v57, %v3919_v3 }
 0x1d2   :  { %2865 = vmatpush1.msra.mxu0 %v2807_v32  ;;  %v1890_v10 = vsel %vm1885_vm13, %v4101_v62, %v4425_v44  ;;  %v987_v38 = vsel %vm983_vm5, %v4082_v29, %v4427_v20  ;;  %v1472_v0 = vld [vmem:[#allocation6 + $0x43] ss:$8 sm:$0xf0] }
 0x1d3   :  { %2866 = vmatprep.subr.mxu0 %v2800_v50  ;;  %963 = vst [vmem:[#allocation2 + $0x1a8] sm:$0xf0] %v947_v18  ;;  %2498 = vst [vmem:[#allocation2 + $0x1d0] sm:$0xf0] %v2482_v23  ;;  %v1941_v32 = vmul.f32 %v1910_v7, %v1890_v10  ;;  %v1041_v24 = vmul.f32 %v1016_v46, %v987_v38  ;;  %v2551_v61 = vmul.f32 %v2523_v35, %v987_v38  ;;  %v2792_v62 = vld [vmem:[#allocation2 + $0x20] sm:$0xff]  ;;  %v2784_v46 = vld [vmem:[#allocation2 + $0x210] sm:$0xff] }
 0x1d4   :  { %2867 = vmatpush1.msra.mxu0 %v2799_v8  ;;  %1879 = vrot.lane.b32.xlu1 %v3742_v39, %s3645_s10  ;;  %v2791_v29 = vld [vmem:[#allocation2 + $0x140] sm:$0xff]  ;;  %v2818_v58 = vld [vmem:[#allocation2 + $0x18] sm:$0xf]  ;;  %v2817_v54 = vld [vmem:[#allocation2 + $0x8] sm:$0xf]  ;;  %v820_v18 = vrot.slane %v4113_v26, %v4303_v31  ;;  %v2377_v23 = vrot.slane %v4115_v45, %v3922_v4  ;;  %v4459_v50 = vor.u32 %v1472_v0, %v1471_v28 }
 0x1d5   :  { %2868 = vmatprep.subr.mxu0 %v2792_v62  ;;  %1881 = vrot.lane.b32.xlu0 %v3738_v34, %s3645_s10  ;;  %1949 = vst [vmem:[#allocation2 + $0xa8] sm:$0xf] %v1941_v32  ;;  %1049 = vst [vmem:[#allocation2 + $0xe0] sm:$0xf] %v1041_v24  ;;  %v1676_v7 = vpop.permute.xlu1 %1675  ;;  %v4453_v35 = vpop.permute.xlu0 %669  ;;  %v5463_v8 = vld [vmem:[#allocation29_spill] sm:$0xff]  ;;  %v2783_v24 = vld [vmem:[#allocation2 + $0x30] sm:$0xff] }
 0x1d6   :  { %2559 = vst [vmem:[#allocation2 + $0x118] sm:$0xf] %v2551_v61  ;;  %2869 = vmatpush1.msra.mxu0 %v2791_v29  ;;  %3511 = vmatprep.subr.msk.mxu1 %vm2833_vm4, %v2818_v58  ;;  %v1695_v10 = vsel %vm1689_vm14, %v1676_v7, %v4142_v47  ;;  %v1696_v38 = vsel %vm1689_vm14, %v3934_v12, %v1676_v7  ;;  %v1581_v7 = vld [vmem:[#allocation6 + $0x44] ss:$8 sm:$0xf] }
 0x1d7   :  { %2870 = vmatprep.subr.mxu0 %v2784_v46  ;;  %v681_v32 = vsel %vm677_vm6, %v5463_v8, %v4453_v35  ;;  %3512 = vmatpush1.msk.msra.mxu1 %vm2833_vm4, %v2817_v54  ;;  %v1743_v61 = vmul.f32 %v1706_v27, %v1696_v38  ;;  %v1744_v28 = vmul.f32 %v1710_v56, %v1695_v10  ;;  %v5464_v38 = vld [vmem:[#allocation30_spill] sm:$0xff] }
 0x1d8   :  { %v735_v0 = vmul.f32 %v710_v53, %v681_v32  ;;  %v2320_v62 = vmul.f32 %v2292_v52, %v681_v32  ;;  %2871 = vmatpush1.msra.mxu0 %v2783_v24  ;;  %1883 = vrot.lane.b32.xlu1 %v3744_v40, %s3645_s10  ;;  %v2776_v29 = vld [vmem:[#allocation2 + $0x370] sm:$0xff]  ;;  %v2775_v58 = vld [vmem:[#allocation2 + $0x218] sm:$0xff]  ;;  %v1482_v56 = vrot.slane %v4459_v50, %v3940_v14 }
 0x1d9   :  { %1683 = vrot.lane.b32.xlu0 %v3742_v39, %s3642_s27  ;;  %1751 = vst [vmem:[#allocation2 + $0x270] sm:$0xf] %v1743_v61  ;;  %1752 = vst [vmem:[#allocation2 + $0xf8] sm:$0xf] %v1744_v28  ;;  %v4476_v12 = vpop.permute.xlu1 %1679  ;;  %2872 = vmatprep.subr.mxu0 %v2776_v29  ;;  %v4478_v27 = vpop.permute.xlu0 %779  ;;  %v1486_v10 = vrot.slane %v4459_v50, %v3919_v3  ;;  %v514_v32 = vrot.slane %v5464_v38, %v4303_v31 }
 0x1da   :  { %v751_v46 = vrot.slane %v735_v0, 4  ;;  %v2336_v8 = vrot.slane %v2320_v62, 4  ;;  %v1582_v53 = vld [vmem:[#allocation6 + $0x44] ss:$8 sm:$0xf0]  ;;  %v1694_v52 = vsel %vm1689_vm14, %v4142_v47, %v4476_v12  ;;  %v791_v54 = vsel %vm787_vm7, %v4164_v51, %v4478_v27  ;;  %2873 = vmatpush1.msra.mxu0 %v2775_v58 }
 0x1db   :  { %v1745_v24 = vmul.f32 %v1714_v5, %v1694_v52  ;;  %v845_v61 = vmul.f32 %v820_v18, %v791_v54  ;;  %v2405_v28 = vmul.f32 %v2377_v23, %v791_v54  ;;  %v5465_v0 = vld [vmem:[#allocation31_spill] sm:$0xff]  ;;  %v4501_v62 = vor.u32 %v1582_v53, %v1581_v7  ;;  %v5468_v58 = vld [vmem:[#allocation33_spill] sm:$0xff]  ;;  %v5469_v7 = vld [vmem:[#allocation32_spill] sm:$0xff] }
 0x1dc   :  { %767 = vst [vmem:[#allocation2 + $0x148] sm:$0xf0] %v751_v46  ;;  %2352 = vst [vmem:[#allocation2 + $0x78] sm:$0xf0] %v2336_v8  ;;  %v2146_v47 = vrot.slane %v5465_v0, %v3922_v4  ;;  %1685 = vrot.lane.b32.xlu1 %v3738_v34, %s3642_s27  ;;  %v2809_v18 = vld [vmem:[#allocation2 + $0x1b8] sm:$0xff]  ;;  %v1490_v23 = vrot.slane %v4459_v50, %v3922_v4  ;;  %v2231_v52 = vrot.slane %v4197_v30, %v3922_v4 }
 0x1dd   :  { %1687 = vrot.lane.b32.xlu0 %v3744_v40, %s3642_s27  ;;  %v2810_v51 = vld [vmem:[#allocation2 + $0x118] sm:$0xff]  ;;  %5466 = vst [vmem:[#allocation29_spill] sm:$0xff] %v4501_v62  ;;  %1753 = vst [vmem:[#allocation2 + $0x1c8] sm:$0xf] %v1745_v24  ;;  %v1448_v29 = vpop.permute.xlu1 %1447  ;;  %v4503_v5 = vpop.permute.xlu0 %473  ;;  %v624_v40 = vrot.slane %v4195_v25, %v4303_v31 }
 0x1de   :  { %853 = vst [vmem:[#allocation2 + $0x1a8] sm:$0xf] %v845_v61  ;;  %2413 = vst [vmem:[#allocation2 + $0x1d0] sm:$0xf] %v2405_v28  ;;  %2935 = vmatprep.subr.mxu1 %v2810_v51  ;;  %v1467_v46 = vsel %vm1461_vm15, %v1448_v29, %v5468_v58  ;;  %v1468_v8 = vsel %vm1461_vm15, %v5469_v7, %v1448_v29  ;;  %v485_v53 = vsel %vm481_vm8, %v4206_v33, %v4503_v5  ;;  %v5470_v51 = vld [vmem:[#allocation12_spill] sm:$0xff] }
 0x1df   :  { %5467 = vst [vmem:[#allocation30_spill] sm:$0xff] %v4503_v5  ;;  %2936 = vmatpush1.msra.mxu1 %v2809_v18  ;;  %v1516_v54 = vmul.f32 %v1482_v56, %v1468_v8  ;;  %v1517_v24 = vmul.f32 %v1486_v10, %v1467_v46  ;;  %v539_v61 = vmul.f32 %v514_v32, %v485_v53 }
 0x1e0   :  { %v2174_v28 = vmul.f32 %v2146_v47, %v485_v53  ;;  %1453 = vrot.lane.b32.xlu1 %v5470_v51, %s3646_s11  ;;  %v2768_v29 = vld [vmem:[#allocation2 + $0xf8] sm:$0xff]  ;;  %v2767_v49 = vld [vmem:[#allocation2 + $0x270] sm:$0xff]  ;;  %v1592_v33 = vrot.slane %v4501_v62, %v3940_v14  ;;  %v1596_v8 = vrot.slane %v4501_v62, %v3919_v3  ;;  %v428_v53 = vrot.slane %v4236_v43, %v4303_v31 }
 0x1e1   :  { %1455 = vrot.lane.b32.xlu0 %v3742_v39, %s3646_s11  ;;  %v1532_v18 = vrot.slane %v1516_v54, 4  ;;  %v1533_v1 = vrot.slane %v1517_v24, 4  ;;  %v555_v5 = vrot.slane %v539_v61, 4  ;;  %v4528_v10 = vpop.permute.xlu1 %1451  ;;  %2874 = vmatprep.subr.mxu0 %v2768_v29  ;;  %v4530_v32 = vpop.permute.xlu0 %583  ;;  %v1276_v29 = vld [vmem:[#allocation6 + $0x41] ss:$8 sm:$0xf0] }
 0x1e2   :  { %v2190_v56 = vrot.slane %v2174_v28, 4  ;;  %5471 = vst [vmem:[#allocation31_spill] sm:$0xff] %v4528_v10  ;;  %5472 = vst [vmem:[#allocation33_spill] sm:$0xff] %v4530_v32  ;;  %v1466_v47 = vsel %vm1461_vm15, %v5468_v58, %v4528_v10  ;;  %v595_v46 = vsel %vm591_vm9, %v4246_v63, %v4530_v32  ;;  %2875 = vmatpush1.msra.mxu0 %v2767_v49  ;;  %v1275_v28 = vld [vmem:[#allocation6 + $0x41] ss:$8 sm:$0xf] }
 0x1e3   :  { %1548 = vst [vmem:[#allocation2 + $0x2f0] sm:$0xf0] %v1532_v18  ;;  %1549 = vst [vmem:[#allocation2 + $0x358] sm:$0xf0] %v1533_v1  ;;  %v1518_v54 = vmul.f32 %v1490_v23, %v1466_v47  ;;  %v649_v24 = vmul.f32 %v624_v40, %v595_v46  ;;  %v2259_v61 = vmul.f32 %v2231_v52, %v595_v46  ;;  %v2801_v23 = vld [vmem:[#allocation2 + $0x288] sm:$0xff]  ;;  %v5473_v18 = vld [vmem:[#allocation35_spill] sm:$0xff] }
 0x1e4   :  { %571 = vst [vmem:[#allocation2 + $0x360] sm:$0xf0] %v555_v5  ;;  %2206 = vst [vmem:[#allocation2 + $0x50] sm:$0xf0] %v2190_v56  ;;  %v2085_v58 = vrot.slane %v4238_v11, %v3922_v4  ;;  %1457 = vrot.lane.b32.xlu1 %v3738_v34, %s3646_s11  ;;  %v1600_v40 = vrot.slane %v4501_v62, %v3922_v4  ;;  %v2000_v52 = vrot.slane %v4277_v22, %v3922_v4  ;;  %v5474_v47 = vld [vmem:[#allocation34_spill] sm:$0xff] }
 0x1e5   :  { %1563 = vrot.lane.b32.xlu0 %v5470_v51, %s3647_s12  ;;  %v2802_v49 = vld [vmem:[#allocation2 + $0x1d0] sm:$0xff]  ;;  %v1534_v63 = vrot.slane %v1518_v54, 4  ;;  %657 = vst [vmem:[#allocation2 + $0x148] sm:$0xf] %v649_v24  ;;  %2267 = vst [vmem:[#allocation2 + $0x78] sm:$0xf] %v2259_v61  ;;  %v1558_v1 = vpop.permute.xlu1 %1557  ;;  %v4550_v5 = vpop.permute.xlu0 %386  ;;  %v4566_v61 = vor.u32 %v1276_v29, %v1275_v28 }
 0x1e6   :  { %2937 = vmatprep.subr.mxu1 %v2802_v49  ;;  %v1577_v56 = vsel %vm1571_vm0, %v1558_v1, %v5473_v18  ;;  %v1578_v46 = vsel %vm1571_vm0, %v5474_v47, %v1558_v1  ;;  %v5475_v54 = vld [vmem:[#allocation40_spill] sm:$0xff] }
 0x1e7   :  { %v400_v24 = vsel %vm5415_vm10, %v5475_v54, %v4550_v5  ;;  %2938 = vmatpush1.msra.mxu1 %v2801_v23  ;;  %1550 = vst [vmem:[#allocation2 + $0x1c0] sm:$0xf0] %v1534_v63  ;;  %v1626_v49 = vmul.f32 %v1592_v33, %v1578_v46  ;;  %v1627_v10 = vmul.f32 %v1596_v8, %v1577_v56  ;;  %vm1265_vm10 = vcmp.lt.s32.totalorder %v3916_v2, 9  ;;  %v1385_v28 = vld [vmem:[#allocation6 + $0x42] ss:$8 sm:$0xf] }
 0x1e8   :  { %v453_v22 = vmul.f32 %v428_v53, %v400_v24  ;;  %v2113_v32 = vmul.f32 %v2085_v58, %v400_v24  ;;  %1565 = vrot.lane.b32.xlu1 %v3742_v39, %s3647_s12  ;;  %v1290_v53 = vrot.slane %v4566_v61, %v3919_v3  ;;  %v1804_v58 = vrot.slane %v4300_v36, %v3922_v4  ;;  %v1386_v29 = vld [vmem:[#allocation6 + $0x42] ss:$8 sm:$0xf0] }
 0x1e9   :  { %1567 = vrot.lane.b32.xlu0 %v3738_v34, %s3647_s12  ;;  %1634 = vst [vmem:[#allocation2 + $0x228] sm:$0xf] %v1626_v49  ;;  %1635 = vst [vmem:[#allocation2 + $0x178] sm:$0xf] %v1627_v10  ;;  %v4572_v1 = vpop.permute.xlu1 %1561  ;;  %v4574_v23 = vpop.permute.xlu0 %1963  ;;  %v5478_v56 = vld [vmem:[#allocation37_spill] sm:$0xff]  ;;  %v5479_v54 = vld [vmem:[#allocation36_spill] sm:$0xff] }
 0x1ea   :  { %461 = vst [vmem:[#allocation2 + $0x360] sm:$0xf] %v453_v22  ;;  %2121 = vst [vmem:[#allocation2 + $0x50] sm:$0xf] %v2113_v32  ;;  %v1576_v33 = vsel %vm1571_vm0, %v5473_v18, %v4572_v1  ;;  %v1975_v8 = vsel %vm1971_vm11, %v4332_v55, %v4574_v23  ;;  %v1286_v22 = vrot.slane %v4566_v61, %v3940_v14 }
 0x1eb   :  { %5476 = vst [vmem:[#allocation32_spill] sm:$0xff] %v4572_v1  ;;  %v1628_v10 = vmul.f32 %v1600_v40, %v1576_v33  ;;  %v2028_v32 = vmul.f32 %v2000_v52, %v1975_v8  ;;  %v2793_v52 = vld [vmem:[#allocation2 + $0x68] sm:$0xff]  ;;  %v1294_v33 = vrot.slane %v4566_v61, %v3922_v4 }
 0x1ec   :  { %1257 = vrot.lane.b32.xlu1 %v5470_v51, %s3648_s13  ;;  %v2794_v55 = vld [vmem:[#allocation2 + $0x78] sm:$0xff] }
 0x1ed   :  { %1259 = vrot.lane.b32.xlu0 %v3742_v39, %s3648_s13  ;;  %1636 = vst [vmem:[#allocation2 + $0x200] sm:$0xf] %v1628_v10  ;;  %v2044_v63 = vrot.slane %v2028_v32, 4  ;;  %v1252_v18 = vpop.permute.xlu1 %1251  ;;  %2939 = vmatprep.subr.mxu1 %v2794_v55  ;;  %v4595_v40 = vpop.permute.xlu0 %1767  ;;  %v4609_v55 = vor.u32 %v1386_v29, %v1385_v28 }
 0x1ee   :  { %5477 = vst [vmem:[#allocation12_spill] sm:$0xff] %v4595_v40  ;;  %v1271_v46 = vsel %vm1265_vm10, %v1252_v18, %v5478_v56  ;;  %v1272_v24 = vsel %vm1265_vm10, %v5479_v54, %v1252_v18  ;;  %v1779_v49 = vsel %vm5420_vm12, %v4379_v37, %v4595_v40  ;;  %2940 = vmatpush1.msra.mxu1 %v2793_v52  ;;  %vm5427_vm12 = vcmp.lt.s32.totalorder %v3916_v2, 8 }
 0x1ef   :  { %2060 = vst [vmem:[#allocation2 + $0xc8] sm:$0xf0] %v2044_v63  ;;  %v1320_v8 = vmul.f32 %v1286_v22, %v1272_v24  ;;  %v1321_v10 = vmul.f32 %v1290_v53, %v1271_v46  ;;  %v1832_v32 = vmul.f32 %v1804_v58, %v1779_v49  ;;  %5480 = vst [vmem:[#allocation35_spill] sm:$0xff] %v4609_v55  ;;  %v2785_v22 = vld [vmem:[#allocation2 + $0x1e0] sm:$0xff]  ;;  %v5483_v24 = vld [vmem:[#allocation39_spill] sm:$0xff] }
 0x1f0   :  { %1261 = vrot.lane.b32.xlu1 %v3738_v34, %s3648_s13  ;;  %v2760_v18 = vld [vmem:[#allocation2 + $0x228] sm:$0xff]  ;;  %v1914_v37 = vrot.slane %v4358_v48, %v3922_v4  ;;  %v1396_v28 = vrot.slane %v4609_v55, %v3940_v14  ;;  %v1400_v29 = vrot.slane %v4609_v55, %v3919_v3  ;;  %v2823_v3 = vld [vmem:[%s5369_s5] sm:$0xf]  ;;  %v5482_v14 = vld [vmem:[#allocation42_spill] sm:$0xff] }
 0x1f1   :  { %1367 = vrot.lane.b32.xlu0 %v5470_v51, %s3649_s14  ;;  %v2786_v1 = vld [vmem:[#allocation2 + $0x50] sm:$0xff]  ;;  %v1336_v52 = vrot.slane %v1320_v8, 4  ;;  %v1337_v40 = vrot.slane %v1321_v10, 4  ;;  %v1848_v36 = vrot.slane %v1832_v32, 4  ;;  %v4617_v63 = vpop.permute.xlu1 %1255  ;;  %2876 = vmatprep.subr.mxu0 %v2760_v18  ;;  %v1404_v32 = vrot.slane %v4609_v55, %v3922_v4 }
 0x1f2   :  { %5481 = vst [vmem:[#allocation34_spill] sm:$0xff] %v4617_v63  ;;  %2941 = vmatprep.subr.mxu1 %v2786_v1  ;;  %v1270_v51 = vsel %vm1265_vm10, %v5478_v56, %v4617_v63  ;;  %v4623_v53 = vpop.permute.xlu0 %1877 }
 0x1f3   :  { %2942 = vmatpush1.msra.mxu1 %v2785_v22  ;;  %1352 = vst [vmem:[#allocation2 + $0x298] sm:$0xf0] %v1336_v52  ;;  %1353 = vst [vmem:[#allocation2 + $0xb8] sm:$0xf0] %v1337_v40  ;;  %v1322_v58 = vmul.f32 %v1294_v33, %v1270_v51  ;;  %v1889_v1 = vsel %vm1885_vm13, %v4425_v44, %v4623_v53  ;;  %v3151_v44 = vld [vmem:[%s5371_s7] sm:$0xff] }
 0x1f4   :  { %1864 = vst [vmem:[#allocation2 + $0xb0] sm:$0xf0] %v1848_v36  ;;  %v1942_v56 = vmul.f32 %v1914_v37, %v1889_v1  ;;  %1369 = vrot.lane.b32.xlu1 %v3742_v39, %s3649_s14  ;;  %v1718_v36 = vrot.slane %v4407_v57, %v3922_v4  ;;  %v5485_v51 = vld [vmem:[#allocation20_spill] sm:$0xff]  ;;  %v1588_v1 = vrot.slane %v4501_v62, %v3937_v13 }
 0x1f5   :  { %1371 = vrot.lane.b32.xlu0 %v3738_v34, %s3649_s14  ;;  %v1338_v40 = vrot.slane %v1322_v58, 4  ;;  %v1362_v46 = vpop.permute.xlu1 %1361  ;;  %v4672_v4 = vsub.s32 7, %v5485_v51 }
 0x1f6   :  { %1950 = vst [vmem:[#allocation2 + $0xc8] sm:$0xf] %v1942_v56  ;;  %v1381_v34 = vsel %vm5427_vm12, %v1362_v46, %v5482_v14  ;;  %v1382_v39 = vsel %vm5427_vm12, %v5483_v24, %v1362_v46  ;;  %v4652_v49 = vpop.permute.xlu0 %1681  ;;  %v4679_v56 = vsub.s32 5, %v5485_v51  ;;  %v2777_v46 = vld [vmem:[#allocation2 + $0xa8] sm:$0xff] }
 0x1f7   :  { %1354 = vst [vmem:[#allocation2 + $0x170] sm:$0xf0] %v1338_v40  ;;  %v1430_v33 = vmul.f32 %v1396_v28, %v1382_v39  ;;  %v1431_v8 = vmul.f32 %v1400_v29, %v1381_v34  ;;  %v1693_v10 = vsel %vm1689_vm14, %v4476_v12, %v4652_v49  ;;  %v4669_v12 = vsub.s32 6, %v5485_v51  ;;  %v2761_v51 = vld [vmem:[#allocation2 + $0x178] sm:$0xff] }
 0x1f8   :  { %v1746_v18 = vmul.f32 %v1718_v36, %v1693_v10  ;;  %2826 = vperm.xlu1 %3558, %v2823_v3   ;;  %v1196_v3 = vrot.slane %v3942_v15, %v3937_v13  ;;  %v1224_v34 = vrot.slane %v3942_v15, %v4672_v4 }
 0x1f9   :  { %3154 = vperm.xlu0 %3557, %v3151_v44   ;;  %1438 = vst [vmem:[#allocation2 + $0x2f0] sm:$0xf] %v1430_v33  ;;  %1439 = vst [vmem:[#allocation2 + $0x358] sm:$0xf] %v1431_v8  ;;  %v4660_v37 = vpop.permute.xlu1 %1365  ;;  %v1392_v44 = vrot.slane %v4609_v55, %v3937_v13  ;;  %v2681_v39 = vrot.slane %v3944_v16, %v4669_v12  ;;  %v632_v8 = vrot.slane %v4195_v25, %v4669_v12 }
 0x1fa   :  { %5484 = vst [vmem:[#allocation40_spill] sm:$0xff] %v4660_v37  ;;  %1754 = vst [vmem:[#allocation2 + $0xb0] sm:$0xf] %v1746_v18  ;;  %v1380_v52 = vsel %vm5427_vm12, %v5482_v14, %v4660_v37  ;;  %v4666_v22 = vpop.permute.xlu0 %1065  ;;  %v2745_v63 = vld [vmem:[#allocation2 + $0xb8] sm:$0xff] }
 0x1fb   :  { %v1432_v58 = vmul.f32 %v1404_v32, %v1380_v52 }
 0x1fd   :  { %1440 = vst [vmem:[#allocation2 + $0x1c0] sm:$0xf] %v1432_v58  ;;  %v4676_v28 = vpop.permute.xlu1 %1569  ;;  %v2778_v29 = vld [vmem:[#allocation2 + $0xc8] sm:$0xff]  ;;  %v5489_v58 = vld [vmem:[#allocation23_spill] sm:$0xff] }
 0x1fe   :  { %5486 = vst [vmem:[#allocation37_spill] sm:$0xff] %v4676_v28  ;;  %v1579_v36 = vsel %vm1571_vm0, %v4676_v28, %v5474_v47  ;;  %2943 = vmatprep.subr.mxu1 %v2778_v29  ;;  %v4685_v40 = vpop.permute.xlu0 %1175  ;;  %v2685_v47 = vrot.slane %v3944_v16, %v4672_v4  ;;  %v2762_v29 = vld [vmem:[#allocation2 + $0x200] sm:$0xff]  ;;  %v2746_v55 = vld [vmem:[#allocation2 + $0x170] sm:$0xff] }
 0x1ff   :  { %v1625_v14 = vmul.f32 %v1588_v1, %v1579_v36  ;;  %2944 = vmatpush1.msra.mxu1 %v2777_v46 }
 0x201   :  { %1633 = vst [vmem:[#allocation2 + $0x2b8] sm:$0xf] %v1625_v14  ;;  %v4705_v18 = vpop.permute.xlu1 %1373  ;;  %v2770_v52 = vld [vmem:[#allocation2 + $0xb0] sm:$0xff]  ;;  %v2769_v14 = vld [vmem:[#allocation2 + $0x1c8] sm:$0xff] }
 0x202   :  { %5487 = vst [vmem:[#allocation36_spill] sm:$0xff] %v4705_v18  ;;  %v1383_v36 = vsel %vm5427_vm12, %v4705_v18, %v5483_v24  ;;  %2945 = vmatprep.subr.mxu1 %v2770_v52  ;;  %v4719_v46 = vpop.permute.xlu0 %869  ;;  %v5488_v24 = vld [vmem:[#allocation22_spill] sm:$0xff]  ;;  %vm2829_vm12 = vcmask 883712  }
 0x203   :  { %v1429_v32 = vmul.f32 %v1392_v44, %v1383_v36  ;;  %2946 = vmatpush1.msra.mxu1 %v2769_v14  ;;  %v5490_v14 = vld [vmem:[#allocation13_spill] sm:$0xff] }
 0x204   :  { %2947 = vmatprep.subr.mxu1 %v2762_v29  ;;  %v2754_v33 = vld [vmem:[#allocation2 + $0x1c0] sm:$0xff]  ;;  %v2753_v29 = vld [vmem:[#allocation2 + $0x358] sm:$0xff] }
 0x205   :  { %1437 = vst [vmem:[#allocation2 + $0x1f8] sm:$0xf] %v1429_v32  ;;  %2948 = vmatpush1.msra.mxu1 %v2761_v51  ;;  %v1178_v10 = vpop.permute.xlu1 %1177 }
 0x206   :  { %v1180_v36 = vsel %vm1179_vm2, %v4685_v40, %v1178_v10  ;;  %v1187_v32 = vsel %vm1179_vm2, %v1178_v10, %v5490_v14  ;;  %2949 = vmatprep.subr.mxu1 %v2754_v33  ;;  %v4755_v51 = vpop.permute.xlu0 %979  ;;  %v5501_v33 = vld [vmem:[#allocation26_spill] sm:$0xff]  ;;  %v5510_v10 = vrot.slane %v5489_v58, %v4303_v31 }
 0x207   :  { %v1233_v52 = vmul.f32 %v1196_v3, %v1187_v32  ;;  %v1240_v44 = vmul.f32 %v1224_v34, %v1180_v36  ;;  %v2700_v1 = vmul.f32 %v2681_v39, %v1180_v36  ;;  %v2701_v37 = vmul.f32 %v2685_v47, %v1187_v32  ;;  %2950 = vmatpush1.msra.mxu1 %v2753_v29  ;;  %v2738_v34 = vld [vmem:[#allocation2 + $0x260] sm:$0xff]  ;;  %v2752_v39 = vld [vmem:[#allocation2 + $0x2f0] sm:$0xff]  ;;  %v2730_v3 = vld [vmem:[#allocation2 + $0x198] sm:$0xff] }
 0x208   :  { %2951 = vmatprep.subr.mxu1 %v2746_v55  ;;  %v2759_v28 = vld [vmem:[#allocation2 + $0x2b8] sm:$0xff]  ;;  %v5492_v32 = vrot.slane %v4029_v41, %v3937_v13  ;;  %v5493_v36 = vrot.slane %v4029_v41, %v4672_v4 }
 0x209   :  { %1241 = vst [vmem:[#allocation2 + $0xd8] sm:$0xf] %v1233_v52  ;;  %1248 = vst [vmem:[#allocation2 + $0xf0] sm:$0xf] %v1240_v44  ;;  %2952 = vmatpush1.msra.mxu1 %v2745_v63  ;;  %v982_v55 = vpop.permute.xlu1 %981  ;;  %2877 = vmatpush1.msra.mxu0 %v2759_v28  ;;  %v2737_v28 = vld [vmem:[#allocation2 + $0x1a0] sm:$0xff]  ;;  %v2729_v44 = vld [vmem:[#allocation2 + $0x2d0] sm:$0xff] }
 0x20a   :  { %2708 = vst [vmem:[#allocation2 + $0x1b0] sm:$0xf] %v2700_v1  ;;  %2709 = vst [vmem:[#allocation2 + $0x150] sm:$0xf] %v2701_v37  ;;  %v984_v52 = vsel %vm983_vm5, %v4755_v51, %v982_v55  ;;  %v5491_v1 = vld [vmem:[#allocation17_spill] sm:$0xff]  ;;  %2953 = vmatprep.subr.mxu1 %v2738_v34  ;;  %v4781_v37 = vpop.permute.xlu0 %673  ;;  %2878 = vmatprep.subr.mxu0 %v2752_v39  ;;  %v5495_v39 = vrot.slane %v4031_v42, %v4672_v4 }
 0x20b   :  { %v991_v63 = vsel %vm983_vm5, %v982_v55, %v5491_v1  ;;  %v1044_v47 = vmul.f32 %v5493_v36, %v984_v52  ;;  %v5494_v55 = vrot.slane %v4031_v42, %v4669_v12  ;;  %2954 = vmatpush1.msra.mxu1 %v2737_v28  ;;  %v5497_v36 = vrot.slane %v4113_v26, %v3937_v13 }
 0x20c   :  { %v1037_v29 = vmul.f32 %v5492_v32, %v991_v63  ;;  %v2555_v1 = vmul.f32 %v5495_v39, %v991_v63  ;;  %2955 = vmatprep.subr.mxu1 %v2730_v3  ;;  %v2722_v3 = vld [vmem:[#allocation2 + $0x318] sm:$0xff] }
 0x20d   :  { %v2554_v34 = vmul.f32 %v5494_v55, %v984_v52  ;;  %1052 = vst [vmem:[#allocation2 + $0x38] sm:$0xf] %v1044_v47  ;;  %2956 = vmatpush1.msra.mxu1 %v2729_v44  ;;  %v786_v63 = vpop.permute.xlu1 %785  ;;  %v5496_v52 = vld [vmem:[#allocation24_spill] sm:$0xff]  ;;  %v2721_v44 = vld [vmem:[#allocation2 + $0x90] sm:$0xff] }
 0x20e   :  { %1045 = vst [vmem:[#allocation2 + $0x350] sm:$0xf] %v1037_v29  ;;  %2563 = vst [vmem:[#allocation2 + $0x250] sm:$0xf] %v2555_v1  ;;  %v795_v47 = vsel %vm787_vm7, %v786_v63, %v5496_v52  ;;  %2957 = vmatprep.subr.mxu1 %v2722_v3  ;;  %v4816_v29 = vpop.permute.xlu0 %783  ;;  %v5498_v52 = vrot.slane %v4115_v45, %v4672_v4  ;;  %v4836_v1 = vld [vmem:[%s5368_s4] sm:$0xf] }
 0x20f   :  { %2562 = vst [vmem:[#allocation2 + $0x180] sm:$0xf] %v2554_v34  ;;  %v841_v55 = vmul.f32 %v5497_v36, %v795_v47  ;;  %v788_v28 = vsel %vm787_vm7, %v4816_v29, %v786_v63  ;;  %2958 = vmatpush1.msra.mxu1 %v2721_v44  ;;  %v2714_v34 = vld [vmem:[#allocation2 + $0x48] sm:$0xff]  ;;  %v5499_v36 = vrot.slane %v4113_v26, %v4672_v4  ;;  %v2713_v63 = vld [vmem:[#allocation2 + $0x10] sm:$0xff] }
 0x210   :  { %v2409_v3 = vmul.f32 %v5498_v52, %v795_v47  ;;  %v5500_v47 = vrot.slane %v4115_v45, %v4669_v12  ;;  %2959 = vmatprep.subr.mxu1 %v2714_v34 }
 0x211   :  { %v848_v32 = vmul.f32 %v5499_v36, %v788_v28  ;;  %v2822_v44 = vld [vmem:[#allocation2 + $0x150] sm:$0xf]  ;;  %849 = vst [vmem:[#allocation2 + $0x28] sm:$0xf] %v841_v55  ;;  %2960 = vmatpush1.msra.mxu1 %v2713_v63  ;;  %v4850_v39 = vpop.permute.xlu1 %589  ;;  %v5505_v36 = vmov 0.0  }
 0x212   :  { %v2408_v52 = vmul.f32 %v5500_v47, %v788_v28  ;;  %v2821_v14 = vld [vmem:[#allocation2 + $0x1b0] sm:$0xf]  ;;  %2417 = vst [vmem:[#allocation2 + $0x290] sm:$0xf] %v2409_v3  ;;  %v599_v55 = vsel %vm591_vm9, %v4850_v39, %v5501_v33  ;;  %3513 = vmatmul.mubr.msk.f32.vlgmr.msra.gmra.mxu1 %vm2829_vm12, %v4836_v1  ;;  %3517 = vmatprep.subr.msk.mxu1 %vm2833_vm4, %v2822_v44  ;;  %v4867_v3 = vpop.permute.xlu0 %1459 }
 0x213   :  { %856 = vst [vmem:[#allocation2 + $0x278] sm:$0xf] %v848_v32  ;;  %5502 = vst [vmem:[#allocation42_spill] sm:$0xff] %v4867_v3  ;;  %v5503_v32 = vrot.slane %v4195_v25, %v3937_v13  ;;  %v5504_v33 = vrot.slane %v4197_v30, %v4672_v4  ;;  %v1469_v44 = vsel %vm1461_vm15, %v4867_v3, %v5469_v7  ;;  %3518 = vmatpush1.msk.msra.mxu1 %vm2833_vm4, %v2821_v14 }
 0x214   :  { %2416 = vst [vmem:[#allocation2 + $0x308] sm:$0xf] %v2408_v52  ;;  %3135 = vmatprep.mubr.f32.mxu1 %v5505_v36  ;;  %v5506_v47 = vrot.slane %v4459_v50, %v3937_v13 }
 0x215   :  { %v645_v52 = vmul.f32 %v5503_v32, %v599_v55  ;;  %v2263_v28 = vmul.f32 %v5504_v33, %v599_v55  ;;  %v1064_v7 = vpop.permute.xlu1 %1063  ;;  %v5509_v33 = vrot.slane %v5488_v24, %v4669_v12 }
 0x216   :  { %v1515_v63 = vmul.f32 %v5506_v47, %v1469_v44  ;;  %v4902_v34 = vpop.permute.xlu0 %1263 }
 0x217   :  { %653 = vst [vmem:[#allocation2 + $0x108] sm:$0xf] %v645_v52  ;;  %2271 = vst [vmem:[#allocation2 + $0x70] sm:$0xf] %v2263_v28  ;;  %v1071_v28 = vsel %vm1069_vm1, %v1064_v7, %v4666_v22  ;;  %v1072_v52 = vsel %vm1069_vm1, %v4360_v19, %v1064_v7  ;;  %v1273_v47 = vsel %vm1265_vm10, %v4902_v34, %v5479_v54 }
 0x218   :  { %v1531_v32 = vrot.slane %v1515_v63, 4  ;;  %5507 = vst [vmem:[#allocation39_spill] sm:$0xff] %v4902_v34  ;;  %v5508_v63 = vrot.slane %v5488_v24, %v4679_v56  ;;  %v1129_v55 = vmul.f32 %v5509_v33, %v1071_v28  ;;  %v2613_v19 = vmul.f32 %v5510_v10, %v1072_v52 }
 0x219   :  { %v5511_v7 = vrot.slane %v4566_v61, %v3937_v13  ;;  %v5512_v54 = vrot.slane %v5489_v58, %v4679_v56  ;;  %v1174_v62 = vpop.permute.xlu1 %1173  ;;  %v2235_v10 = vrot.slane %v4197_v30, %v4303_v31 }
 0x21a   :  { %v1128_v44 = vmul.f32 %v5508_v63, %v1072_v52  ;;  %1547 = vst [vmem:[#allocation2 + $0x1f8] sm:$0xf0] %v1531_v32  ;;  %v628_v63 = vrot.slane %v4195_v25, %v4679_v56  ;;  %v1145_v34 = vrot.slane %v1129_v55, 4  ;;  %v2629_v3 = vrot.slane %v2613_v19, 4 }
 0x21b   :  { %v1319_v14 = vmul.f32 %v5511_v7, %v1273_v47  ;;  %v2614_v18 = vmul.f32 %v5512_v54, %v1071_v28  ;;  %v1068_v47 = vpop.permute.xlu0 %1067  ;;  %v1181_v28 = vsel %vm1179_vm2, %v1174_v62, %v4685_v40  ;;  %v1182_v7 = vsel %vm1179_vm2, %v4381_v9, %v1174_v62 }
 0x21c   :  { %v1144_v33 = vrot.slane %v1128_v44, 4  ;;  %1161 = vst [vmem:[#allocation2 + $0x1e8] sm:$0xf0] %v1145_v34  ;;  %2645 = vst [vmem:[#allocation2 + $0x88] sm:$0xf0] %v2629_v3  ;;  %v1070_v55 = vsel %vm1069_vm1, %v4666_v22, %v1068_v47  ;;  %v5513_v44 = vld [vmem:[#allocation14_spill] sm:$0xff]  ;;  %v5515_v40 = vrot.slane %v3942_v15, %v4669_v12  ;;  %v5516_v9 = vrot.slane %v5488_v24, %v3937_v13 }
 0x21d   :  { %v1335_v32 = vrot.slane %v1319_v14, 4  ;;  %v2630_v52 = vrot.slane %v2614_v18, 4  ;;  %v1077_v18 = vsel %vm1069_vm1, %v1068_v47, %v5513_v44  ;;  %v5514_v14 = vrot.slane %v3942_v15, %v4679_v56 }
 0x21e   :  { %1160 = vst [vmem:[#allocation2 + $0x130] sm:$0xf0] %v1144_v33  ;;  %v1239_v54 = vmul.f32 %v5515_v40, %v1181_v28  ;;  %v1123_v62 = vmul.f32 %v5516_v9, %v1077_v18  ;;  %v5517_v22 = vrot.slane %v5488_v24, %v4672_v4  ;;  %v5518_v3 = vrot.slane %v5489_v58, %v4669_v12  ;;  %v868_v24 = vpop.permute.xlu1 %867 }
 0x21f   :  { %v1238_v19 = vmul.f32 %v5514_v14, %v1182_v7  ;;  %1351 = vst [vmem:[#allocation2 + $0xd8] sm:$0xf0] %v1335_v32  ;;  %2646 = vst [vmem:[#allocation2 + $0x368] sm:$0xf0] %v2630_v52  ;;  %v5519_v47 = vrot.slane %v5489_v58, %v4672_v4  ;;  %v5520_v15 = vrot.slane %v3944_v16, %v4303_v31  ;;  %vm5548_vm1 = vcmp.lt.s32.totalorder %v3916_v2, 73 }
 0x220   :  { %v1130_v34 = vmul.f32 %v5517_v22, %v1070_v55  ;;  %v2615_v33 = vmul.f32 %v5518_v3, %v1070_v55  ;;  %1247 = vst [vmem:[#allocation2 + $0x320] sm:$0xf] %v1239_v54  ;;  %v5521_v52 = vrot.slane %v3944_v16, %v4679_v56  ;;  %v2239_v40 = vrot.slane %v4197_v30, %v4679_v56  ;;  %v872_v54 = vpop.permute.xlu0 %871  ;;  %v5522_v16 = vld [vmem:[#allocation15_spill] sm:$0xff]  ;;  %vm5565_vm2 = vmmov %vm5548_vm1 }
 0x221   :  { %v2616_v44 = vmul.f32 %v5519_v47, %v1077_v18  ;;  %1246 = vst [vmem:[#allocation2 + $0xa0] sm:$0xf] %v1238_v19  ;;  %v2698_v32 = vmul.f32 %v5520_v15, %v1182_v7  ;;  %v1139_v9 = vrot.slane %v1123_v62, 4  ;;  %v874_v7 = vsel %vm873_vm3, %v4719_v46, %v872_v54 }
 0x222   :  { %v2699_v14 = vmul.f32 %v5521_v52, %v1181_v28  ;;  %v1146_v58 = vrot.slane %v1130_v34, 4  ;;  %v2631_v18 = vrot.slane %v2615_v33, 4  ;;  %v881_v28 = vsel %vm873_vm3, %v872_v54, %v5522_v16  ;;  %v2751_v34 = vld [vmem:[#allocation2 + $0x1f8] sm:$0xff]  ;;  %v978_v16 = vpop.permute.xlu1 %977 }
 0x223   :  { %v2632_v19 = vrot.slane %v2616_v44, 4  ;;  %2706 = vst [vmem:[#allocation2] sm:$0xf] %v2698_v32  ;;  %v875_v22 = vsel %vm873_vm3, %v868_v24, %v4719_v46  ;;  %v876_v62 = vsel %vm873_vm3, %v4401_v21, %v868_v24  ;;  %1155 = vst [vmem:[#allocation2 + $0x350] sm:$0xf0] %v1139_v9  ;;  %v5523_v3 = vrot.slane %v3988_v59, %v3937_v13  ;;  %v2744_v52 = vld [vmem:[#allocation2 + $0x298] sm:$0xff] }
 0x224   :  { %2707 = vst [vmem:[#allocation2 + $0x2a0] sm:$0xf] %v2699_v14  ;;  %1162 = vst [vmem:[#allocation2 + $0x38] sm:$0xf0] %v1146_v58  ;;  %v5524_v47 = vrot.slane %v3988_v59, %v4672_v4  ;;  %v5525_v46 = vrot.slane %v3990_v60, %v4669_v12  ;;  %v5526_v21 = vrot.slane %v3990_v60, %v4672_v4  ;;  %2879 = vmatpush1.msra.mxu0 %v2751_v34 }
 0x225   :  { %2647 = vst [vmem:[#allocation2 + $0x180] sm:$0xf0] %v2631_v18  ;;  %2648 = vst [vmem:[#allocation2 + $0x250] sm:$0xf0] %v2632_v19  ;;  %v927_v33 = vmul.f32 %v5523_v3, %v881_v28  ;;  %v5527_v14 = vrot.slane %v3988_v59, %v4679_v56  ;;  %v5528_v9 = vrot.slane %v3988_v59, %v4669_v12  ;;  %2880 = vmatprep.subr.mxu0 %v2744_v52 }
 0x226   :  { %v934_v44 = vmul.f32 %v5524_v47, %v874_v7  ;;  %v2469_v15 = vmul.f32 %v5525_v46, %v874_v7  ;;  %v2470_v32 = vmul.f32 %v5526_v21, %v881_v28  ;;  %v5529_v18 = vrot.slane %v3990_v60, %v4303_v31  ;;  %v676_v46 = vpop.permute.xlu0 %675  ;;  %vm5567_vm3 = vmmov %vm5548_vm1 }
 0x227   :  { %v932_v24 = vmul.f32 %v5527_v14, %v876_v62  ;;  %v933_v58 = vmul.f32 %v5528_v9, %v875_v22  ;;  %v5530_v54 = vrot.slane %v3990_v60, %v4679_v56  ;;  %v943_v28 = vrot.slane %v927_v33, 4  ;;  %v2743_v9 = vld [vmem:[#allocation2 + $0xd8] sm:$0xff] }
 0x228   :  { %v2467_v19 = vmul.f32 %v5529_v18, %v876_v62  ;;  %v950_v34 = vrot.slane %v934_v44, 4  ;;  %v2485_v3 = vrot.slane %v2469_v15, 4  ;;  %v2486_v47 = vrot.slane %v2470_v32, 4  ;;  %2881 = vmatpush1.msra.mxu0 %v2743_v9  ;;  %v2736_v15 = vld [vmem:[#allocation2 + $0x120] sm:$0xff] }
 0x229   :  { %v2468_v7 = vmul.f32 %v5530_v54, %v875_v22  ;;  %v948_v21 = vrot.slane %v932_v24, 4  ;;  %v949_v14 = vrot.slane %v933_v58, 4  ;;  %959 = vst [vmem:[#allocation2 + $0x28] sm:$0xf0] %v943_v28  ;;  %v678_v60 = vsel %vm677_vm6, %v4781_v37, %v676_v46  ;;  %v5531_v22 = vld [vmem:[#allocation16_spill] sm:$0xff]  ;;  %2882 = vmatprep.subr.mxu0 %v2736_v15  ;;  %v672_v54 = vpop.permute.xlu1 %671  ;;  %v2728_v15 = vld [vmem:[#allocation2 + $0x330] sm:$0xff] }
 0x22a   :  { %v2483_v55 = vrot.slane %v2467_v19, 4  ;;  %966 = vst [vmem:[#allocation2 + $0x278] sm:$0xf0] %v950_v34  ;;  %2501 = vst [vmem:[#allocation2 + $0x308] sm:$0xf0] %v2485_v3  ;;  %v685_v62 = vsel %vm677_vm6, %v676_v46, %v5531_v22  ;;  %v985_v33 = vsel %vm983_vm5, %v978_v16, %v4755_v51  ;;  %v986_v44 = vsel %vm983_vm5, %v4427_v20, %v978_v16  ;;  %v2735_v22 = vld [vmem:[#allocation2 + $0x350] sm:$0xff] }
 0x22b   :  { %v2484_v59 = vrot.slane %v2468_v7, 4  ;;  %2502 = vst [vmem:[#allocation2 + $0x290] sm:$0xf0] %v2486_v47  ;;  %964 = vst [vmem:[#allocation2 + $0x158] sm:$0xf0] %v948_v21  ;;  %v5532_v32 = vrot.slane %v4072_v6, %v3937_v13  ;;  %v5533_v24 = vrot.slane %v4072_v6, %v4672_v4  ;;  %v5534_v51 = vrot.slane %v4074_v17, %v4669_v12  ;;  %v5049_v21 = vpop.permute.xlu0 %479 }
 0x22c   :  { %965 = vst [vmem:[#allocation2 + $0x2e0] sm:$0xf0] %v949_v14  ;;  %2499 = vst [vmem:[#allocation2 + $0x280] sm:$0xf0] %v2483_v55  ;;  %v5535_v20 = vrot.slane %v4074_v17, %v4672_v4  ;;  %v5536_v55 = vrot.slane %v4029_v41, %v4679_v56  ;;  %v5537_v16 = vrot.slane %v4029_v41, %v4669_v12  ;;  %v5540_v41 = vld [vmem:[#allocation18_spill] sm:$0xff]  ;;  %2883 = vmatpush1.msra.mxu0 %v2735_v22  ;;  %v5547_v22 = vld [vmem:[#allocation19_spill] sm:$0xff] }
 0x22d   :  { %2500 = vst [vmem:[#allocation2 + $0x300] sm:$0xf0] %v2484_v59  ;;  %v731_v52 = vmul.f32 %v5532_v32, %v685_v62  ;;  %v738_v58 = vmul.f32 %v5533_v24, %v678_v60  ;;  %v2323_v18 = vmul.f32 %v5534_v51, %v678_v60  ;;  %v5538_v34 = vrot.slane %v4031_v42, %v4303_v31  ;;  %v2813_v32 = vld [vmem:[#allocation2 + $0x180] sm:$0xff]  ;;  %vm5568_vm5 = vmmov %vm5548_vm1 }
 0x22e   :  { %v2324_v19 = vmul.f32 %v5535_v20, %v685_v62  ;;  %v1042_v7 = vmul.f32 %v5536_v55, %v986_v44  ;;  %v1043_v28 = vmul.f32 %v5537_v16, %v985_v33  ;;  %v5539_v47 = vrot.slane %v4031_v42, %v4679_v56  ;;  %v2814_v62 = vld [vmem:[#allocation2 + $0x250] sm:$0xff]  ;;  %2884 = vmatprep.subr.mxu0 %v2728_v15 }
 0x22f   :  { %v2552_v3 = vmul.f32 %v5538_v34, %v986_v44  ;;  %v747_v14 = vrot.slane %v731_v52, 4  ;;  %v754_v59 = vrot.slane %v738_v58, 4  ;;  %v2339_v9 = vrot.slane %v2323_v18, 4  ;;  %3077 = vmatprep.subr.mxu1 %v2814_v62 }
 0x230   :  { %v2553_v46 = vmul.f32 %v5539_v47, %v985_v33  ;;  %v2340_v60 = vrot.slane %v2324_v19, 4  ;;  %1050 = vst [vmem:[#allocation2 + $0x130] sm:$0xf] %v1042_v7  ;;  %1051 = vst [vmem:[#allocation2 + $0x1e8] sm:$0xf] %v1043_v28  ;;  %v489_v44 = vsel %vm481_vm8, %v5049_v21, %v5540_v41  ;;  %v679_v42 = vsel %vm677_vm6, %v672_v54, %v4781_v37  ;;  %v782_v19 = vpop.permute.xlu1 %781  ;;  %v5079_v28 = vpop.permute.xlu0 %392 }
 0x231   :  { %2560 = vst [vmem:[#allocation2 + $0x88] sm:$0xf] %v2552_v3  ;;  %v680_v33 = vsel %vm677_vm6, %v4453_v35, %v672_v54  ;;  %763 = vst [vmem:[#allocation2 + $0x108] sm:$0xf0] %v747_v14  ;;  %v5541_v52 = vrot.slane %v5464_v38, %v3937_v13  ;;  %v5542_v58 = vrot.slane %v5465_v0, %v4672_v4  ;;  %3078 = vmatpush1.msra.mxu1 %v2813_v32 }
 0x232   :  { %2561 = vst [vmem:[#allocation2 + $0x368] sm:$0xf] %v2553_v46  ;;  %770 = vst [vmem:[#allocation2 + $0x2d8] sm:$0xf0] %v754_v59  ;;  %v5543_v51 = vrot.slane %v4072_v6, %v4679_v56  ;;  %v5544_v18 = vrot.slane %v4072_v6, %v4669_v12  ;;  %v5545_v54 = vrot.slane %v4074_v17, %v4303_v31  ;;  %v2727_v59 = vld [vmem:[#allocation2 + $0x28] sm:$0xff]  ;;  %vm5573_vm6 = vcmp.lt.s32.totalorder %v3916_v2, 121 }
 0x233   :  { %2355 = vst [vmem:[#allocation2 + $0x2c8] sm:$0xf0] %v2339_v9  ;;  %2356 = vst [vmem:[#allocation2 + $0x70] sm:$0xf0] %v2340_v60  ;;  %v535_v24 = vmul.f32 %v5541_v52, %v489_v44  ;;  %v2178_v37 = vmul.f32 %v5542_v58, %v489_v44  ;;  %v5546_v7 = vrot.slane %v4074_v17, %v4679_v56  ;;  %v2806_v9 = vld [vmem:[#allocation2 + $0x290] sm:$0xff]  ;;  %2885 = vmatpush1.msra.mxu0 %v2727_v59  ;;  %v2805_v44 = vld [vmem:[#allocation2 + $0x308] sm:$0xff] }
 0x234   :  { %v736_v35 = vmul.f32 %v5543_v51, %v680_v33  ;;  %v737_v20 = vmul.f32 %v5544_v18, %v679_v42  ;;  %v2321_v55 = vmul.f32 %v5545_v54, %v680_v33  ;;  %v789_v34 = vsel %vm787_vm7, %v782_v19, %v4816_v29  ;;  %3079 = vmatprep.subr.mxu1 %v2806_v9  ;;  %v476_v51 = vpop.permute.xlu1 %475  ;;  %v478_v18 = vpop.permute.xlu0 %477 }
 0x235   :  { %v2322_v16 = vmul.f32 %v5546_v7, %v679_v42  ;;  %v790_v6 = vsel %vm787_vm7, %v4478_v27, %v782_v19  ;;  %v551_v3 = vrot.slane %v535_v24, 4  ;;  %v2194_v47 = vrot.slane %v2178_v37, 4  ;;  %v2720_v27 = vld [vmem:[#allocation2 + $0x110] sm:$0xff]  ;;  %3080 = vmatpush1.msra.mxu1 %v2805_v44  ;;  %vm5574_vm7 = vmmov %vm5573_vm6 }
 0x236   :  { %v752_v46 = vrot.slane %v736_v35, 4  ;;  %v753_v14 = vrot.slane %v737_v20, 4  ;;  %v2337_v60 = vrot.slane %v2321_v55, 4  ;;  %v404_v62 = vsel %vm5548_vm1, %v5079_v28, %v5547_v22  ;;  %2886 = vmatprep.subr.mxu0 %v2720_v27  ;;  %v5555_v20 = vld [vmem:[#allocation30_spill] sm:$0xff] }
 0x237   :  { %v2338_v17 = vrot.slane %v2322_v16, 4  ;;  %v5549_v29 = vrot.slane %v4113_v26, %v4679_v56  ;;  %567 = vst [vmem:[#allocation2 + $0x2b0] sm:$0xf0] %v551_v3  ;;  %2210 = vst [vmem:[#allocation2 + $0x60] sm:$0xf0] %v2194_v47  ;;  %v5550_v42 = vrot.slane %v4236_v43, %v3937_v13  ;;  %v5551_v15 = vrot.slane %v4238_v11, %v4672_v4 }
 0x238   :  { %768 = vst [vmem:[#allocation2 + $0x100] sm:$0xf0] %v752_v46  ;;  %769 = vst [vmem:[#allocation2 + $0x58] sm:$0xf0] %v753_v14  ;;  %v5552_v52 = vrot.slane %v4113_v26, %v4669_v12  ;;  %v5553_v58 = vrot.slane %v4115_v45, %v4303_v31  ;;  %v5554_v13 = vrot.slane %v4115_v45, %v4679_v56  ;;  %v586_v27 = vpop.permute.xlu1 %585 }
 0x239   :  { %v846_v41 = vmul.f32 %v5549_v29, %v790_v6  ;;  %v449_v33 = vmul.f32 %v5550_v42, %v404_v62  ;;  %v2117_v32 = vmul.f32 %v5551_v15, %v404_v62  ;;  %2353 = vst [vmem:[#allocation2 + $0x188] sm:$0xf0] %v2337_v60  ;;  %2354 = vst [vmem:[#allocation2 + $0x238] sm:$0xf0] %v2338_v17  ;;  %v2719_v17 = vld [vmem:[#allocation2 + $0x108] sm:$0xff] }
 0x23a   :  { %v847_v24 = vmul.f32 %v5552_v52, %v789_v34  ;;  %v2406_v37 = vmul.f32 %v5553_v58, %v790_v6  ;;  %v2407_v35 = vmul.f32 %v5554_v13, %v789_v34  ;;  %v484_v26 = vsel %vm481_vm8, %v5555_v20, %v476_v51  ;;  %v2798_v22 = vld [vmem:[#allocation2 + $0x70] sm:$0xff]  ;;  %2887 = vmatpush1.msra.mxu0 %v2719_v17  ;;  %v5562_v58 = vld [vmem:[#allocation33_spill] sm:$0xff] }
 0x23b   :  { %854 = vst [vmem:[#allocation2 + $0x158] sm:$0xf] %v846_v41  ;;  %v2097_v19 = vrot.slane %v4238_v11, %v4669_v12  ;;  %v432_v54 = vrot.slane %v4236_v43, %v4679_v56  ;;  %457 = vst [vmem:[#allocation2 + $0x2b0] sm:$0xf] %v449_v33  ;;  %v482_v45 = vsel %vm481_vm8, %v478_v18, %v5049_v21  ;;  %3081 = vmatprep.subr.mxu1 %v2798_v22  ;;  %v2712_v41 = vld [vmem:[#allocation2 + $0xd0] sm:$0xff] }
 0x23c   :  { %2125 = vst [vmem:[#allocation2 + $0x60] sm:$0xf] %v2117_v32  ;;  %855 = vst [vmem:[#allocation2 + $0x2e0] sm:$0xf] %v847_v24  ;;  %v483_v55 = vsel %vm481_vm8, %v476_v51, %v478_v18  ;;  %v5556_v7 = vrot.slane %v5464_v38, %v4679_v56  ;;  %v5557_v34 = vrot.slane %v5465_v0, %v4303_v31  ;;  %2888 = vmatprep.subr.mxu0 %v2712_v41  ;;  %v5570_v41 = vld [vmem:[#allocation41_spill] sm:$0xff] }
 0x23d   :  { %2414 = vst [vmem:[#allocation2 + $0x280] sm:$0xf] %v2406_v37  ;;  %2415 = vst [vmem:[#allocation2 + $0x300] sm:$0xf] %v2407_v35  ;;  %v5558_v3 = vrot.slane %v5464_v38, %v4672_v4  ;;  %v5559_v46 = vrot.slane %v5465_v0, %v4669_v12  ;;  %v5560_v14 = vrot.slane %v5464_v38, %v4669_v12 }
 0x23e   :  { %v540_v16 = vmul.f32 %v5556_v7, %v484_v26  ;;  %v2175_v6 = vmul.f32 %v5557_v34, %v484_v26  ;;  %v5561_v9 = vrot.slane %v5465_v0, %v4679_v56  ;;  %v436_v44 = vrot.slane %v4236_v43, %v4669_v12  ;;  %v588_v0 = vpop.permute.xlu0 %587  ;;  %v389_v7 = vpop.permute.xlu1 %388  ;;  %vm5576_vm8 = vmmov %vm5573_vm6 }
 0x23f   :  { %v542_v47 = vmul.f32 %v5558_v3, %v482_v45  ;;  %v2177_v21 = vmul.f32 %v5559_v46, %v482_v45  ;;  %v541_v59 = vmul.f32 %v5560_v14, %v483_v55  ;;  %v2089_v42 = vrot.slane %v4238_v11, %v4303_v31 }
 0x240   :  { %v2176_v60 = vmul.f32 %v5561_v9, %v483_v55  ;;  %v556_v62 = vrot.slane %v540_v16, 4  ;;  %v2191_v29 = vrot.slane %v2175_v6, 4  ;;  %v592_v52 = vsel %vm591_vm9, %v588_v0, %v4850_v39 }
 0x241   :  { %v558_v38 = vrot.slane %v542_v47, 4  ;;  %v2193_v33 = vrot.slane %v2177_v21, 4  ;;  %v557_v15 = vrot.slane %v541_v59, 4  ;;  %v593_v24 = vsel %vm591_vm9, %v586_v27, %v588_v0  ;;  %v2820_v59 = vld [vmem:[#allocation2 + $0x2a0] sm:$0xf] }
 0x242   :  { %v2192_v32 = vrot.slane %v2176_v60, 4  ;;  %572 = vst [vmem:[#allocation2 + $0x328] sm:$0xf0] %v556_v62  ;;  %2207 = vst [vmem:[#allocation2 + $0x80] sm:$0xf0] %v2191_v29  ;;  %v594_v37 = vsel %vm591_vm9, %v5562_v58, %v586_v27  ;;  %v2093_v51 = vrot.slane %v4238_v11, %v4679_v56  ;;  %v5563_v13 = vrot.slane %v4195_v25, %v4672_v4  ;;  %v2711_v16 = vld [vmem:[#allocation2 + $0x2b0] sm:$0xff]  ;;  %v391_v34 = vpop.permute.xlu0 %390 }
 0x243   :  { %574 = vst [vmem:[#allocation2 + $0x378] sm:$0xf0] %v558_v38  ;;  %2209 = vst [vmem:[#allocation2 + $0x160] sm:$0xf0] %v2193_v33  ;;  %v5564_v39 = vrot.slane %v4197_v30, %v4669_v12  ;;  %v650_v20 = vmul.f32 %v628_v63, %v594_v37  ;;  %v651_v26 = vmul.f32 %v632_v8, %v593_v24  ;;  %v5566_v8 = vld [vmem:[#allocation38_spill] sm:$0xff]  ;;  %2889 = vmatpush1.msra.mxu0 %v2711_v16 }
 0x244   :  { %573 = vst [vmem:[#allocation2 + $0x40] sm:$0xf0] %v557_v15  ;;  %2208 = vst [vmem:[#allocation2 + $0x1f0] sm:$0xf0] %v2192_v32  ;;  %v652_v35 = vmul.f32 %v5563_v13, %v592_v52  ;;  %v2260_v45 = vmul.f32 %v2235_v10, %v594_v37  ;;  %v2261_v55 = vmul.f32 %v2239_v40, %v593_v24  ;;  %3510 = vmatmul.mubr.msk.f32.vlgmr.msra.gmra.mxu0 %vm2829_vm12, %v4836_v1  ;;  %v2804_v29 = vld [vmem:[#allocation2 + $0x300] sm:$0xff] }
 0x245   :  { %v2262_v18 = vmul.f32 %v5564_v39, %v592_v52  ;;  %658 = vst [vmem:[#allocation2 + $0x100] sm:$0xf] %v650_v20  ;;  %659 = vst [vmem:[#allocation2 + $0x58] sm:$0xf] %v651_v26  ;;  %v399_v25 = vsel %vm5565_vm2, %v4550_v5, %v389_v7  ;;  %v2004_v63 = vrot.slane %v5566_v8, %v4303_v31  ;;  %3514 = vmatprep.subr.msk.mxu0 %vm2833_vm4, %v2820_v59  ;;  %v5571_v52 = vld [vmem:[#allocation27_spill] sm:$0xff]  ;;  %v2790_v37 = vld [vmem:[#allocation2 + $0x60] sm:$0xff] }
 0x246   :  { %660 = vst [vmem:[#allocation2 + $0x2d8] sm:$0xf] %v652_v35  ;;  %v2008_v10 = vrot.slane %v5566_v8, %v4679_v56  ;;  %2268 = vst [vmem:[#allocation2 + $0x188] sm:$0xf] %v2260_v45  ;;  %v397_v30 = vsel %vm5567_vm3, %v391_v34, %v5079_v28  ;;  %v398_v40 = vsel %vm5568_vm5, %v389_v7, %v391_v34  ;;  %v2819_v28 = vld [vmem:[#allocation2] sm:$0xf]  ;;  %3064 = vmatprep.mubr.f32.mxu0 %v5505_v36  ;;  %v1968_v11 = vpop.permute.xlu0 %1967 }
 0x247   :  { %2270 = vst [vmem:[#allocation2 + $0x2c8] sm:$0xf] %v2262_v18  ;;  %2269 = vst [vmem:[#allocation2 + $0x238] sm:$0xf] %v2261_v55  ;;  %v454_v6 = vmul.f32 %v432_v54, %v399_v25  ;;  %v2114_v3 = vmul.f32 %v2089_v42, %v399_v25  ;;  %v5569_v5 = vrot.slane %v4236_v43, %v4672_v4  ;;  %v1966_v54 = vpop.permute.xlu1 %1965  ;;  %3515 = vmatpush1.msk.msra.mxu0 %vm2833_vm4, %v2819_v28  ;;  %v2812_v43 = vld [vmem:[#allocation2 + $0x368] sm:$0xff]  ;;  %v5572_v13 = vld [vmem:[#allocation12_spill] sm:$0xff] }
 0x248   :  { %v2116_v46 = vmul.f32 %v2097_v19, %v397_v30  ;;  %v455_v21 = vmul.f32 %v436_v44, %v398_v40  ;;  %v2115_v14 = vmul.f32 %v2093_v51, %v398_v40  ;;  %v1974_v1 = vsel %vm1971_vm11, %v4574_v23, %v1966_v54  ;;  %3006 = vmatprep.subr.mxu0 %v2812_v43  ;;  %v2811_v19 = vld [vmem:[#allocation2 + $0x88] sm:$0xff]  ;;  %v2803_v23 = vld [vmem:[#allocation2 + $0x280] sm:$0xff]  ;;  %vm5577_vm9 = vmmov %vm5573_vm6 }
 0x249   :  { %v456_v47 = vmul.f32 %v5569_v5, %v397_v30  ;;  %462 = vst [vmem:[#allocation2 + $0x328] sm:$0xf] %v454_v6  ;;  %2122 = vst [vmem:[#allocation2 + $0x80] sm:$0xf] %v2114_v3  ;;  %v1973_v9 = vsel %vm1971_vm11, %v1966_v54, %v1968_v11  ;;  %v2029_v60 = vmul.f32 %v2004_v63, %v1974_v1  ;;  %3007 = vmatpush1.msra.mxu0 %v2811_v19  ;;  %v5575_v40 = vld [vmem:[#allocation21_spill] sm:$0xff] }
 0x24a   :  { %2124 = vst [vmem:[#allocation2 + $0x160] sm:$0xf] %v2116_v46  ;;  %463 = vst [vmem:[#allocation2 + $0x40] sm:$0xf] %v455_v21  ;;  %v2012_v17 = vrot.slane %v5566_v8, %v4669_v12  ;;  %v2016_v22 = vrot.slane %v5566_v8, %v4672_v4  ;;  %v2030_v62 = vmul.f32 %v2008_v10, %v1973_v9  ;;  %3008 = vmatprep.subr.mxu0 %v2804_v29  ;;  %v1770_v15 = vpop.permute.xlu0 %1769 }
 0x24b   :  { %464 = vst [vmem:[#allocation2 + $0x378] sm:$0xf] %v456_v47  ;;  %2123 = vst [vmem:[#allocation2 + $0x1f0] sm:$0xf] %v2115_v14  ;;  %v1808_v27 = vrot.slane %v5570_v41, %v4303_v31  ;;  %v2045_v44 = vrot.slane %v2029_v60, 4  ;;  %v1970_v38 = vpop.permute.xlu1 %1969  ;;  %3009 = vmatpush1.msra.mxu0 %v2803_v23  ;;  %v1812_v51 = vrot.slane %v5570_v41, %v4679_v56  ;;  %v5578_v23 = vld [vmem:[#allocation28_spill] sm:$0xff] }
 0x24c   :  { %v2046_v33 = vrot.slane %v2030_v62, 4  ;;  %v1972_v0 = vsel %vm1971_vm11, %v1968_v11, %v1970_v38  ;;  %v1979_v24 = vsel %vm1971_vm11, %v1970_v38, %v5571_v52  ;;  %v1778_v35 = vsel %vm5573_vm6, %v5572_v13, %v1770_v15  ;;  %v5579_v52 = vld [vmem:[#allocation25_spill] sm:$0xff] }
 0x24d   :  { %v2795_v58 = vld [vmem:[#allocation2 + $0x188] sm:$0xff]  ;;  %2061 = vst [vmem:[#allocation2 + $0x338] sm:$0xf0] %v2045_v44  ;;  %v2031_v39 = vmul.f32 %v2012_v17, %v1972_v0  ;;  %v2032_v18 = vmul.f32 %v2016_v22, %v1979_v24  ;;  %v1833_v20 = vmul.f32 %v1808_v27, %v1778_v35  ;;  %v1820_v26 = vrot.slane %v5570_v41, %v4672_v4 }
 0x24e   :  { %v2797_v42 = vld [vmem:[#allocation2 + $0x2c8] sm:$0xff]  ;;  %v2796_v32 = vld [vmem:[#allocation2 + $0x238] sm:$0xff]  ;;  %2062 = vst [vmem:[#allocation2 + $0x230] sm:$0xf0] %v2046_v33  ;;  %v1816_v45 = vrot.slane %v5570_v41, %v4669_v12  ;;  %v1774_v10 = vpop.permute.xlu0 %1773  ;;  %v1918_v47 = vrot.slane %v4358_v48, %v4303_v31  ;;  %v1922_v14 = vrot.slane %v4358_v48, %v4679_v56  ;;  %v1722_v17 = vrot.slane %v4407_v57, %v4303_v31 }
 0x24f   :  { %3082 = vmatpush1.msra.mxu1 %v2797_v42  ;;  %3010 = vmatprep.subr.mxu0 %v2796_v32  ;;  %v2047_v7 = vrot.slane %v2031_v39, 4  ;;  %v2048_v16 = vrot.slane %v2032_v18, 4  ;;  %v1772_v8 = vpop.permute.xlu1 %1771  ;;  %v1849_v63 = vrot.slane %v1833_v20, 4  ;;  %v1783_v6 = vsel %vm5576_vm8, %v1774_v10, %v5575_v40 }
 0x250   :  { %3083 = vmatprep.subr.mxu1 %v2790_v37  ;;  %3011 = vmatpush1.msra.mxu0 %v2795_v58  ;;  %v2787_v55 = vld [vmem:[#allocation2 + $0x80] sm:$0xff]  ;;  %v1777_v30 = vsel %vm5574_vm7, %v1770_v15, %v1772_v8  ;;  %v1776_v3 = vsel %vm5577_vm9, %v1772_v8, %v1774_v10  ;;  %v1836_v46 = vmul.f32 %v1820_v26, %v1783_v6  ;;  %vm5588_vm11 = vcmp.lt.s32.totalorder %v3916_v2, 8 }
 0x251   :  { %v2789_v34 = vld [vmem:[#allocation2 + $0x160] sm:$0xff]  ;;  %2063 = vst [vmem:[#allocation2 + $0xc0] sm:$0xf0] %v2047_v7  ;;  %2064 = vst [vmem:[#allocation2 + $0x128] sm:$0xf0] %v2048_v16  ;;  %v1834_v5 = vmul.f32 %v1812_v51, %v1777_v30  ;;  %v1835_v21 = vmul.f32 %v1816_v45, %v1776_v3  ;;  %v1926_v22 = vrot.slane %v4358_v48, %v4669_v12  ;;  %v5580_v7 = vld [vmem:[#allocation31_spill] sm:$0xff] }
 0x252   :  { %v2788_v25 = vld [vmem:[#allocation2 + $0x1f0] sm:$0xff]  ;;  %3084 = vmatpush1.msra.mxu1 %v2789_v34  ;;  %1865 = vst [vmem:[#allocation2 + $0x138] sm:$0xf0] %v1849_v63  ;;  %v1852_v54 = vrot.slane %v1836_v46, 4  ;;  %v1882_v11 = vpop.permute.xlu0 %1881  ;;  %v1930_v62 = vrot.slane %v4358_v48, %v4672_v4  ;;  %v1734_v41 = vrot.slane %v4407_v57, %v4672_v4  ;;  %v1726_v48 = vrot.slane %v4407_v57, %v4679_v56  ;;  %v5581_v34 = vld [vmem:[#allocation29_spill] sm:$0xff] }
 0x253   :  { %3012 = vmatprep.subr.mxu0 %v2788_v25  ;;  %v1850_v59 = vrot.slane %v1834_v5, 4  ;;  %v1880_v28 = vpop.permute.xlu1 %1879  ;;  %v1851_v43 = vrot.slane %v1835_v21, 4  ;;  %v1730_v32 = vrot.slane %v4407_v57, %v4669_v12  ;;  %v1494_v51 = vrot.slane %v4459_v50, %v4303_v31 }
 0x254   :  { %3013 = vmatpush1.msra.mxu0 %v2787_v55  ;;  %v1888_v1 = vsel %vm1885_vm13, %v4623_v53, %v1880_v28  ;;  %v1887_v19 = vsel %vm1885_vm13, %v1880_v28, %v1882_v11  ;;  %1868 = vst [vmem:[#allocation2 + $0x1d8] sm:$0xf0] %v1852_v54  ;;  %v1498_v39 = vrot.slane %v4459_v50, %v4679_v56  ;;  %v5583_v28 = vld [vmem:[#allocation42_spill] sm:$0xff] }
 0x255   :  { %1866 = vst [vmem:[#allocation2 + $0x2c0] sm:$0xf0] %v1850_v59  ;;  %v1943_v9 = vmul.f32 %v1918_v47, %v1888_v1  ;;  %1867 = vst [vmem:[#allocation2 + $0xe8] sm:$0xf0] %v1851_v43  ;;  %v1944_v60 = vmul.f32 %v1922_v14, %v1887_v19  ;;  %v1604_v25 = vrot.slane %v5581_v34, %v4303_v31  ;;  %v5582_v14 = vld [vmem:[#allocation32_spill] sm:$0xff] }
 0x256   :  { %v1684_v53 = vpop.permute.xlu0 %1683  ;;  %v1502_v10 = vrot.slane %v4459_v50, %v4669_v12  ;;  %v1506_v30 = vrot.slane %v4459_v50, %v4672_v4  ;;  %v1616_v21 = vrot.slane %v5581_v34, %v4672_v4  ;;  %v1608_v43 = vrot.slane %v5581_v34, %v4679_v56 }
 0x257   :  { %1951 = vst [vmem:[#allocation2 + $0x338] sm:$0xf] %v1943_v9  ;;  %1952 = vst [vmem:[#allocation2 + $0x230] sm:$0xf] %v1944_v60  ;;  %v1884_v29 = vpop.permute.xlu1 %1883  ;;  %v1692_v27 = vsel %vm1689_vm14, %v4652_v49, %v1684_v53  ;;  %v1612_v9 = vrot.slane %v5581_v34, %v4669_v12 }
 0x258   :  { %v1886_v44 = vsel %vm1885_vm13, %v1882_v11, %v1884_v29  ;;  %v1893_v42 = vsel %vm1885_vm13, %v1884_v29, %v5578_v23  ;;  %v1747_v38 = vmul.f32 %v1722_v17, %v1692_v27  ;;  %v5584_v23 = vld [vmem:[#allocation37_spill] sm:$0xff] }
 0x259   :  { %v1945_v33 = vmul.f32 %v1926_v22, %v1886_v44  ;;  %v1946_v15 = vmul.f32 %v1930_v62, %v1893_v42  ;;  %v1298_v44 = vrot.slane %v4566_v61, %v4303_v31 }
 0x25a   :  { %1755 = vst [vmem:[#allocation2 + $0x138] sm:$0xf] %v1747_v38  ;;  %v1688_v49 = vpop.permute.xlu0 %1687 }
 0x25b   :  { %1953 = vst [vmem:[#allocation2 + $0xc0] sm:$0xf] %v1945_v33  ;;  %1954 = vst [vmem:[#allocation2 + $0x128] sm:$0xf] %v1946_v15  ;;  %v1686_v0 = vpop.permute.xlu1 %1685  ;;  %v1697_v24 = vsel %vm1689_vm14, %v1688_v49, %v5579_v52 }
 0x25c   :  { %v1690_v58 = vsel %vm1689_vm14, %v1686_v0, %v1688_v49  ;;  %v1691_v37 = vsel %vm1689_vm14, %v1684_v53, %v1686_v0  ;;  %v1750_v13 = vmul.f32 %v1734_v41, %v1697_v24  ;;  %v1302_v49 = vrot.slane %v4566_v61, %v4679_v56 }
 0x25d   :  { %v1748_v57 = vmul.f32 %v1726_v48, %v1691_v37  ;;  %v1749_v35 = vmul.f32 %v1730_v32, %v1690_v58  ;;  %v5585_v58 = vld [vmem:[#allocation34_spill] sm:$0xff] }
 0x25e   :  { %v2779_v18 = vld [vmem:[#allocation2 + $0x338] sm:$0xff]  ;;  %v2780_v20 = vld [vmem:[#allocation2 + $0x230] sm:$0xff]  ;;  %1758 = vst [vmem:[#allocation2 + $0x1d8] sm:$0xf] %v1750_v13  ;;  %v1456_v26 = vpop.permute.xlu0 %1455 }
 0x25f   :  { %1756 = vst [vmem:[#allocation2 + $0x2c0] sm:$0xf] %v1748_v57  ;;  %1757 = vst [vmem:[#allocation2 + $0xe8] sm:$0xf] %v1749_v35  ;;  %3014 = vmatprep.subr.mxu0 %v2780_v20  ;;  %v1454_v45 = vpop.permute.xlu1 %1453 }
 0x260   :  { %v1464_v55 = vsel %vm1461_vm15, %v1454_v45, %v1456_v26  ;;  %v1465_v16 = vsel %vm1461_vm15, %v5580_v7, %v1454_v45  ;;  %3015 = vmatpush1.msra.mxu0 %v2779_v18  ;;  %v1310_v18 = vrot.slane %v4566_v61, %v4672_v4 }
 0x261   :  { %v1519_v8 = vmul.f32 %v1494_v51, %v1465_v16  ;;  %v1520_v63 = vmul.f32 %v1498_v39, %v1464_v55  ;;  %v2771_v27 = vld [vmem:[#allocation2 + $0x138] sm:$0xff]  ;;  %v1306_v39 = vrot.slane %v4566_v61, %v4669_v12  ;;  %v5587_v16 = vld [vmem:[#allocation40_spill] sm:$0xff] }
 0x262   :  { %v2782_v40 = vld [vmem:[#allocation2 + $0x128] sm:$0xff]  ;;  %v2781_v6 = vld [vmem:[#allocation2 + $0xc0] sm:$0xff]  ;;  %v1564_v47 = vpop.permute.xlu0 %1563  ;;  %v5586_v51 = vld [vmem:[#allocation35_spill] sm:$0xff] }
 0x263   :  { %v1535_v3 = vrot.slane %v1519_v8, 4  ;;  %v1536_v5 = vrot.slane %v1520_v63, 4  ;;  %3085 = vmatprep.subr.mxu1 %v2782_v40  ;;  %v1458_v46 = vpop.permute.xlu1 %1457  ;;  %v1575_v59 = vsel %vm1571_vm0, %v5582_v14, %v1564_v47  ;;  %v1408_v13 = vrot.slane %v5586_v51, %v4303_v31  ;;  %v5589_v31 = vld [vmem:[#allocation39_spill] sm:$0xff] }
 0x264   :  { %v1462_v54 = vsel %vm1461_vm15, %v1458_v46, %v5583_v28  ;;  %v1463_v50 = vsel %vm1461_vm15, %v1456_v26, %v1458_v46  ;;  %3086 = vmatpush1.msra.mxu1 %v2781_v6  ;;  %v1629_v11 = vmul.f32 %v1604_v25, %v1575_v59  ;;  %v1420_v7 = vrot.slane %v5586_v51, %v4672_v4 }
 0x265   :  { %1551 = vst [vmem:[#allocation2 + $0x248] sm:$0xf0] %v1535_v3  ;;  %1552 = vst [vmem:[#allocation2 + $0x340] sm:$0xf0] %v1536_v5  ;;  %v1521_v1 = vmul.f32 %v1502_v10, %v1463_v50  ;;  %v1522_v19 = vmul.f32 %v1506_v30, %v1462_v54  ;;  %v2774_v17 = vld [vmem:[#allocation2 + $0x1d8] sm:$0xff]  ;;  %v1412_v61 = vrot.slane %v5586_v51, %v4679_v56  ;;  %v5590_v56 = vld [vmem:[#allocation36_spill] sm:$0xff] }
 0x266   :  { %v2772_v60 = vld [vmem:[#allocation2 + $0x2c0] sm:$0xff]  ;;  %v2773_v22 = vld [vmem:[#allocation2 + $0xe8] sm:$0xff]  ;;  %1637 = vst [vmem:[#allocation2 + $0x2e8] sm:$0xf] %v1629_v11  ;;  %v1568_v29 = vpop.permute.xlu0 %1567  ;;  %3087 = vmatprep.subr.mxu1 %v2774_v17  ;;  %v1416_v4 = vrot.slane %v5586_v51, %v4669_v12  ;;  %vm3157_vm15 = vcmask 31744  }
 0x267   :  { %v1537_v62 = vrot.slane %v1521_v1, 4  ;;  %v1538_v53 = vrot.slane %v1522_v19, 4  ;;  %3016 = vmatprep.subr.mxu0 %v2772_v60  ;;  %v1566_v41 = vpop.permute.xlu1 %1565  ;;  %v1572_v42 = vsel %vm1571_vm0, %v1568_v29, %v5584_v23  ;;  %3088 = vmatpush1.msra.mxu1 %v2773_v22  ;;  %v2731_v23 = vld [vmem:[#allocation2 + $0x1a8] sm:$0xff] }
 0x268   :  { %v1573_v48 = vsel %vm1571_vm0, %v1566_v41, %v1568_v29  ;;  %v1574_v38 = vsel %vm1571_vm0, %v1564_v47, %v1566_v41  ;;  %3017 = vmatpush1.msra.mxu0 %v2771_v27  ;;  %v1632_v33 = vmul.f32 %v1616_v21, %v1572_v42  ;;  %v2739_v29 = vld [vmem:[#allocation2 + $0xe0] sm:$0xff]  ;;  %v2741_v41 = vld [vmem:[#allocation2 + $0x1e8] sm:$0xff]  ;;  %v2732_v27 = vld [vmem:[#allocation2 + $0x158] sm:$0xff] }
 0x269   :  { %1553 = vst [vmem:[#allocation2 + $0x2a8] sm:$0xf0] %v1537_v62  ;;  %1554 = vst [vmem:[#allocation2 + $0x310] sm:$0xf0] %v1538_v53  ;;  %v1630_v15 = vmul.f32 %v1608_v43, %v1574_v38  ;;  %v1631_v32 = vmul.f32 %v1612_v9, %v1573_v48  ;;  %v2740_v62 = vld [vmem:[#allocation2 + $0x130] sm:$0xff]  ;;  %v2742_v53 = vld [vmem:[#allocation2 + $0x38] sm:$0xff] }
 0x26a   :  { %1640 = vst [vmem:[#allocation2 + $0x268] sm:$0xf] %v1632_v33  ;;  %v1260_v0 = vpop.permute.xlu0 %1259  ;;  %v2733_v42 = vld [vmem:[#allocation2 + $0x2e0] sm:$0xff]  ;;  %v2726_v38 = vld [vmem:[#allocation2 + $0x2d8] sm:$0xff]  ;;  %v2723_v33 = vld [vmem:[#allocation2 + $0x148] sm:$0xff] }
 0x26b   :  { %1638 = vst [vmem:[#allocation2 + $0x208] sm:$0xf] %v1630_v15  ;;  %1639 = vst [vmem:[#allocation2 + $0x2f8] sm:$0xf] %v1631_v32  ;;  %v1258_v52 = vpop.permute.xlu1 %1257  ;;  %v2724_v48 = vld [vmem:[#allocation2 + $0x100] sm:$0xff]  ;;  %v2725_v15 = vld [vmem:[#allocation2 + $0x58] sm:$0xff] }
 0x26c   :  { %v1268_v24 = vsel %vm1265_vm10, %v1258_v52, %v1260_v0  ;;  %v1269_v37 = vsel %vm1265_vm10, %v5585_v58, %v1258_v52  ;;  %v2716_v32 = vld [vmem:[#allocation2 + $0x328] sm:$0xff]  ;;  %v2717_v52 = vld [vmem:[#allocation2 + $0x40] sm:$0xff] }
 0x26d   :  { %v1323_v57 = vmul.f32 %v1298_v44, %v1269_v37  ;;  %v1324_v35 = vmul.f32 %v1302_v49, %v1268_v24  ;;  %v2763_v14 = vld [vmem:[#allocation2 + $0x2e8] sm:$0xff]  ;;  %v2734_v44 = vld [vmem:[#allocation2 + $0x278] sm:$0xff]  ;;  %v3559_v24 = vld [vmem:[%s5368_s4] sm:$0xf]  ;;  %s3650_s4 = smov [#allocation8]  }
 0x26e   :  { %v1368_v45 = vpop.permute.xlu0 %1367  ;;  %v2718_v49 = vld [vmem:[#allocation2 + $0x378] sm:$0xff] }
 0x26f   :  { %v1339_v20 = vrot.slane %v1323_v57, 4  ;;  %v1340_v26 = vrot.slane %v1324_v35, 4  ;;  %v1262_v55 = vpop.permute.xlu1 %1261  ;;  %v1379_v34 = vsel %vm5588_vm11, %v5587_v16, %v1368_v45 }
 0x270   :  { %v1266_v25 = vsel %vm1265_vm10, %v1262_v55, %v5589_v31  ;;  %v1267_v8 = vsel %vm1265_vm10, %v1260_v0, %v1262_v55  ;;  %v1433_v63 = vmul.f32 %v1408_v13, %v1379_v34  ;;  %vm5591_vm10 = vmmov %vm5588_vm11  ;;  %v2715_v0 = vld [vmem:[#allocation2 + $0x360] sm:$0xff] }
 0x271   :  { %1355 = vst [vmem:[#allocation2 + $0x98] sm:$0xf0] %v1339_v20  ;;  %1356 = vst [vmem:[#allocation2 + $0xa0] sm:$0xf0] %v1340_v26  ;;  %v1325_v10 = vmul.f32 %v1306_v39, %v1267_v8  ;;  %v1326_v30 = vmul.f32 %v1310_v18, %v1266_v25  ;;  %v2766_v40 = vld [vmem:[#allocation2 + $0x268] sm:$0xff]  ;;  %v3150_v18 = vld [vmem:[%s5370_s6] sm:$0xff] }
 0x272   :  { %v2764_v6 = vld [vmem:[#allocation2 + $0x208] sm:$0xff]  ;;  %v2765_v3 = vld [vmem:[#allocation2 + $0x2f8] sm:$0xff]  ;;  %1441 = vst [vmem:[#allocation2 + $0x248] sm:$0xf] %v1433_v63  ;;  %v1372_v46 = vpop.permute.xlu0 %1371  ;;  %3089 = vmatprep.subr.mxu1 %v2766_v40  ;;  %vm5592_vm13 = vmmov %vm5591_vm10  ;;  %s3491_s6 = sshll.u32 %s3650_s4, 4  ;;  %s3492_s6 = int_to_ptr.vmem [resolvable:$true] %s3491_s6 }
 0x273   :  { %v1341_v5 = vrot.slane %v1325_v10, 4  ;;  %v1342_v47 = vrot.slane %v1326_v30, 4  ;;  %v1370_v21 = vpop.permute.xlu1 %1369  ;;  %3018 = vmatprep.subr.mxu0 %v2764_v6  ;;  %v1376_v59 = vsel %vm5591_vm10, %v1372_v46, %v5590_v56  ;;  %vm5593_vm14 = vmmov %vm5591_vm10  ;;  %3090 = vmatpush1.msra.mxu1 %v2765_v3  ;;  %s3600_s2 = scalar_lea.vmem %s3492_s6, 1024  ;;  %p3605_p11 = scmp.lt.s32.totalorder %s3492_s6, %s3492_s6 }
 0x274   :  { %v1377_v28 = vsel %vm5592_vm13, %v1370_v21, %v1372_v46  ;;  %v1378_v12 = vsel %vm5593_vm14, %v1368_v45, %v1370_v21  ;;  %3019 = vmatpush1.msra.mxu0 %v2763_v14  ;;  %v1436_v54 = vmul.f32 %v1420_v7, %v1376_v59  ;;  %p3601_p10 = scmp.ne.s32.totalorder %s3492_s6, %s3600_s2  ;;  %p3606_p12 = scmp.lt.s32.totalorder %s3600_s2, %s3600_s2 }
 0x275   :  { %1357 = vst [vmem:[#allocation2 + $0x320] sm:$0xf0] %v1341_v5  ;;  %1358 = vst [vmem:[#allocation2 + $0xf0] sm:$0xf0] %v1342_v47  ;;  %v1434_v50 = vmul.f32 %v1412_v61, %v1378_v12  ;;  %v1435_v43 = vmul.f32 %v1416_v4, %v1377_v28 }
 0x276   :  { %1444 = vst [vmem:[#allocation2 + $0x310] sm:$0xf] %v1436_v54  ;;  %p3607_p13 = por %p3606_p12, %p3605_p11 }
 0x277   :  { %1442 = vst [vmem:[#allocation2 + $0x340] sm:$0xf] %v1434_v50  ;;  %1443 = vst [vmem:[#allocation2 + $0x2a8] sm:$0xf] %v1435_v43  ;;  %v2827_v58 = vpop.permute.xlu1 %2826 }
 0x278   :  { %v2748_v2 = vld [vmem:[#allocation2 + $0xa0] sm:$0xff]  ;;  %v2747_v17 = vld [vmem:[#allocation2 + $0x98] sm:$0xff]  ;;  %p3608_p0 = pnand %p3607_p13, %p3601_p10 }
 0x279   :  { %v2755_v9 = vld [vmem:[#allocation2 + $0x248] sm:$0xff] }
 0x27c   :  { %v2750_v60 = vld [vmem:[#allocation2 + $0xf0] sm:$0xff]  ;;  %v2749_v22 = vld [vmem:[#allocation2 + $0x320] sm:$0xff] }
 0x27d   :  { %v2758_v1 = vld [vmem:[#allocation2 + $0x310] sm:$0xff] }
 0x27e   :  { %v2756_v11 = vld [vmem:[#allocation2 + $0x340] sm:$0xff]  ;;  %v2757_v19 = vld [vmem:[#allocation2 + $0x2a8] sm:$0xff]  ;;  %3091 = vmatprep.subr.mxu1 %v2758_v1 }
 0x27f   :  { %3020 = vmatprep.subr.mxu0 %v2756_v11  ;;  %3092 = vmatpush1.msra.mxu1 %v2757_v19 }
 0x280   :  { %3021 = vmatpush1.msra.mxu0 %v2755_v9  ;;  %3093 = vmatprep.subr.mxu1 %v2750_v60 }
 0x281   :  { %3022 = vmatprep.subr.mxu0 %v2748_v2  ;;  %3094 = vmatpush1.msra.mxu1 %v2749_v22 }
 0x282   :  { %3023 = vmatpush1.msra.mxu0 %v2747_v17  ;;  %3095 = vmatprep.subr.mxu1 %v2742_v53 }
 0x283   :  { %3024 = vmatprep.subr.mxu0 %v2740_v62  ;;  %3096 = vmatpush1.msra.mxu1 %v2741_v41 }
 0x284   :  { %3025 = vmatpush1.msra.mxu0 %v2739_v29  ;;  %3097 = vmatprep.subr.mxu1 %v2734_v44 }
 0x285   :  { %3026 = vmatprep.subr.mxu0 %v2732_v27  ;;  %3098 = vmatpush1.msra.mxu1 %v2733_v42 }
 0x286   :  { %3027 = vmatpush1.msra.mxu0 %v2731_v23  ;;  %3099 = vmatprep.subr.mxu1 %v2726_v38 }
 0x287   :  { %3028 = vmatprep.subr.mxu0 %v2724_v48  ;;  %3100 = vmatpush1.msra.mxu1 %v2725_v15 }
 0x288   :  { %3029 = vmatpush1.msra.mxu0 %v2723_v33  ;;  %3101 = vmatprep.subr.mxu1 %v2718_v49 }
 0x289   :  { %3030 = vmatprep.subr.mxu0 %v2716_v32  ;;  %3102 = vmatpush1.msra.mxu1 %v2717_v52 }
 0x28a   :  { %3031 = vmatpush1.msra.mxu0 %v2715_v0  ;;  %3519 = vmatmul.mubr.msk.f32.vlgmr.msra.gmra.mxu1 %vm2829_vm12, %v3559_v24 }
 0x28b   :  { %3516 = vmatmul.mubr.msk.f32.vlgmr.msra.gmra.mxu0 %vm2829_vm12, %v3559_v24  ;;  %3320 = vmatprep.mubr.f32.mxu1 %v5505_v36 }
 0x28c   :  { %3249 = vmatprep.mubr.f32.mxu0 %v5505_v36 }
 0x2d2   :  { %v2995_v37 = vpop.f32.mrf.mxu1 }
 0x2d3   :  { %v2996_v51 = vadd.f32 %v2995_v37, %v2827_v58 }
 0x2d4   :  { %v2997_v13 = vpop.f32.mrf.mxu1 }
 0x2d5   :  { %v2998_v57 = vadd.f32 %v2997_v13, %v2827_v58  ;;  %v3144_v35 = vmax.f32 %v2996_v51, 0.0 }
 0x2d7   :  { %v3145_v39 = vmax.f32 %v2998_v57, 0.0 }
 0x2d9   :  { %3523 = vmatprep.subr.msk.mxu1 %vm2833_vm4, %v3145_v39 }
 0x2da   :  { %3524 = vmatpush1.msk.msra.mxu1 %vm2833_vm4, %v3144_v35 }
 0x2db   :  { %3525 = vmatmul.mubr.msk.f32.vlgmr.msra.gmra.mxu1 %vm3157_vm15, %v3150_v18 }
 0x2dc   :  { %3462 = vmatprep.mubr.f32.mxu1 %v5505_v36 }
 0x304   :  { %v2924_v20 = vpop.f32.mrf.mxu0 }
 0x305   :  { %v2925_v26 = vadd.f32 %v2924_v20, %v2827_v58 }
 0x306   :  { %v2926_v45 = vpop.f32.mrf.mxu0 }
 0x307   :  { %v2927_v55 = vadd.f32 %v2926_v45, %v2827_v58  ;;  %v3142_v7 = vmax.f32 %v2925_v26, 0.0 }
 0x309   :  { %v3143_v16 = vmax.f32 %v2927_v55, 0.0 }
 0x30b   :  { %3520 = vmatprep.subr.msk.mxu0 %vm2833_vm4, %v3143_v16 }
 0x30c   :  { %3521 = vmatpush1.msk.msra.mxu0 %vm2833_vm4, %v3142_v7 }
 0x30d   :  { %3522 = vmatmul.mubr.msk.f32.vlgmr.msra.gmra.mxu0 %vm3157_vm15, %v3150_v18 }
 0x30e   :  { %3391 = vmatprep.mubr.f32.mxu0 %v5505_v36  ;;  %v3155_v36 = vpop.permute.xlu0 %3154 }
 0x34a   :  { %v3137_v31 = vpop.f32.mrf.mxu1 }
 0x34b   :  { %v3066_v34 = vpop.f32.mrf.mxu0  ;;  %v3138_v8 = vadd.f32 %v3137_v31, %v2827_v58 }
 0x34c   :  { %v3067_v25 = vadd.f32 %v3066_v34, %v2827_v58  ;;  %v3139_v63 = vpop.f32.mrf.mxu1 }
 0x34d   :  { %v3068_v61 = vpop.f32.mrf.mxu0  ;;  %v3140_v30 = vadd.f32 %v3139_v63, %v2827_v58  ;;  %v3148_v3 = vmax.f32 %v3138_v8, 0.0 }
 0x34e   :  { %v3069_v10 = vadd.f32 %v3068_v61, %v2827_v58  ;;  %v3146_v6 = vmax.f32 %v3067_v25, 0.0 }
 0x34f   :  { %v3149_v40 = vmax.f32 %v3140_v30, 0.0 }
 0x350   :  { %v3147_v4 = vmax.f32 %v3069_v10, 0.0 }
 0x351   :  { %3529 = vmatprep.subr.msk.mxu1 %vm2833_vm4, %v3149_v40 }
 0x352   :  { %3526 = vmatprep.subr.msk.mxu0 %vm2833_vm4, %v3147_v4  ;;  %3530 = vmatpush1.msk.msra.mxu1 %vm2833_vm4, %v3148_v3 }
 0x353   :  { %3527 = vmatpush1.msk.msra.mxu0 %vm2833_vm4, %v3146_v6  ;;  %3531 = vmatmul.mubr.msk.f32.vlgmr.msra.gmra.mxu1 %vm3157_vm15, %v3150_v18 }
 0x354   :  { %3528 = vmatmul.mubr.msk.f32.vlgmr.msra.gmra.mxu0 %vm3157_vm15, %v3150_v18 }
 0x39b   :  { %v3322_v5 = vpop.f32.mrf.mxu1 }
 0x39c   :  { %v3323_v47 = vadd.f32 %v3322_v5, %v3155_v36 }
 0x39d   :  { %v3324_v46 = vpop.f32.mrf.mxu1 }
 0x39e   :  { %v3471_v21 = vmax.f32 %v3323_v47, 0.0  ;;  %v3325_v14 = vadd.f32 %v3324_v46, %v3155_v36 }
 0x3a0   :  { %3479 = vst [vmem:[#allocation8 + $0x10] sm:$0xff] %v3471_v21  ;;  %v3472_v56 = vmax.f32 %v3325_v14, 0.0 }
 0x3a2   :  { %3480 = vst [vmem:[#allocation8 + $0x18] sm:$0xff] %v3472_v56 }
 0x3cd   :  { %v3251_v59 = vpop.f32.mrf.mxu0 }
 0x3ce   :  { %v3252_v28 = vadd.f32 %v3251_v59, %v3155_v36 }
 0x3cf   :  { %v3253_v12 = vpop.f32.mrf.mxu0 }
 0x3d0   :  { %v3469_v54 = vmax.f32 %v3252_v28, 0.0  ;;  %v3254_v50 = vadd.f32 %v3253_v12, %v3155_v36 }
 0x3d2   :  { %3477 = vst [vmem:[#allocation8] sm:$0xff] %v3469_v54  ;;  %v3470_v43 = vmax.f32 %v3254_v50, 0.0 }
 0x3d4   :  { %3478 = vst [vmem:[#allocation8 + $0x8] sm:$0xff] %v3470_v43 }
 0x413   :  { %v3464_v1 = vpop.f32.mrf.mxu1 }
 0x414   :  { %v3393_v11 = vpop.f32.mrf.mxu0  ;;  %v3465_v9 = vadd.f32 %v3464_v1, %v3155_v36 }
 0x415   :  { %v3394_v19 = vadd.f32 %v3393_v11, %v3155_v36  ;;  %v3466_v60 = vpop.f32.mrf.mxu1 }
 0x416   :  { %v3395_v2 = vpop.f32.mrf.mxu0  ;;  %v3475_v22 = vmax.f32 %v3465_v9, 0.0  ;;  %v3467_v53 = vadd.f32 %v3466_v60, %v3155_v36 }
 0x417   :  { %v3473_v17 = vmax.f32 %v3394_v19, 0.0  ;;  %v3396_v62 = vadd.f32 %v3395_v2, %v3155_v36 }
 0x418   :  { %3484 = vst [vmem:[#allocation8 + $0x30] sm:$0xff] %v3475_v22  ;;  %v3476_v41 = vmax.f32 %v3467_v53, 0.0 }
 0x419   :  { %3482 = vst [vmem:[#allocation8 + $0x20] sm:$0xff] %v3473_v17  ;;  %v3474_v29 = vmax.f32 %v3396_v62, 0.0 }
 0x41a   :  { %3485 = vst [vmem:[#allocation8 + $0x38] sm:$0xff] %v3476_v41 }
 0x41b   :  { %3483 = vst [vmem:[#allocation8 + $0x28] sm:$0xff] %v3474_v29 }
 0x41c   :  { %3611 = shalt.err (!%p3608_p0)
}
 0x41d   :  { %3497 = dma.vmem_to_hbm [thread:$0]  %s3492_s6, 1024, %s5372_s8, [#allocation5], %s3627_s30, %s3627_s30, %s3628_s9  }
 0x41e   :  { %3624 = dma.done.wait [#allocation5], 1024  }
 0x41f   :  { %3625 = vsyncadd [#allocation5], 4294966272 }
 0x420   :  { %3501 = vsyncpa [#allocation4], 1 }
 0x421   :  { %3502 = vsyncpa [#allocation7], 1 }
 0x422   :  { %3503 = vsyncpa [#allocation5], 1 }

</bundles_post_ra>
